<compile_context>
chip_gen: v6e
topology: v6e:2x2x1
jax: 0.10.0
libtpu: 0.0.40
codegen_flags: <defaults>
</compile_context>

<pallas_src>
import functools

import jax
import jax.numpy as jnp
from jax import lax
from jax.experimental import pallas as pl
from jax.experimental.pallas import tpu as pltpu


# ----------------------------------------------------------------------------
# Small host-side helpers
# ----------------------------------------------------------------------------

def _round_up(x, m):
    return ((x + m - 1) // m) * m


def _pick_bt(batch):
    """Samples per grid step: amortize per-step overhead, keep >= 2 steps."""
    if batch <= 2:
        return 1
    for bt in (8, 4, 2):
        if batch % bt == 0 and batch // bt >= 2:
            return bt
    return 1


def _band_mask_host(L, Wp, W):
    """[1, L] f32 mask zeroing the 2 halo columns of every band row."""
    col = jnp.arange(L, dtype=jnp.int32) % Wp
    return jnp.logical_and(col >= 1, col <= W).astype(jnp.float32).reshape(1, L)


def _vmem_limit(est_elems):
    """Explicit scoped-VMEM request (f32 elems estimate, 2x headroom)."""
    return int(min(48 << 20, max(8 << 20, 8 * est_elems + (2 << 20))))


# ----------------------------------------------------------------------------
# In-kernel helpers (trace-time, shared by the fused kernels)
# ----------------------------------------------------------------------------

def _fill_canvas(cv, x, H, W, Wp):
    """Build a zero-bordered flattened canvas in VMEM from a [C, H*W] value."""
    cv[...] = jnp.zeros_like(cv)
    c = x.shape[0]
    for i in range(H):
        dst = 1 + (i + 1) * Wp + 1
        cv[0:c, dst:dst + W] = x[:, i * W:(i + 1) * W]


def _zero_borders(cv, qs, L, Nc):
    """Zero only the canvas regions the per-sample band write never covers."""
    c = cv.shape[0]
    cv[:, 0:qs] = jnp.zeros((c, qs), jnp.float32)
    cv[:, qs + L:Nc] = jnp.zeros((c, Nc - qs - L), jnp.float32)


def _conv3x3(canvas, w_ref, b_ref, tap_ref, H, Wp, relu):
    """3x3 'same' conv on the canvas band via ONE MXU dot (K = 9*CH).

    canvas: [CH, Nc] VMEM ref (zero borders).  w_ref: [Cout, 9*CH] tap-stacked
    weights.  b_ref: [Cout, 1].  tap_ref: [9*CH, L] staging scratch.
    Returns the [Cout, L] band (halo columns hold garbage; caller masks).
    """
    CH = canvas.shape[0]
    L = H * Wp
    qs = 1 + Wp
    for t in range(9):
        ki, kj = divmod(t, 3)
        start = qs + (ki - 1) * Wp + (kj - 1)
        tap_ref[t * CH:(t + 1) * CH, :] = canvas[:, start:start + L]
    acc = jnp.dot(w_ref[...], tap_ref[...],
                  preferred_element_type=jnp.float32) + b_ref[...]
    if relu:
        acc = jnp.maximum(acc, 0.0)
    return acc


def _lpips_layer(fa, fb, lin_ref, inv_hw, mask=None):
    """One LPIPS layer: channel unit-normalize, squared diff, non-negative
    'lin' weights, spatial mean.  fa, fb: [C, L] bands.  Returns [1, 1]."""
    def _unit(f):
        ss = jnp.sum(f * f, axis=0, keepdims=True)              # [1, L]
        return f * lax.rsqrt(ss + 1e-20)                         # EUP rsqrt

    d = _unit(fa) - _unit(fb)
    wd = jnp.sum(d * d * lin_ref[...], axis=0, keepdims=True)    # [1, L]
    if mask is not None:
        wd = wd * mask
    return jnp.sum(wd, axis=1, keepdims=True) * inv_hw           # [1, 1]


# ----------------------------------------------------------------------------
# Fused kernel: latent L2 + decode(both latents) + LPIPS   (grid over batch)
# ----------------------------------------------------------------------------

def _fused_latent_lpips_kernel(lat_t_ref, lat_p_ref,
                               dec_w_ref, dec_b_ref, f1_w_ref, f1_b_ref,
                               f2_w_ref, f2_b_ref, lin1_ref, lin2_ref,
                               mask_ref,
                               lpips_ref, l2_ref,
                               lat_t_cv, lat_p_cv, img_t_cv, img_p_cv,
                               f1_t_cv, f1_p_cv, tap_sc,
                               *, Bt, H, W, Wp):
    L = H * Wp
    qs = 1 + Wp
    Nc = (H + 2) * Wp + 2
    inv_hw = 1.0 / float(H * W)
    ones_lane = jnp.ones((1, 128), jnp.float32)   # hoisted (no per-iter bcast)
    mask = mask_ref[...]                          # [1, L]

    for s in range(Bt):
        x_t = lat_t_ref[s, :, :]                  # [Clat, H*W]
        x_p = lat_p_ref[s, :, :]

        # ---- exact latent L2 partial sum for this sample ----
        d = x_t - x_p
        ssq = jnp.sum(jnp.sum(d * d, axis=1, keepdims=True),
                      axis=0, keepdims=True)       # [1, 1]
        l2_ref[s, :, :] = ssq * ones_lane          # lane-dense store

        # ---- zero-bordered latent canvases built in VMEM (no HBM padding) --
        _fill_canvas(lat_t_cv, x_t, H, W, Wp)
        _fill_canvas(lat_p_cv, x_p, H, W, Wp)
        for cv in (img_t_cv, img_p_cv, f1_t_cv, f1_p_cv):
            _zero_borders(cv, qs, L, Nc)

        # ---- layer 0: decode both latents (scaling folded into dec_w/b) ----
        img_t_cv[:, qs:qs + L] = _conv3x3(lat_t_cv, dec_w_ref, dec_b_ref,
                                          tap_sc, H, Wp, False) * mask
        img_p_cv[:, qs:qs + L] = _conv3x3(lat_p_cv, dec_w_ref, dec_b_ref,
                                          tap_sc, H, Wp, False) * mask

        # ---- layer 1 ----
        f1_t = _conv3x3(img_t_cv, f1_w_ref, f1_b_ref, tap_sc, H, Wp, True) * mask
        f1_t_cv[:, qs:qs + L] = f1_t
        f1_p = _conv3x3(img_p_cv, f1_w_ref, f1_b_ref, tap_sc, H, Wp, True) * mask
        f1_p_cv[:, qs:qs + L] = f1_p
        val = _lpips_layer(f1_t, f1_p, lin1_ref, inv_hw)

        # ---- layer 2 (last layer: bands never re-stored; mask the row) ----
        f2_t = _conv3x3(f1_t_cv, f2_w_ref, f2_b_ref, tap_sc, H, Wp, True)
        f2_p = _conv3x3(f1_p_cv, f2_w_ref, f2_b_ref, tap_sc, H, Wp, True)
        val = val + _lpips_layer(f2_t, f2_p, lin2_ref, inv_hw, mask=mask)

        lpips_ref[s, :, :] = val * ones_lane


# ----------------------------------------------------------------------------
# Fused kernel: LPIPS(image_inputs, decode(latent_predictions))
# ----------------------------------------------------------------------------

def _lpips_on_inputs_kernel(img0_ref, lat_p_ref,
                            dec_w_ref, dec_b_ref, f1_w_ref, f1_b_ref,
                            f2_w_ref, f2_b_ref, lin1_ref, lin2_ref,
                            mask_ref, shift_ref, inv_scale_ref,
                            lpips_ref,
                            lat_p_cv, img0_cv, img1_cv, f1_0_cv, f1_1_cv,
                            tap_sc,
                            *, Bt, H, W, Wp):
    L = H * Wp
    qs = 1 + Wp
    Nc = (H + 2) * Wp + 2
    inv_hw = 1.0 / float(H * W)
    ones_lane = jnp.ones((1, 128), jnp.float32)
    mask = mask_ref[...]

    for s in range(Bt):
        # LPIPS scaling applied in-kernel (exact padded-zero semantics kept)
        x0 = (img0_ref[s, :, :] - shift_ref[...]) * inv_scale_ref[...]
        xp = lat_p_ref[s, :, :]

        _fill_canvas(img0_cv, x0, H, W, Wp)
        _fill_canvas(lat_p_cv, xp, H, W, Wp)
        for cv in (img1_cv, f1_0_cv, f1_1_cv):
            _zero_borders(cv, qs, L, Nc)

        # decoded prediction (scaling folded into decoder weights)
        img1_cv[:, qs:qs + L] = _conv3x3(lat_p_cv, dec_w_ref, dec_b_ref,
                                         tap_sc, H, Wp, False) * mask

        f1_0 = _conv3x3(img0_cv, f1_w_ref, f1_b_ref, tap_sc, H, Wp, True) * mask
        f1_0_cv[:, qs:qs + L] = f1_0
        f1_1 = _conv3x3(img1_cv, f1_w_ref, f1_b_ref, tap_sc, H, Wp, True) * mask
        f1_1_cv[:, qs:qs + L] = f1_1
        val = _lpips_layer(f1_0, f1_1, lin1_ref, inv_hw)

        f2_0 = _conv3x3(f1_0_cv, f2_w_ref, f2_b_ref, tap_sc, H, Wp, True)
        f2_1 = _conv3x3(f1_1_cv, f2_w_ref, f2_b_ref, tap_sc, H, Wp, True)
        val = val + _lpips_layer(f2_0, f2_1, lin2_ref, inv_hw, mask=mask)

        lpips_ref[s, :, :] = val * ones_lane


# ----------------------------------------------------------------------------
# Stand-alone latent L2 kernel (lane-dense tiles, (8,128) VMEM accumulator)
# ----------------------------------------------------------------------------

def _l2_sum_kernel(a_ref, b_ref, o_ref, acc_ref, *, inv_total):
    i = pl.program_id(0)

    @pl.when(i == 0)
    def _init():
        acc_ref[...] = jnp.zeros_like(acc_ref)

    d = a_ref[...] - b_ref[...]
    acc_ref[...] += jnp.sum((d * d).reshape(-1, 8, 128), axis=0)

    @pl.when(i == pl.num_programs(0) - 1)
    def _fin():
        total = jnp.sum(jnp.sum(acc_ref[...], axis=1, keepdims=True),
                        axis=0, keepdims=True)
        o_ref[...] = total * inv_total


def pallas_l2_mean(a, b):
    """Mean of (a - b)**2 over all elements."""
    af = a.astype(jnp.float32).reshape(-1)
    bf = b.astype(jnp.float32).reshape(-1)
    n = af.size
    lane = 128
    rows = pl.cdiv(n, lane)
    bm = 512 if rows >= 512 else (256 if rows >= 256 else 8)
    rows_p = pl.cdiv(rows, bm) * bm
    pad = rows_p * lane - n
    if pad:
        af = jnp.pad(af, (0, pad))
        bf = jnp.pad(bf, (0, pad))
    a2 = af.reshape(rows_p, lane)
    b2 = bf.reshape(rows_p, lane)
    kern = functools.partial(_l2_sum_kernel, inv_total=1.0 / float(n))
    out = pl.pallas_call(
        kern,
        out_shape=jax.ShapeDtypeStruct((1, 1), jnp.float32),
        grid=(rows_p // bm,),
        in_specs=[pl.BlockSpec((bm, lane), lambda i: (i, 0)),
                  pl.BlockSpec((bm, lane), lambda i: (i, 0))],
        out_specs=pl.BlockSpec((1, 1), lambda i: (0, 0)),
        scratch_shapes=[pltpu.VMEM((8, lane), jnp.float32)],
        compiler_params=pltpu.CompilerParams(
            dimension_semantics=("arbitrary",),
            vmem_limit_bytes=_vmem_limit(4 * bm * lane + 8 * lane)),
    )(a2, b2)
    return out[0, 0]


# ----------------------------------------------------------------------------
# Wrapper-side glue for the fused kernels
# ----------------------------------------------------------------------------

_WEIGHT_NAMES = ("dec_w", "dec_b", "f1_w", "f1_b", "f2_w", "f2_b",
                 "lin1", "lin2")


def _weight_specs(kp):
    return [pl.BlockSpec(kp[n].shape, lambda b: (0, 0)) for n in _WEIGHT_NAMES]


def _weight_args(kp):
    return tuple(kp[n] for n in _WEIGHT_NAMES)


def fused_latent_lpips(latent_inputs, latent_predictions, kp):
    """Returns (latent_l2_mean, perceptual_mean) via the fused kernel."""
    B, Clat, H, W = latent_inputs.shape
    HW, Wp = H * W, W + 2
    L = H * Wp
    Nc = (H + 2) * Wp + 2
    bt = _pick_bt(B)
    CH = kp["CH"]
    c_f2 = kp["f2_w"].shape[0]

    lat_t = latent_inputs.astype(jnp.float32).reshape(B, Clat, HW)
    lat_p = latent_predictions.astype(jnp.float32).reshape(B, Clat, HW)
    mask = _band_mask_host(L, Wp, W)

    est_elems = (2 * 2 * bt * Clat * HW          # double-buffered latent blocks
                 + 6 * CH * Nc + 9 * CH * L      # canvases + tap scratch
                 + (4 * CH + 2 * c_f2 + 8) * L   # live feature bands headroom
                 + 4 * bt * 128)
    kern = functools.partial(_fused_latent_lpips_kernel,
                             Bt=bt, H=H, W=W, Wp=Wp)
    lpips_b, l2_b = pl.pallas_call(
        kern,
        out_shape=(jax.ShapeDtypeStruct((B, 1, 128), jnp.float32),
                   jax.ShapeDtypeStruct((B, 1, 128), jnp.float32)),
        grid=(B // bt,),
        in_specs=[pl.BlockSpec((bt, Clat, HW), lambda b: (b, 0, 0)),
                  pl.BlockSpec((bt, Clat, HW), lambda b: (b, 0, 0))]
                 + _weight_specs(kp)
                 + [pl.BlockSpec((1, L), lambda b: (0, 0))],
        out_specs=(pl.BlockSpec((bt, 1, 128), lambda b: (b, 0, 0)),
                   pl.BlockSpec((bt, 1, 128), lambda b: (b, 0, 0))),
        scratch_shapes=[pltpu.VMEM((CH, Nc), jnp.float32),   # lat_t canvas
                        pltpu.VMEM((CH, Nc), jnp.float32),   # lat_p canvas
                        pltpu.VMEM((CH, Nc), jnp.float32),   # img_t canvas
                        pltpu.VMEM((CH, Nc), jnp.float32),   # img_p canvas
                        pltpu.VMEM((CH, Nc), jnp.float32),   # f1_t canvas
                        pltpu.VMEM((CH, Nc), jnp.float32),   # f1_p canvas
                        pltpu.VMEM((9 * CH, L), jnp.float32)],  # tap staging
        compiler_params=pltpu.CompilerParams(
            dimension_semantics=("parallel",),
            vmem_limit_bytes=_vmem_limit(est_elems)),
    )(lat_t, lat_p, *_weight_args(kp), mask)
    latent_l2 = jnp.sum(l2_b[:, 0, 0]) / float(latent_inputs.size)
    perceptual = jnp.mean(lpips_b[:, 0, 0])
    return latent_l2, perceptual


def lpips_on_inputs(image_inputs, latent_predictions, kp):
    """Mean LPIPS(image_inputs, decode(latent_predictions))."""
    B, Cimg, H, W = image_inputs.shape
    Clat = latent_predictions.shape[1]
    HW, Wp = H * W, W + 2
    L = H * Wp
    Nc = (H + 2) * Wp + 2
    bt = _pick_bt(B)
    CH = kp["CH"]
    c_f2 = kp["f2_w"].shape[0]

    img0 = image_inputs.astype(jnp.float32).reshape(B, Cimg, HW)
    lat_p = latent_predictions.astype(jnp.float32).reshape(B, Clat, HW)
    mask = _band_mask_host(L, Wp, W)

    est_elems = (2 * bt * (Cimg + Clat) * HW
                 + 6 * CH * Nc + 9 * CH * L
                 + (4 * CH + 2 * c_f2 + 8) * L
                 + 2 * bt * 128)
    kern = functools.partial(_lpips_on_inputs_kernel, Bt=bt, H=H, W=W, Wp=Wp)
    lpips_b = pl.pallas_call(
        kern,
        out_shape=jax.ShapeDtypeStruct((B, 1, 128), jnp.float32),
        grid=(B // bt,),
        in_specs=[pl.BlockSpec((bt, Cimg, HW), lambda b: (b, 0, 0)),
                  pl.BlockSpec((bt, Clat, HW), lambda b: (b, 0, 0))]
                 + _weight_specs(kp)
                 + [pl.BlockSpec((1, L), lambda b: (0, 0)),
                    pl.BlockSpec(kp["shift"].shape, lambda b: (0, 0)),
                    pl.BlockSpec(kp["inv_scale"].shape, lambda b: (0, 0))],
        out_specs=pl.BlockSpec((bt, 1, 128), lambda b: (b, 0, 0)),
        scratch_shapes=[pltpu.VMEM((CH, Nc), jnp.float32),   # lat_p canvas
                        pltpu.VMEM((CH, Nc), jnp.float32),   # img0 canvas
                        pltpu.VMEM((CH, Nc), jnp.float32),   # img1 canvas
                        pltpu.VMEM((CH, Nc), jnp.float32),   # f1_0 canvas
                        pltpu.VMEM((CH, Nc), jnp.float32),   # f1_1 canvas
                        pltpu.VMEM((9 * CH, L), jnp.float32)],
        compiler_params=pltpu.CompilerParams(
            dimension_semantics=("parallel",),
            vmem_limit_bytes=_vmem_limit(est_elems)),
    )(img0, lat_p, *_weight_args(kp), mask, kp["shift"], kp["inv_scale"])
    return jnp.mean(lpips_b[:, 0, 0])


# ----------------------------------------------------------------------------
# Deterministic synthetic parameters
# ----------------------------------------------------------------------------

def _prepare_kernel_params(p):
    """Fold LPIPS scaling into the decoder conv; stack 3x3 taps to [Cout, 9*CH]
    with per-tap channel padding to CH (multiple of 8, aligned tap stores)."""
    scale = p["lpips_scale"]
    shift = p["lpips_shift"]
    clat = p["dec_w"].shape[1]
    c_f1 = p["feat1_w"].shape[0]
    CH = _round_up(max(clat, 3, c_f1), 8)

    # Exact output-side affine fold: ((conv + b) - shift) / scale
    dec_w = p["dec_w"] / scale[:, None, None, None]
    dec_b = (p["dec_b"] - shift) / scale

    def stack_taps(w, cout_pad=None):
        cout, cin = w.shape[0], w.shape[1]
        w = jnp.pad(w, ((0, 0), (0, CH - cin), (0, 0), (0, 0)))
        w2 = jnp.transpose(w, (0, 2, 3, 1)).reshape(cout, 9 * CH)
        if cout_pad is not None and cout_pad > cout:
            w2 = jnp.pad(w2, ((0, cout_pad - cout), (0, 0)))
        return w2

    def pad_col(v, n):
        v = v.reshape(-1, 1)
        if n > v.shape[0]:
            v = jnp.pad(v, ((0, n - v.shape[0]), (0, 0)))
        return v

    return {
        "CH": CH,
        "dec_w": stack_taps(dec_w, cout_pad=CH),
        "dec_b": pad_col(dec_b, CH),
        "f1_w": stack_taps(p["feat1_w"], cout_pad=CH),
        "f1_b": pad_col(p["feat1_b"], CH),
        "f2_w": stack_taps(p["feat2_w"]),
        "f2_b": p["feat2_b"].reshape(-1, 1),
        "lin1": pad_col(p["lin1_w"], CH),
        "lin2": p["lin2_w"].reshape(-1, 1),
        "shift": shift.reshape(-1, 1),
        "inv_scale": (1.0 / scale).reshape(-1, 1),
    }


def make_params(latent_channels=4):
    key = jax.random.PRNGKey(42)
    k = jax.random.split(key, 6)
    params = {
        # synthetic decoder: 3x3 conv latent_C -> 3 (RGB), same spatial size
        "dec_w": 0.1 * jax.random.normal(k[0], (3, latent_channels, 3, 3),
                                         jnp.float32),
        "dec_b": jnp.zeros((3,), jnp.float32),
        # LPIPS scaling layer (standard constants)
        "lpips_shift": jnp.array([-0.030, -0.088, -0.188], jnp.float32),
        "lpips_scale": jnp.array([0.458, 0.448, 0.450], jnp.float32),
        # synthetic LPIPS feature net: two 3x3 conv + relu stages
        "feat1_w": 0.2 * jax.random.normal(k[1], (8, 3, 3, 3), jnp.float32),
        "feat1_b": 0.01 * jax.random.normal(k[2], (8,), jnp.float32),
        "feat2_w": 0.2 * jax.random.normal(k[3], (16, 8, 3, 3), jnp.float32),
        "feat2_b": 0.01 * jax.random.normal(k[4], (16,), jnp.float32),
        # LPIPS "lin" layers: non-negative per-channel weights
        "lin1_w": jnp.abs(jax.random.normal(k[5], (8,), jnp.float32)),
        "lin2_w": jnp.abs(jax.random.normal(jax.random.fold_in(key, 7), (16,),
                                            jnp.float32)),
    }
    params["kernel"] = _prepare_kernel_params(params)
    return params


# ----------------------------------------------------------------------------
# LatentLPIPS forward
# ----------------------------------------------------------------------------

def latent_lpips_forward(latent_inputs, latent_predictions, image_inputs,
                         params, split="train",
                         perceptual_weight=1.0, latent_weight=1.0,
                         perceptual_weight_on_inputs=0.0):
    """Inputs are NCHW float32 arrays, matching the PyTorch module."""
    log = {}
    kp = params["kernel"]

    if perceptual_weight > 0.0:
        latent_l2, p_mean = fused_latent_lpips(latent_inputs,
                                               latent_predictions, kp)
        log[f"{split}/latent_l2_loss"] = latent_l2
        loss = latent_weight * latent_l2 + perceptual_weight * p_mean
        log[f"{split}/perceptual_loss"] = p_mean
    else:
        # TODO(synk): original returns the unreduced squared-error tensor
        # here; we return its mean (scalar) instead.
        latent_l2 = pallas_l2_mean(latent_inputs, latent_predictions)
        log[f"{split}/latent_l2_loss"] = latent_l2
        loss = latent_l2

    if perceptual_weight_on_inputs > 0.0:
        # TODO(synk): bicubic antialias interpolate (scale_input_to_tgt_size /
        # scale_tgt_to_input_size) omitted; shapes assumed to match.
        p2_mean = lpips_on_inputs(image_inputs, latent_predictions, kp)
        loss = loss + perceptual_weight_on_inputs * p2_mean
        log[f"{split}/perceptual_loss_on_inputs"] = p2_mean

    return loss, log


# ----------------------------------------------------------------------------
# Main
# ----------------------------------------------------------------------------

if __name__ == "__main__":
    key = jax.random.PRNGKey(0)
    k_li, k_lp, k_im = jax.random.split(key, 3)

    B, C, H, W = 2, 4, 16, 16
    latent_inputs = jax.random.normal(k_li, (B, C, H, W), jnp.float32)
    latent_predictions = jax.random.normal(k_lp, (B, C, H, W), jnp.float32)
    image_inputs = jax.random.normal(k_im, (B, 3, H, W), jnp.float32)

    params = make_params(latent_channels=C)

    # default path: fused latent-L2 + decoder + LPIPS kernel
    loss, log = latent_lpips_forward(latent_inputs, latent_predictions,
                                     image_inputs, params, split="train")
    jax.block_until_ready((loss, log))

    # latent-only path: exercises the tiled lane-dense L2 kernel
    loss2, log2 = latent_lpips_forward(latent_inputs, latent_predictions,
                                       image_inputs, params, split="train",
                                       perceptual_weight=0.0)
    jax.block_until_ready((loss2, log2))

    # perceptual-on-inputs path: exercises the LPIPS-on-inputs kernel
    loss3, log3 = latent_lpips_forward(latent_inputs, latent_predictions,
                                       image_inputs, params, split="train",
                                       perceptual_weight_on_inputs=0.5)
    jax.block_until_ready((loss3, log3))

    print("KERNEL_OK")
</pallas_src>

<mosaic_0001>
module attributes {stable_mosaic.version = 11 : i64} {
  func.func @_fused_latent_lpips_kernel(%arg0: i32, %arg1: memref<1x4x256xf32, #tpu.memory_space<vmem>>, %arg2: memref<1x4x256xf32, #tpu.memory_space<vmem>>, %arg3: memref<8x72xf32, #tpu.memory_space<vmem>>, %arg4: memref<8x1xf32, #tpu.memory_space<vmem>>, %arg5: memref<8x72xf32, #tpu.memory_space<vmem>>, %arg6: memref<8x1xf32, #tpu.memory_space<vmem>>, %arg7: memref<16x72xf32, #tpu.memory_space<vmem>>, %arg8: memref<16x1xf32, #tpu.memory_space<vmem>>, %arg9: memref<8x1xf32, #tpu.memory_space<vmem>>, %arg10: memref<16x1xf32, #tpu.memory_space<vmem>>, %arg11: memref<1x288xf32, #tpu.memory_space<vmem>>, %arg12: memref<1x1x128xf32, #tpu.memory_space<vmem>>, %arg13: memref<1x1x128xf32, #tpu.memory_space<vmem>>, %arg14: memref<8x326xf32, #tpu.memory_space<vmem>>, %arg15: memref<8x326xf32, #tpu.memory_space<vmem>>, %arg16: memref<8x326xf32, #tpu.memory_space<vmem>>, %arg17: memref<8x326xf32, #tpu.memory_space<vmem>>, %arg18: memref<8x326xf32, #tpu.memory_space<vmem>>, %arg19: memref<8x326xf32, #tpu.memory_space<vmem>>, %arg20: memref<72x288xf32, #tpu.memory_space<vmem>>) attributes {dimension_semantics = [#tpu.dimension_semantics<parallel>], iteration_bounds = array<i64: 2>, scalar_prefetch = 0 : i64, scratch_operands = 7 : i64, tpu.core_type = #tpu.core_type<tc>, window_params = [{transform_indices = @transform_0, window_bounds = array<i64: 1, 4, 256>}, {transform_indices = @transform_1, window_bounds = array<i64: 1, 4, 256>}, {pipeline_mode = #tpu.pipeline_mode<synchronous>, transform_indices = @transform_2, window_bounds = array<i64: 8, 72>}, {pipeline_mode = #tpu.pipeline_mode<synchronous>, transform_indices = @transform_3, window_bounds = array<i64: 8, 1>}, {pipeline_mode = #tpu.pipeline_mode<synchronous>, transform_indices = @transform_4, window_bounds = array<i64: 8, 72>}, {pipeline_mode = #tpu.pipeline_mode<synchronous>, transform_indices = @transform_5, window_bounds = array<i64: 8, 1>}, {pipeline_mode = #tpu.pipeline_mode<synchronous>, transform_indices = @transform_6, window_bounds = array<i64: 16, 72>}, {pipeline_mode = #tpu.pipeline_mode<synchronous>, transform_indices = @transform_7, window_bounds = array<i64: 16, 1>}, {pipeline_mode = #tpu.pipeline_mode<synchronous>, transform_indices = @transform_8, window_bounds = array<i64: 8, 1>}, {pipeline_mode = #tpu.pipeline_mode<synchronous>, transform_indices = @transform_9, window_bounds = array<i64: 16, 1>}, {pipeline_mode = #tpu.pipeline_mode<synchronous>, transform_indices = @transform_10, window_bounds = array<i64: 1, 288>}, {transform_indices = @transform_11, window_bounds = array<i64: 1, 1, 128>}, {transform_indices = @transform_12, window_bounds = array<i64: 1, 1, 128>}]} {
    %cst = arith.constant 1.000000e+00 : f32
    %0 = vector.broadcast %cst : f32 to vector<1x128xf32>
    %c0 = arith.constant 0 : index
    %c0_0 = arith.constant 0 : index
    %1 = vector.load %arg11[%c0, %c0_0] : memref<1x288xf32, #tpu.memory_space<vmem>>, vector<1x288xf32>
    %c0_1 = arith.constant 0 : index
    %c0_2 = arith.constant 0 : index
    %c0_3 = arith.constant 0 : index
    %2 = vector.load %arg1[%c0_1, %c0_2, %c0_3] : memref<1x4x256xf32, #tpu.memory_space<vmem>>, vector<1x4x256xf32>
    %3 = vector.shape_cast %2 : vector<1x4x256xf32> to vector<4x256xf32>
    %c0_4 = arith.constant 0 : index
    %c0_5 = arith.constant 0 : index
    %c0_6 = arith.constant 0 : index
    %4 = vector.load %arg2[%c0_4, %c0_5, %c0_6] : memref<1x4x256xf32, #tpu.memory_space<vmem>>, vector<1x4x256xf32>
    %5 = vector.shape_cast %4 : vector<1x4x256xf32> to vector<4x256xf32>
    %6 = arith.subf %3, %5 : vector<4x256xf32>
    %7 = arith.mulf %6, %6 : vector<4x256xf32>
    %cst_7 = arith.constant dense<0.000000e+00> : vector<4xf32>
    %8 = vector.multi_reduction <add>, %7, %cst_7 [1] : vector<4x256xf32> to vector<4xf32>
    %9 = vector.shape_cast %8 : vector<4xf32> to vector<4x1xf32>
    %cst_8 = arith.constant dense<0.000000e+00> : vector<1xf32>
    %10 = vector.multi_reduction <add>, %9, %cst_8 [0] : vector<4x1xf32> to vector<1xf32>
    %11 = vector.shape_cast %10 : vector<1xf32> to vector<1x1xf32>
    %12 = vector.broadcast %11 : vector<1x1xf32> to vector<1x128xf32>
    %13 = arith.mulf %12, %0 : vector<1x128xf32>
    %c0_9 = arith.constant 0 : index
    %c0_10 = arith.constant 0 : index
    %c0_11 = arith.constant 0 : index
    %14 = vector.load %arg13[%c0_9, %c0_10, %c0_11] : memref<1x1x128xf32, #tpu.memory_space<vmem>>, vector<1x1x128xf32>
    %15 = vector.shape_cast %14 : vector<1x1x128xf32> to vector<1x128xf32>
    %16 = vector.shape_cast %13 : vector<1x128xf32> to vector<1x1x128xf32>
    tpu.vector_store %arg13[%c0_9, %c0_10, %c0_11], %16 {strides = array<i32>} : memref<1x1x128xf32, #tpu.memory_space<vmem>>, vector<1x1x128xf32>,
    %cst_12 = arith.constant 0.000000e+00 : f32
    %17 = vector.broadcast %cst_12 : f32 to vector<8x326xf32>
    %c0_13 = arith.constant 0 : index
    %c0_14 = arith.constant 0 : index
    %18 = vector.load %arg14[%c0_13, %c0_14] : memref<8x326xf32, #tpu.memory_space<vmem>>, vector<8x326xf32>
    tpu.vector_store %arg14[%c0_13, %c0_14], %17 {strides = array<i32>} : memref<8x326xf32, #tpu.memory_space<vmem>>, vector<8x326xf32>,
    %19 = vector.extract_strided_slice %3 {offsets = [0, 0], sizes = [4, 16], strides = [1, 1]} : vector<4x256xf32> to vector<4x16xf32>
    %c0_15 = arith.constant 0 : index
    %c20 = arith.constant 20 : index
    %20 = vector.load %arg14[%c0_15, %c20] : memref<8x326xf32, #tpu.memory_space<vmem>>, vector<4x16xf32>
    tpu.vector_store %arg14[%c0_15, %c20], %19 {strides = array<i32>} : memref<8x326xf32, #tpu.memory_space<vmem>>, vector<4x16xf32>,
    %21 = vector.extract_strided_slice %3 {offsets = [0, 16], sizes = [4, 16], strides = [1, 1]} : vector<4x256xf32> to vector<4x16xf32>
    %c0_16 = arith.constant 0 : index
    %c38 = arith.constant 38 : index
    %22 = vector.load %arg14[%c0_16, %c38] : memref<8x326xf32, #tpu.memory_space<vmem>>, vector<4x16xf32>
    tpu.vector_store %arg14[%c0_16, %c38], %21 {strides = array<i32>} : memref<8x326xf32, #tpu.memory_space<vmem>>, vector<4x16xf32>,
    %23 = vector.extract_strided_slice %3 {offsets = [0, 32], sizes = [4, 16], strides = [1, 1]} : vector<4x256xf32> to vector<4x16xf32>
    %c0_17 = arith.constant 0 : index
    %c56 = arith.constant 56 : index
    %24 = vector.load %arg14[%c0_17, %c56] : memref<8x326xf32, #tpu.memory_space<vmem>>, vector<4x16xf32>
    tpu.vector_store %arg14[%c0_17, %c56], %23 {strides = array<i32>} : memref<8x326xf32, #tpu.memory_space<vmem>>, vector<4x16xf32>,
    %25 = vector.extract_strided_slice %3 {offsets = [0, 48], sizes = [4, 16], strides = [1, 1]} : vector<4x256xf32> to vector<4x16xf32>
    %c0_18 = arith.constant 0 : index
    %c74 = arith.constant 74 : index
    %26 = vector.load %arg14[%c0_18, %c74] : memref<8x326xf32, #tpu.memory_space<vmem>>, vector<4x16xf32>
    tpu.vector_store %arg14[%c0_18, %c74], %25 {strides = array<i32>} : memref<8x326xf32, #tpu.memory_space<vmem>>, vector<4x16xf32>,
    %27 = vector.extract_strided_slice %3 {offsets = [0, 64], sizes = [4, 16], strides = [1, 1]} : vector<4x256xf32> to vector<4x16xf32>
    %c0_19 = arith.constant 0 : index
    %c92 = arith.constant 92 : index
    %28 = vector.load %arg14[%c0_19, %c92] : memref<8x326xf32, #tpu.memory_space<vmem>>, vector<4x16xf32>
    tpu.vector_store %arg14[%c0_19, %c92], %27 {strides = array<i32>} : memref<8x326xf32, #tpu.memory_space<vmem>>, vector<4x16xf32>,
    %29 = vector.extract_strided_slice %3 {offsets = [0, 80], sizes = [4, 16], strides = [1, 1]} : vector<4x256xf32> to vector<4x16xf32>
    %c0_20 = arith.constant 0 : index
    %c110 = arith.constant 110 : index
    %30 = vector.load %arg14[%c0_20, %c110] : memref<8x326xf32, #tpu.memory_space<vmem>>, vector<4x16xf32>
    tpu.vector_store %arg14[%c0_20, %c110], %29 {strides = array<i32>} : memref<8x326xf32, #tpu.memory_space<vmem>>, vector<4x16xf32>,
    %31 = vector.extract_strided_slice %3 {offsets = [0, 96], sizes = [4, 16], strides = [1, 1]} : vector<4x256xf32> to vector<4x16xf32>
    %c0_21 = arith.constant 0 : index
    %c128 = arith.constant 128 : index
    %32 = vector.load %arg14[%c0_21, %c128] : memref<8x326xf32, #tpu.memory_space<vmem>>, vector<4x16xf32>
    tpu.vector_store %arg14[%c0_21, %c128], %31 {strides = array<i32>} : memref<8x326xf32, #tpu.memory_space<vmem>>, vector<4x16xf32>,
    %33 = vector.extract_strided_slice %3 {offsets = [0, 112], sizes = [4, 16], strides = [1, 1]} : vector<4x256xf32> to vector<4x16xf32>
    %c0_22 = arith.constant 0 : index
    %c146 = arith.constant 146 : index
    %34 = vector.load %arg14[%c0_22, %c146] : memref<8x326xf32, #tpu.memory_space<vmem>>, vector<4x16xf32>
    tpu.vector_store %arg14[%c0_22, %c146], %33 {strides = array<i32>} : memref<8x326xf32, #tpu.memory_space<vmem>>, vector<4x16xf32>,
    %35 = vector.extract_strided_slice %3 {offsets = [0, 128], sizes = [4, 16], strides = [1, 1]} : vector<4x256xf32> to vector<4x16xf32>
    %c0_23 = arith.constant 0 : index
    %c164 = arith.constant 164 : index
    %36 = vector.load %arg14[%c0_23, %c164] : memref<8x326xf32, #tpu.memory_space<vmem>>, vector<4x16xf32>
    tpu.vector_store %arg14[%c0_23, %c164], %35 {strides = array<i32>} : memref<8x326xf32, #tpu.memory_space<vmem>>, vector<4x16xf32>,
    %37 = vector.extract_strided_slice %3 {offsets = [0, 144], sizes = [4, 16], strides = [1, 1]} : vector<4x256xf32> to vector<4x16xf32>
    %c0_24 = arith.constant 0 : index
    %c182 = arith.constant 182 : index
    %38 = vector.load %arg14[%c0_24, %c182] : memref<8x326xf32, #tpu.memory_space<vmem>>, vector<4x16xf32>
    tpu.vector_store %arg14[%c0_24, %c182], %37 {strides = array<i32>} : memref<8x326xf32, #tpu.memory_space<vmem>>, vector<4x16xf32>,
    %39 = vector.extract_strided_slice %3 {offsets = [0, 160], sizes = [4, 16], strides = [1, 1]} : vector<4x256xf32> to vector<4x16xf32>
    %c0_25 = arith.constant 0 : index
    %c200 = arith.constant 200 : index
    %40 = vector.load %arg14[%c0_25, %c200] : memref<8x326xf32, #tpu.memory_space<vmem>>, vector<4x16xf32>
    tpu.vector_store %arg14[%c0_25, %c200], %39 {strides = array<i32>} : memref<8x326xf32, #tpu.memory_space<vmem>>, vector<4x16xf32>,
    %41 = vector.extract_strided_slice %3 {offsets = [0, 176], sizes = [4, 16], strides = [1, 1]} : vector<4x256xf32> to vector<4x16xf32>
    %c0_26 = arith.constant 0 : index
    %c218 = arith.constant 218 : index
    %42 = vector.load %arg14[%c0_26, %c218] : memref<8x326xf32, #tpu.memory_space<vmem>>, vector<4x16xf32>
    tpu.vector_store %arg14[%c0_26, %c218], %41 {strides = array<i32>} : memref<8x326xf32, #tpu.memory_space<vmem>>, vector<4x16xf32>,
    %43 = vector.extract_strided_slice %3 {offsets = [0, 192], sizes = [4, 16], strides = [1, 1]} : vector<4x256xf32> to vector<4x16xf32>
    %c0_27 = arith.constant 0 : index
    %c236 = arith.constant 236 : index
    %44 = vector.load %arg14[%c0_27, %c236] : memref<8x326xf32, #tpu.memory_space<vmem>>, vector<4x16xf32>
    tpu.vector_store %arg14[%c0_27, %c236], %43 {strides = array<i32>} : memref<8x326xf32, #tpu.memory_space<vmem>>, vector<4x16xf32>,
    %45 = vector.extract_strided_slice %3 {offsets = [0, 208], sizes = [4, 16], strides = [1, 1]} : vector<4x256xf32> to vector<4x16xf32>
    %c0_28 = arith.constant 0 : index
    %c254 = arith.constant 254 : index
    %46 = vector.load %arg14[%c0_28, %c254] : memref<8x326xf32, #tpu.memory_space<vmem>>, vector<4x16xf32>
    tpu.vector_store %arg14[%c0_28, %c254], %45 {strides = array<i32>} : memref<8x326xf32, #tpu.memory_space<vmem>>, vector<4x16xf32>,
    %47 = vector.extract_strided_slice %3 {offsets = [0, 224], sizes = [4, 16], strides = [1, 1]} : vector<4x256xf32> to vector<4x16xf32>
    %c0_29 = arith.constant 0 : index
    %c272 = arith.constant 272 : index
    %48 = vector.load %arg14[%c0_29, %c272] : memref<8x326xf32, #tpu.memory_space<vmem>>, vector<4x16xf32>
    tpu.vector_store %arg14[%c0_29, %c272], %47 {strides = array<i32>} : memref<8x326xf32, #tpu.memory_space<vmem>>, vector<4x16xf32>,
    %49 = vector.extract_strided_slice %3 {offsets = [0, 240], sizes = [4, 16], strides = [1, 1]} : vector<4x256xf32> to vector<4x16xf32>
    %c0_30 = arith.constant 0 : index
    %c290 = arith.constant 290 : index
    %50 = vector.load %arg14[%c0_30, %c290] : memref<8x326xf32, #tpu.memory_space<vmem>>, vector<4x16xf32>
    tpu.vector_store %arg14[%c0_30, %c290], %49 {strides = array<i32>} : memref<8x326xf32, #tpu.memory_space<vmem>>, vector<4x16xf32>,
    %cst_31 = arith.constant 0.000000e+00 : f32
    %51 = vector.broadcast %cst_31 : f32 to vector<8x326xf32>
    %c0_32 = arith.constant 0 : index
    %c0_33 = arith.constant 0 : index
    %52 = vector.load %arg15[%c0_32, %c0_33] : memref<8x326xf32, #tpu.memory_space<vmem>>, vector<8x326xf32>
    tpu.vector_store %arg15[%c0_32, %c0_33], %51 {strides = array<i32>} : memref<8x326xf32, #tpu.memory_space<vmem>>, vector<8x326xf32>,
    %53 = vector.extract_strided_slice %5 {offsets = [0, 0], sizes = [4, 16], strides = [1, 1]} : vector<4x256xf32> to vector<4x16xf32>
    %c0_34 = arith.constant 0 : index
    %c20_35 = arith.constant 20 : index
    %54 = vector.load %arg15[%c0_34, %c20_35] : memref<8x326xf32, #tpu.memory_space<vmem>>, vector<4x16xf32>
    tpu.vector_store %arg15[%c0_34, %c20_35], %53 {strides = array<i32>} : memref<8x326xf32, #tpu.memory_space<vmem>>, vector<4x16xf32>,
    %55 = vector.extract_strided_slice %5 {offsets = [0, 16], sizes = [4, 16], strides = [1, 1]} : vector<4x256xf32> to vector<4x16xf32>
    %c0_36 = arith.constant 0 : index
    %c38_37 = arith.constant 38 : index
    %56 = vector.load %arg15[%c0_36, %c38_37] : memref<8x326xf32, #tpu.memory_space<vmem>>, vector<4x16xf32>
    tpu.vector_store %arg15[%c0_36, %c38_37], %55 {strides = array<i32>} : memref<8x326xf32, #tpu.memory_space<vmem>>, vector<4x16xf32>,
    %57 = vector.extract_strided_slice %5 {offsets = [0, 32], sizes = [4, 16], strides = [1, 1]} : vector<4x256xf32> to vector<4x16xf32>
    %c0_38 = arith.constant 0 : index
    %c56_39 = arith.constant 56 : index
    %58 = vector.load %arg15[%c0_38, %c56_39] : memref<8x326xf32, #tpu.memory_space<vmem>>, vector<4x16xf32>
    tpu.vector_store %arg15[%c0_38, %c56_39], %57 {strides = array<i32>} : memref<8x326xf32, #tpu.memory_space<vmem>>, vector<4x16xf32>,
    %59 = vector.extract_strided_slice %5 {offsets = [0, 48], sizes = [4, 16], strides = [1, 1]} : vector<4x256xf32> to vector<4x16xf32>
    %c0_40 = arith.constant 0 : index
    %c74_41 = arith.constant 74 : index
    %60 = vector.load %arg15[%c0_40, %c74_41] : memref<8x326xf32, #tpu.memory_space<vmem>>, vector<4x16xf32>
    tpu.vector_store %arg15[%c0_40, %c74_41], %59 {strides = array<i32>} : memref<8x326xf32, #tpu.memory_space<vmem>>, vector<4x16xf32>,
    %61 = vector.extract_strided_slice %5 {offsets = [0, 64], sizes = [4, 16], strides = [1, 1]} : vector<4x256xf32> to vector<4x16xf32>
    %c0_42 = arith.constant 0 : index
    %c92_43 = arith.constant 92 : index
    %62 = vector.load %arg15[%c0_42, %c92_43] : memref<8x326xf32, #tpu.memory_space<vmem>>, vector<4x16xf32>
    tpu.vector_store %arg15[%c0_42, %c92_43], %61 {strides = array<i32>} : memref<8x326xf32, #tpu.memory_space<vmem>>, vector<4x16xf32>,
    %63 = vector.extract_strided_slice %5 {offsets = [0, 80], sizes = [4, 16], strides = [1, 1]} : vector<4x256xf32> to vector<4x16xf32>
    %c0_44 = arith.constant 0 : index
    %c110_45 = arith.constant 110 : index
    %64 = vector.load %arg15[%c0_44, %c110_45] : memref<8x326xf32, #tpu.memory_space<vmem>>, vector<4x16xf32>
    tpu.vector_store %arg15[%c0_44, %c110_45], %63 {strides = array<i32>} : memref<8x326xf32, #tpu.memory_space<vmem>>, vector<4x16xf32>,
    %65 = vector.extract_strided_slice %5 {offsets = [0, 96], sizes = [4, 16], strides = [1, 1]} : vector<4x256xf32> to vector<4x16xf32>
    %c0_46 = arith.constant 0 : index
    %c128_47 = arith.constant 128 : index
    %66 = vector.load %arg15[%c0_46, %c128_47] : memref<8x326xf32, #tpu.memory_space<vmem>>, vector<4x16xf32>
    tpu.vector_store %arg15[%c0_46, %c128_47], %65 {strides = array<i32>} : memref<8x326xf32, #tpu.memory_space<vmem>>, vector<4x16xf32>,
    %67 = vector.extract_strided_slice %5 {offsets = [0, 112], sizes = [4, 16], strides = [1, 1]} : vector<4x256xf32> to vector<4x16xf32>
    %c0_48 = arith.constant 0 : index
    %c146_49 = arith.constant 146 : index
    %68 = vector.load %arg15[%c0_48, %c146_49] : memref<8x326xf32, #tpu.memory_space<vmem>>, vector<4x16xf32>
    tpu.vector_store %arg15[%c0_48, %c146_49], %67 {strides = array<i32>} : memref<8x326xf32, #tpu.memory_space<vmem>>, vector<4x16xf32>,
    %69 = vector.extract_strided_slice %5 {offsets = [0, 128], sizes = [4, 16], strides = [1, 1]} : vector<4x256xf32> to vector<4x16xf32>
    %c0_50 = arith.constant 0 : index
    %c164_51 = arith.constant 164 : index
    %70 = vector.load %arg15[%c0_50, %c164_51] : memref<8x326xf32, #tpu.memory_space<vmem>>, vector<4x16xf32>
    tpu.vector_store %arg15[%c0_50, %c164_51], %69 {strides = array<i32>} : memref<8x326xf32, #tpu.memory_space<vmem>>, vector<4x16xf32>,
    %71 = vector.extract_strided_slice %5 {offsets = [0, 144], sizes = [4, 16], strides = [1, 1]} : vector<4x256xf32> to vector<4x16xf32>
    %c0_52 = arith.constant 0 : index
    %c182_53 = arith.constant 182 : index
    %72 = vector.load %arg15[%c0_52, %c182_53] : memref<8x326xf32, #tpu.memory_space<vmem>>, vector<4x16xf32>
    tpu.vector_store %arg15[%c0_52, %c182_53], %71 {strides = array<i32>} : memref<8x326xf32, #tpu.memory_space<vmem>>, vector<4x16xf32>,
    %73 = vector.extract_strided_slice %5 {offsets = [0, 160], sizes = [4, 16], strides = [1, 1]} : vector<4x256xf32> to vector<4x16xf32>
    %c0_54 = arith.constant 0 : index
    %c200_55 = arith.constant 200 : index
    %74 = vector.load %arg15[%c0_54, %c200_55] : memref<8x326xf32, #tpu.memory_space<vmem>>, vector<4x16xf32>
    tpu.vector_store %arg15[%c0_54, %c200_55], %73 {strides = array<i32>} : memref<8x326xf32, #tpu.memory_space<vmem>>, vector<4x16xf32>,
    %75 = vector.extract_strided_slice %5 {offsets = [0, 176], sizes = [4, 16], strides = [1, 1]} : vector<4x256xf32> to vector<4x16xf32>
    %c0_56 = arith.constant 0 : index
    %c218_57 = arith.constant 218 : index
    %76 = vector.load %arg15[%c0_56, %c218_57] : memref<8x326xf32, #tpu.memory_space<vmem>>, vector<4x16xf32>
    tpu.vector_store %arg15[%c0_56, %c218_57], %75 {strides = array<i32>} : memref<8x326xf32, #tpu.memory_space<vmem>>, vector<4x16xf32>,
    %77 = vector.extract_strided_slice %5 {offsets = [0, 192], sizes = [4, 16], strides = [1, 1]} : vector<4x256xf32> to vector<4x16xf32>
    %c0_58 = arith.constant 0 : index
    %c236_59 = arith.constant 236 : index
    %78 = vector.load %arg15[%c0_58, %c236_59] : memref<8x326xf32, #tpu.memory_space<vmem>>, vector<4x16xf32>
    tpu.vector_store %arg15[%c0_58, %c236_59], %77 {strides = array<i32>} : memref<8x326xf32, #tpu.memory_space<vmem>>, vector<4x16xf32>,
    %79 = vector.extract_strided_slice %5 {offsets = [0, 208], sizes = [4, 16], strides = [1, 1]} : vector<4x256xf32> to vector<4x16xf32>
    %c0_60 = arith.constant 0 : index
    %c254_61 = arith.constant 254 : index
    %80 = vector.load %arg15[%c0_60, %c254_61] : memref<8x326xf32, #tpu.memory_space<vmem>>, vector<4x16xf32>
    tpu.vector_store %arg15[%c0_60, %c254_61], %79 {strides = array<i32>} : memref<8x326xf32, #tpu.memory_space<vmem>>, vector<4x16xf32>,
    %81 = vector.extract_strided_slice %5 {offsets = [0, 224], sizes = [4, 16], strides = [1, 1]} : vector<4x256xf32> to vector<4x16xf32>
    %c0_62 = arith.constant 0 : index
    %c272_63 = arith.constant 272 : index
    %82 = vector.load %arg15[%c0_62, %c272_63] : memref<8x326xf32, #tpu.memory_space<vmem>>, vector<4x16xf32>
    tpu.vector_store %arg15[%c0_62, %c272_63], %81 {strides = array<i32>} : memref<8x326xf32, #tpu.memory_space<vmem>>, vector<4x16xf32>,
    %83 = vector.extract_strided_slice %5 {offsets = [0, 240], sizes = [4, 16], strides = [1, 1]} : vector<4x256xf32> to vector<4x16xf32>
    %c0_64 = arith.constant 0 : index
    %c290_65 = arith.constant 290 : index
    %84 = vector.load %arg15[%c0_64, %c290_65] : memref<8x326xf32, #tpu.memory_space<vmem>>, vector<4x16xf32>
    tpu.vector_store %arg15[%c0_64, %c290_65], %83 {strides = array<i32>} : memref<8x326xf32, #tpu.memory_space<vmem>>, vector<4x16xf32>,
    %cst_66 = arith.constant 0.000000e+00 : f32
    %85 = vector.broadcast %cst_66 : f32 to vector<8x19xf32>
    %c0_67 = arith.constant 0 : index
    %c0_68 = arith.constant 0 : index
    %86 = vector.load %arg16[%c0_67, %c0_68] : memref<8x326xf32, #tpu.memory_space<vmem>>, vector<8x19xf32>
    tpu.vector_store %arg16[%c0_67, %c0_68], %85 {strides = array<i32>} : memref<8x326xf32, #tpu.memory_space<vmem>>, vector<8x19xf32>,
    %cst_69 = arith.constant 0.000000e+00 : f32
    %87 = vector.broadcast %cst_69 : f32 to vector<8x19xf32>
    %c0_70 = arith.constant 0 : index
    %c307 = arith.constant 307 : index
    %88 = vector.load %arg16[%c0_70, %c307] : memref<8x326xf32, #tpu.memory_space<vmem>>, vector<8x19xf32>
    tpu.vector_store %arg16[%c0_70, %c307], %87 {strides = array<i32>} : memref<8x326xf32, #tpu.memory_space<vmem>>, vector<8x19xf32>,
    %cst_71 = arith.constant 0.000000e+00 : f32
    %89 = vector.broadcast %cst_71 : f32 to vector<8x19xf32>
    %c0_72 = arith.constant 0 : index
    %c0_73 = arith.constant 0 : index
    %90 = vector.load %arg17[%c0_72, %c0_73] : memref<8x326xf32, #tpu.memory_space<vmem>>, vector<8x19xf32>
    tpu.vector_store %arg17[%c0_72, %c0_73], %89 {strides = array<i32>} : memref<8x326xf32, #tpu.memory_space<vmem>>, vector<8x19xf32>,
    %cst_74 = arith.constant 0.000000e+00 : f32
    %91 = vector.broadcast %cst_74 : f32 to vector<8x19xf32>
    %c0_75 = arith.constant 0 : index
    %c307_76 = arith.constant 307 : index
    %92 = vector.load %arg17[%c0_75, %c307_76] : memref<8x326xf32, #tpu.memory_space<vmem>>, vector<8x19xf32>
    tpu.vector_store %arg17[%c0_75, %c307_76], %91 {strides = array<i32>} : memref<8x326xf32, #tpu.memory_space<vmem>>, vector<8x19xf32>,
    %cst_77 = arith.constant 0.000000e+00 : f32
    %93 = vector.broadcast %cst_77 : f32 to vector<8x19xf32>
    %c0_78 = arith.constant 0 : index
    %c0_79 = arith.constant 0 : index
    %94 = vector.load %arg18[%c0_78, %c0_79] : memref<8x326xf32, #tpu.memory_space<vmem>>, vector<8x19xf32>
    tpu.vector_store %arg18[%c0_78, %c0_79], %93 {strides = array<i32>} : memref<8x326xf32, #tpu.memory_space<vmem>>, vector<8x19xf32>,
    %cst_80 = arith.constant 0.000000e+00 : f32
    %95 = vector.broadcast %cst_80 : f32 to vector<8x19xf32>
    %c0_81 = arith.constant 0 : index
    %c307_82 = arith.constant 307 : index
    %96 = vector.load %arg18[%c0_81, %c307_82] : memref<8x326xf32, #tpu.memory_space<vmem>>, vector<8x19xf32>
    tpu.vector_store %arg18[%c0_81, %c307_82], %95 {strides = array<i32>} : memref<8x326xf32, #tpu.memory_space<vmem>>, vector<8x19xf32>,
    %cst_83 = arith.constant 0.000000e+00 : f32
    %97 = vector.broadcast %cst_83 : f32 to vector<8x19xf32>
    %c0_84 = arith.constant 0 : index
    %c0_85 = arith.constant 0 : index
    %98 = vector.load %arg19[%c0_84, %c0_85] : memref<8x326xf32, #tpu.memory_space<vmem>>, vector<8x19xf32>
    tpu.vector_store %arg19[%c0_84, %c0_85], %97 {strides = array<i32>} : memref<8x326xf32, #tpu.memory_space<vmem>>, vector<8x19xf32>,
    %cst_86 = arith.constant 0.000000e+00 : f32
    %99 = vector.broadcast %cst_86 : f32 to vector<8x19xf32>
    %c0_87 = arith.constant 0 : index
    %c307_88 = arith.constant 307 : index
    %100 = vector.load %arg19[%c0_87, %c307_88] : memref<8x326xf32, #tpu.memory_space<vmem>>, vector<8x19xf32>
    tpu.vector_store %arg19[%c0_87, %c307_88], %99 {strides = array<i32>} : memref<8x326xf32, #tpu.memory_space<vmem>>, vector<8x19xf32>,
    %c0_89 = arith.constant 0 : index
    %c0_90 = arith.constant 0 : index
    %101 = vector.load %arg14[%c0_89, %c0_90] : memref<8x326xf32, #tpu.memory_space<vmem>>, vector<8x288xf32>
    %c0_91 = arith.constant 0 : index
    %c0_92 = arith.constant 0 : index
    %102 = vector.load %arg20[%c0_91, %c0_92] : memref<72x288xf32, #tpu.memory_space<vmem>>, vector<8x288xf32>
    tpu.vector_store %arg20[%c0_91, %c0_92], %101 {strides = array<i32>} : memref<72x288xf32, #tpu.memory_space<vmem>>, vector<8x288xf32>,
    %c0_93 = arith.constant 0 : index
    %c1 = arith.constant 1 : index
    %103 = vector.load %arg14[%c0_93, %c1] : memref<8x326xf32, #tpu.memory_space<vmem>>, vector<8x288xf32>
    %c8 = arith.constant 8 : index
    %c0_94 = arith.constant 0 : index
    %104 = vector.load %arg20[%c8, %c0_94] : memref<72x288xf32, #tpu.memory_space<vmem>>, vector<8x288xf32>
    tpu.vector_store %arg20[%c8, %c0_94], %103 {strides = array<i32>} : memref<72x288xf32, #tpu.memory_space<vmem>>, vector<8x288xf32>,
    %c0_95 = arith.constant 0 : index
    %c2 = arith.constant 2 : index
    %105 = vector.load %arg14[%c0_95, %c2] : memref<8x326xf32, #tpu.memory_space<vmem>>, vector<8x288xf32>
    %c16 = arith.constant 16 : index
    %c0_96 = arith.constant 0 : index
    %106 = vector.load %arg20[%c16, %c0_96] : memref<72x288xf32, #tpu.memory_space<vmem>>, vector<8x288xf32>
    tpu.vector_store %arg20[%c16, %c0_96], %105 {strides = array<i32>} : memref<72x288xf32, #tpu.memory_space<vmem>>, vector<8x288xf32>,
    %c0_97 = arith.constant 0 : index
    %c18 = arith.constant 18 : index
    %107 = vector.load %arg14[%c0_97, %c18] : memref<8x326xf32, #tpu.memory_space<vmem>>, vector<8x288xf32>
    %c24 = arith.constant 24 : index
    %c0_98 = arith.constant 0 : index
    %108 = vector.load %arg20[%c24, %c0_98] : memref<72x288xf32, #tpu.memory_space<vmem>>, vector<8x288xf32>
    tpu.vector_store %arg20[%c24, %c0_98], %107 {strides = array<i32>} : memref<72x288xf32, #tpu.memory_space<vmem>>, vector<8x288xf32>,
    %c0_99 = arith.constant 0 : index
    %c19 = arith.constant 19 : index
    %109 = vector.load %arg14[%c0_99, %c19] : memref<8x326xf32, #tpu.memory_space<vmem>>, vector<8x288xf32>
    %c32 = arith.constant 32 : index
    %c0_100 = arith.constant 0 : index
    %110 = vector.load %arg20[%c32, %c0_100] : memref<72x288xf32, #tpu.memory_space<vmem>>, vector<8x288xf32>
    tpu.vector_store %arg20[%c32, %c0_100], %109 {strides = array<i32>} : memref<72x288xf32, #tpu.memory_space<vmem>>, vector<8x288xf32>,
    %c0_101 = arith.constant 0 : index
    %c20_102 = arith.constant 20 : index
    %111 = vector.load %arg14[%c0_101, %c20_102] : memref<8x326xf32, #tpu.memory_space<vmem>>, vector<8x288xf32>
    %c40 = arith.constant 40 : index
    %c0_103 = arith.constant 0 : index
    %112 = vector.load %arg20[%c40, %c0_103] : memref<72x288xf32, #tpu.memory_space<vmem>>, vector<8x288xf32>
    tpu.vector_store %arg20[%c40, %c0_103], %111 {strides = array<i32>} : memref<72x288xf32, #tpu.memory_space<vmem>>, vector<8x288xf32>,
    %c0_104 = arith.constant 0 : index
    %c36 = arith.constant 36 : index
    %113 = vector.load %arg14[%c0_104, %c36] : memref<8x326xf32, #tpu.memory_space<vmem>>, vector<8x288xf32>
    %c48 = arith.constant 48 : index
    %c0_105 = arith.constant 0 : index
    %114 = vector.load %arg20[%c48, %c0_105] : memref<72x288xf32, #tpu.memory_space<vmem>>, vector<8x288xf32>
    tpu.vector_store %arg20[%c48, %c0_105], %113 {strides = array<i32>} : memref<72x288xf32, #tpu.memory_space<vmem>>, vector<8x288xf32>,
    %c0_106 = arith.constant 0 : index
    %c37 = arith.constant 37 : index
    %115 = vector.load %arg14[%c0_106, %c37] : memref<8x326xf32, #tpu.memory_space<vmem>>, vector<8x288xf32>
    %c56_107 = arith.constant 56 : index
    %c0_108 = arith.constant 0 : index
    %116 = vector.load %arg20[%c56_107, %c0_108] : memref<72x288xf32, #tpu.memory_space<vmem>>, vector<8x288xf32>
    tpu.vector_store %arg20[%c56_107, %c0_108], %115 {strides = array<i32>} : memref<72x288xf32, #tpu.memory_space<vmem>>, vector<8x288xf32>,
    %c0_109 = arith.constant 0 : index
    %c38_110 = arith.constant 38 : index
    %117 = vector.load %arg14[%c0_109, %c38_110] : memref<8x326xf32, #tpu.memory_space<vmem>>, vector<8x288xf32>
    %c64 = arith.constant 64 : index
    %c0_111 = arith.constant 0 : index
    %118 = vector.load %arg20[%c64, %c0_111] : memref<72x288xf32, #tpu.memory_space<vmem>>, vector<8x288xf32>
    tpu.vector_store %arg20[%c64, %c0_111], %117 {strides = array<i32>} : memref<72x288xf32, #tpu.memory_space<vmem>>, vector<8x288xf32>,
    %c0_112 = arith.constant 0 : index
    %c0_113 = arith.constant 0 : index
    %119 = vector.load %arg3[%c0_112, %c0_113] : memref<8x72xf32, #tpu.memory_space<vmem>>, vector<8x72xf32>
    %c0_114 = arith.constant 0 : index
    %c0_115 = arith.constant 0 : index
    %120 = vector.load %arg20[%c0_114, %c0_115] : memref<72x288xf32, #tpu.memory_space<vmem>>, vector<72x288xf32>
    %cst_116 = arith.constant dense<0.000000e+00> : vector<8x288xf32>
    %121 = tpu.matmul %119, %120, %cst_116 {dimension_numbers = #tpu.dot_dimension_numbers<[1], [0], [0], [1], [0, 0, 1, 1], [], []>} : vector<8x72xf32>, vector<72x288xf32>, vector<8x288xf32> -> vector<8x288xf32>
    %c0_117 = arith.constant 0 : index
    %c0_118 = arith.constant 0 : index
    %122 = vector.load %arg4[%c0_117, %c0_118] : memref<8x1xf32, #tpu.memory_space<vmem>>, vector<8x1xf32>
    %123 = vector.broadcast %122 : vector<8x1xf32> to vector<8x288xf32>
    %124 = arith.addf %121, %123 : vector<8x288xf32>
    %125 = vector.broadcast %1 : vector<1x288xf32> to vector<8x288xf32>
    %126 = arith.mulf %124, %125 : vector<8x288xf32>
    %c0_119 = arith.constant 0 : index
    %c19_120 = arith.constant 19 : index
    %127 = vector.load %arg16[%c0_119, %c19_120] : memref<8x326xf32, #tpu.memory_space<vmem>>, vector<8x288xf32>
    tpu.vector_store %arg16[%c0_119, %c19_120], %126 {strides = array<i32>} : memref<8x326xf32, #tpu.memory_space<vmem>>, vector<8x288xf32>,
    %c0_121 = arith.constant 0 : index
    %c0_122 = arith.constant 0 : index
    %128 = vector.load %arg15[%c0_121, %c0_122] : memref<8x326xf32, #tpu.memory_space<vmem>>, vector<8x288xf32>
    %c0_123 = arith.constant 0 : index
    %c0_124 = arith.constant 0 : index
    %129 = vector.load %arg20[%c0_123, %c0_124] : memref<72x288xf32, #tpu.memory_space<vmem>>, vector<8x288xf32>
    tpu.vector_store %arg20[%c0_123, %c0_124], %128 {strides = array<i32>} : memref<72x288xf32, #tpu.memory_space<vmem>>, vector<8x288xf32>,
    %c0_125 = arith.constant 0 : index
    %c1_126 = arith.constant 1 : index
    %130 = vector.load %arg15[%c0_125, %c1_126] : memref<8x326xf32, #tpu.memory_space<vmem>>, vector<8x288xf32>
    %c8_127 = arith.constant 8 : index
    %c0_128 = arith.constant 0 : index
    %131 = vector.load %arg20[%c8_127, %c0_128] : memref<72x288xf32, #tpu.memory_space<vmem>>, vector<8x288xf32>
    tpu.vector_store %arg20[%c8_127, %c0_128], %130 {strides = array<i32>} : memref<72x288xf32, #tpu.memory_space<vmem>>, vector<8x288xf32>,
    %c0_129 = arith.constant 0 : index
    %c2_130 = arith.constant 2 : index
    %132 = vector.load %arg15[%c0_129, %c2_130] : memref<8x326xf32, #tpu.memory_space<vmem>>, vector<8x288xf32>
    %c16_131 = arith.constant 16 : index
    %c0_132 = arith.constant 0 : index
    %133 = vector.load %arg20[%c16_131, %c0_132] : memref<72x288xf32, #tpu.memory_space<vmem>>, vector<8x288xf32>
    tpu.vector_store %arg20[%c16_131, %c0_132], %132 {strides = array<i32>} : memref<72x288xf32, #tpu.memory_space<vmem>>, vector<8x288xf32>,
    %c0_133 = arith.constant 0 : index
    %c18_134 = arith.constant 18 : index
    %134 = vector.load %arg15[%c0_133, %c18_134] : memref<8x326xf32, #tpu.memory_space<vmem>>, vector<8x288xf32>
    %c24_135 = arith.constant 24 : index
    %c0_136 = arith.constant 0 : index
    %135 = vector.load %arg20[%c24_135, %c0_136] : memref<72x288xf32, #tpu.memory_space<vmem>>, vector<8x288xf32>
    tpu.vector_store %arg20[%c24_135, %c0_136], %134 {strides = array<i32>} : memref<72x288xf32, #tpu.memory_space<vmem>>, vector<8x288xf32>,
    %c0_137 = arith.constant 0 : index
    %c19_138 = arith.constant 19 : index
    %136 = vector.load %arg15[%c0_137, %c19_138] : memref<8x326xf32, #tpu.memory_space<vmem>>, vector<8x288xf32>
    %c32_139 = arith.constant 32 : index
    %c0_140 = arith.constant 0 : index
    %137 = vector.load %arg20[%c32_139, %c0_140] : memref<72x288xf32, #tpu.memory_space<vmem>>, vector<8x288xf32>
    tpu.vector_store %arg20[%c32_139, %c0_140], %136 {strides = array<i32>} : memref<72x288xf32, #tpu.memory_space<vmem>>, vector<8x288xf32>,
    %c0_141 = arith.constant 0 : index
    %c20_142 = arith.constant 20 : index
    %138 = vector.load %arg15[%c0_141, %c20_142] : memref<8x326xf32, #tpu.memory_space<vmem>>, vector<8x288xf32>
    %c40_143 = arith.constant 40 : index
    %c0_144 = arith.constant 0 : index
    %139 = vector.load %arg20[%c40_143, %c0_144] : memref<72x288xf32, #tpu.memory_space<vmem>>, vector<8x288xf32>
    tpu.vector_store %arg20[%c40_143, %c0_144], %138 {strides = array<i32>} : memref<72x288xf32, #tpu.memory_space<vmem>>, vector<8x288xf32>,
    %c0_145 = arith.constant 0 : index
    %c36_146 = arith.constant 36 : index
    %140 = vector.load %arg15[%c0_145, %c36_146] : memref<8x326xf32, #tpu.memory_space<vmem>>, vector<8x288xf32>
    %c48_147 = arith.constant 48 : index
    %c0_148 = arith.constant 0 : index
    %141 = vector.load %arg20[%c48_147, %c0_148] : memref<72x288xf32, #tpu.memory_space<vmem>>, vector<8x288xf32>
    tpu.vector_store %arg20[%c48_147, %c0_148], %140 {strides = array<i32>} : memref<72x288xf32, #tpu.memory_space<vmem>>, vector<8x288xf32>,
    %c0_149 = arith.constant 0 : index
    %c37_150 = arith.constant 37 : index
    %142 = vector.load %arg15[%c0_149, %c37_150] : memref<8x326xf32, #tpu.memory_space<vmem>>, vector<8x288xf32>
    %c56_151 = arith.constant 56 : index
    %c0_152 = arith.constant 0 : index
    %143 = vector.load %arg20[%c56_151, %c0_152] : memref<72x288xf32, #tpu.memory_space<vmem>>, vector<8x288xf32>
    tpu.vector_store %arg20[%c56_151, %c0_152], %142 {strides = array<i32>} : memref<72x288xf32, #tpu.memory_space<vmem>>, vector<8x288xf32>,
    %c0_153 = arith.constant 0 : index
    %c38_154 = arith.constant 38 : index
    %144 = vector.load %arg15[%c0_153, %c38_154] : memref<8x326xf32, #tpu.memory_space<vmem>>, vector<8x288xf32>
    %c64_155 = arith.constant 64 : index
    %c0_156 = arith.constant 0 : index
    %145 = vector.load %arg20[%c64_155, %c0_156] : memref<72x288xf32, #tpu.memory_space<vmem>>, vector<8x288xf32>
    tpu.vector_store %arg20[%c64_155, %c0_156], %144 {strides = array<i32>} : memref<72x288xf32, #tpu.memory_space<vmem>>, vector<8x288xf32>,
    %c0_157 = arith.constant 0 : index
    %c0_158 = arith.constant 0 : index
    %146 = vector.load %arg3[%c0_157, %c0_158] : memref<8x72xf32, #tpu.memory_space<vmem>>, vector<8x72xf32>
    %c0_159 = arith.constant 0 : index
    %c0_160 = arith.constant 0 : index
    %147 = vector.load %arg20[%c0_159, %c0_160] : memref<72x288xf32, #tpu.memory_space<vmem>>, vector<72x288xf32>
    %cst_161 = arith.constant dense<0.000000e+00> : vector<8x288xf32>
    %148 = tpu.matmul %146, %147, %cst_161 {dimension_numbers = #tpu.dot_dimension_numbers<[1], [0], [0], [1], [0, 0, 1, 1], [], []>} : vector<8x72xf32>, vector<72x288xf32>, vector<8x288xf32> -> vector<8x288xf32>
    %c0_162 = arith.constant 0 : index
    %c0_163 = arith.constant 0 : index
    %149 = vector.load %arg4[%c0_162, %c0_163] : memref<8x1xf32, #tpu.memory_space<vmem>>, vector<8x1xf32>
    %150 = vector.broadcast %149 : vector<8x1xf32> to vector<8x288xf32>
    %151 = arith.addf %148, %150 : vector<8x288xf32>
    %152 = vector.broadcast %1 : vector<1x288xf32> to vector<8x288xf32>
    %153 = arith.mulf %151, %152 : vector<8x288xf32>
    %c0_164 = arith.constant 0 : index
    %c19_165 = arith.constant 19 : index
    %154 = vector.load %arg17[%c0_164, %c19_165] : memref<8x326xf32, #tpu.memory_space<vmem>>, vector<8x288xf32>
    tpu.vector_store %arg17[%c0_164, %c19_165], %153 {strides = array<i32>} : memref<8x326xf32, #tpu.memory_space<vmem>>, vector<8x288xf32>,
    %c0_166 = arith.constant 0 : index
    %c0_167 = arith.constant 0 : index
    %155 = vector.load %arg16[%c0_166, %c0_167] : memref<8x326xf32, #tpu.memory_space<vmem>>, vector<8x288xf32>
    %c0_168 = arith.constant 0 : index
    %c0_169 = arith.constant 0 : index
    %156 = vector.load %arg20[%c0_168, %c0_169] : memref<72x288xf32, #tpu.memory_space<vmem>>, vector<8x288xf32>
    tpu.vector_store %arg20[%c0_168, %c0_169], %155 {strides = array<i32>} : memref<72x288xf32, #tpu.memory_space<vmem>>, vector<8x288xf32>,
    %c0_170 = arith.constant 0 : index
    %c1_171 = arith.constant 1 : index
    %157 = vector.load %arg16[%c0_170, %c1_171] : memref<8x326xf32, #tpu.memory_space<vmem>>, vector<8x288xf32>
    %c8_172 = arith.constant 8 : index
    %c0_173 = arith.constant 0 : index
    %158 = vector.load %arg20[%c8_172, %c0_173] : memref<72x288xf32, #tpu.memory_space<vmem>>, vector<8x288xf32>
    tpu.vector_store %arg20[%c8_172, %c0_173], %157 {strides = array<i32>} : memref<72x288xf32, #tpu.memory_space<vmem>>, vector<8x288xf32>,
    %c0_174 = arith.constant 0 : index
    %c2_175 = arith.constant 2 : index
    %159 = vector.load %arg16[%c0_174, %c2_175] : memref<8x326xf32, #tpu.memory_space<vmem>>, vector<8x288xf32>
    %c16_176 = arith.constant 16 : index
    %c0_177 = arith.constant 0 : index
    %160 = vector.load %arg20[%c16_176, %c0_177] : memref<72x288xf32, #tpu.memory_space<vmem>>, vector<8x288xf32>
    tpu.vector_store %arg20[%c16_176, %c0_177], %159 {strides = array<i32>} : memref<72x288xf32, #tpu.memory_space<vmem>>, vector<8x288xf32>,
    %c0_178 = arith.constant 0 : index
    %c18_179 = arith.constant 18 : index
    %161 = vector.load %arg16[%c0_178, %c18_179] : memref<8x326xf32, #tpu.memory_space<vmem>>, vector<8x288xf32>
    %c24_180 = arith.constant 24 : index
    %c0_181 = arith.constant 0 : index
    %162 = vector.load %arg20[%c24_180, %c0_181] : memref<72x288xf32, #tpu.memory_space<vmem>>, vector<8x288xf32>
    tpu.vector_store %arg20[%c24_180, %c0_181], %161 {strides = array<i32>} : memref<72x288xf32, #tpu.memory_space<vmem>>, vector<8x288xf32>,
    %c0_182 = arith.constant 0 : index
    %c19_183 = arith.constant 19 : index
    %163 = vector.load %arg16[%c0_182, %c19_183] : memref<8x326xf32, #tpu.memory_space<vmem>>, vector<8x288xf32>
    %c32_184 = arith.constant 32 : index
    %c0_185 = arith.constant 0 : index
    %164 = vector.load %arg20[%c32_184, %c0_185] : memref<72x288xf32, #tpu.memory_space<vmem>>, vector<8x288xf32>
    tpu.vector_store %arg20[%c32_184, %c0_185], %163 {strides = array<i32>} : memref<72x288xf32, #tpu.memory_space<vmem>>, vector<8x288xf32>,
    %c0_186 = arith.constant 0 : index
    %c20_187 = arith.constant 20 : index
    %165 = vector.load %arg16[%c0_186, %c20_187] : memref<8x326xf32, #tpu.memory_space<vmem>>, vector<8x288xf32>
    %c40_188 = arith.constant 40 : index
    %c0_189 = arith.constant 0 : index
    %166 = vector.load %arg20[%c40_188, %c0_189] : memref<72x288xf32, #tpu.memory_space<vmem>>, vector<8x288xf32>
    tpu.vector_store %arg20[%c40_188, %c0_189], %165 {strides = array<i32>} : memref<72x288xf32, #tpu.memory_space<vmem>>, vector<8x288xf32>,
    %c0_190 = arith.constant 0 : index
    %c36_191 = arith.constant 36 : index
    %167 = vector.load %arg16[%c0_190, %c36_191] : memref<8x326xf32, #tpu.memory_space<vmem>>, vector<8x288xf32>
    %c48_192 = arith.constant 48 : index
    %c0_193 = arith.constant 0 : index
    %168 = vector.load %arg20[%c48_192, %c0_193] : memref<72x288xf32, #tpu.memory_space<vmem>>, vector<8x288xf32>
    tpu.vector_store %arg20[%c48_192, %c0_193], %167 {strides = array<i32>} : memref<72x288xf32, #tpu.memory_space<vmem>>, vector<8x288xf32>,
    %c0_194 = arith.constant 0 : index
    %c37_195 = arith.constant 37 : index
    %169 = vector.load %arg16[%c0_194, %c37_195] : memref<8x326xf32, #tpu.memory_space<vmem>>, vector<8x288xf32>
    %c56_196 = arith.constant 56 : index
    %c0_197 = arith.constant 0 : index
    %170 = vector.load %arg20[%c56_196, %c0_197] : memref<72x288xf32, #tpu.memory_space<vmem>>, vector<8x288xf32>
    tpu.vector_store %arg20[%c56_196, %c0_197], %169 {strides = array<i32>} : memref<72x288xf32, #tpu.memory_space<vmem>>, vector<8x288xf32>,
    %c0_198 = arith.constant 0 : index
    %c38_199 = arith.constant 38 : index
    %171 = vector.load %arg16[%c0_198, %c38_199] : memref<8x326xf32, #tpu.memory_space<vmem>>, vector<8x288xf32>
    %c64_200 = arith.constant 64 : index
    %c0_201 = arith.constant 0 : index
    %172 = vector.load %arg20[%c64_200, %c0_201] : memref<72x288xf32, #tpu.memory_space<vmem>>, vector<8x288xf32>
    tpu.vector_store %arg20[%c64_200, %c0_201], %171 {strides = array<i32>} : memref<72x288xf32, #tpu.memory_space<vmem>>, vector<8x288xf32>,
    %c0_202 = arith.constant 0 : index
    %c0_203 = arith.constant 0 : index
    %173 = vector.load %arg5[%c0_202, %c0_203] : memref<8x72xf32, #tpu.memory_space<vmem>>, vector<8x72xf32>
    %c0_204 = arith.constant 0 : index
    %c0_205 = arith.constant 0 : index
    %174 = vector.load %arg20[%c0_204, %c0_205] : memref<72x288xf32, #tpu.memory_space<vmem>>, vector<72x288xf32>
    %cst_206 = arith.constant dense<0.000000e+00> : vector<8x288xf32>
    %175 = tpu.matmul %173, %174, %cst_206 {dimension_numbers = #tpu.dot_dimension_numbers<[1], [0], [0], [1], [0, 0, 1, 1], [], []>} : vector<8x72xf32>, vector<72x288xf32>, vector<8x288xf32> -> vector<8x288xf32>
    %c0_207 = arith.constant 0 : index
    %c0_208 = arith.constant 0 : index
    %176 = vector.load %arg6[%c0_207, %c0_208] : memref<8x1xf32, #tpu.memory_space<vmem>>, vector<8x1xf32>
    %177 = vector.broadcast %176 : vector<8x1xf32> to vector<8x288xf32>
    %178 = arith.addf %175, %177 : vector<8x288xf32>
    %cst_209 = arith.constant 0.000000e+00 : f32
    %179 = vector.broadcast %cst_209 : f32 to vector<8x288xf32>
    %180 = arith.maximumf %178, %179 : vector<8x288xf32>
    %181 = vector.broadcast %1 : vector<1x288xf32> to vector<8x288xf32>
    %182 = arith.mulf %180, %181 : vector<8x288xf32>
    %c0_210 = arith.constant 0 : index
    %c19_211 = arith.constant 19 : index
    %183 = vector.load %arg18[%c0_210, %c19_211] : memref<8x326xf32, #tpu.memory_space<vmem>>, vector<8x288xf32>
    tpu.vector_store %arg18[%c0_210, %c19_211], %182 {strides = array<i32>} : memref<8x326xf32, #tpu.memory_space<vmem>>, vector<8x288xf32>,
    %c0_212 = arith.constant 0 : index
    %c0_213 = arith.constant 0 : index
    %184 = vector.load %arg17[%c0_212, %c0_213] : memref<8x326xf32, #tpu.memory_space<vmem>>, vector<8x288xf32>
    %c0_214 = arith.constant 0 : index
    %c0_215 = arith.constant 0 : index
    %185 = vector.load %arg20[%c0_214, %c0_215] : memref<72x288xf32, #tpu.memory_space<vmem>>, vector<8x288xf32>
    tpu.vector_store %arg20[%c0_214, %c0_215], %184 {strides = array<i32>} : memref<72x288xf32, #tpu.memory_space<vmem>>, vector<8x288xf32>,
    %c0_216 = arith.constant 0 : index
    %c1_217 = arith.constant 1 : index
    %186 = vector.load %arg17[%c0_216, %c1_217] : memref<8x326xf32, #tpu.memory_space<vmem>>, vector<8x288xf32>
    %c8_218 = arith.constant 8 : index
    %c0_219 = arith.constant 0 : index
    %187 = vector.load %arg20[%c8_218, %c0_219] : memref<72x288xf32, #tpu.memory_space<vmem>>, vector<8x288xf32>
    tpu.vector_store %arg20[%c8_218, %c0_219], %186 {strides = array<i32>} : memref<72x288xf32, #tpu.memory_space<vmem>>, vector<8x288xf32>,
    %c0_220 = arith.constant 0 : index
    %c2_221 = arith.constant 2 : index
    %188 = vector.load %arg17[%c0_220, %c2_221] : memref<8x326xf32, #tpu.memory_space<vmem>>, vector<8x288xf32>
    %c16_222 = arith.constant 16 : index
    %c0_223 = arith.constant 0 : index
    %189 = vector.load %arg20[%c16_222, %c0_223] : memref<72x288xf32, #tpu.memory_space<vmem>>, vector<8x288xf32>
    tpu.vector_store %arg20[%c16_222, %c0_223], %188 {strides = array<i32>} : memref<72x288xf32, #tpu.memory_space<vmem>>, vector<8x288xf32>,
    %c0_224 = arith.constant 0 : index
    %c18_225 = arith.constant 18 : index
    %190 = vector.load %arg17[%c0_224, %c18_225] : memref<8x326xf32, #tpu.memory_space<vmem>>, vector<8x288xf32>
    %c24_226 = arith.constant 24 : index
    %c0_227 = arith.constant 0 : index
    %191 = vector.load %arg20[%c24_226, %c0_227] : memref<72x288xf32, #tpu.memory_space<vmem>>, vector<8x288xf32>
    tpu.vector_store %arg20[%c24_226, %c0_227], %190 {strides = array<i32>} : memref<72x288xf32, #tpu.memory_space<vmem>>, vector<8x288xf32>,
    %c0_228 = arith.constant 0 : index
    %c19_229 = arith.constant 19 : index
    %192 = vector.load %arg17[%c0_228, %c19_229] : memref<8x326xf32, #tpu.memory_space<vmem>>, vector<8x288xf32>
    %c32_230 = arith.constant 32 : index
    %c0_231 = arith.constant 0 : index
    %193 = vector.load %arg20[%c32_230, %c0_231] : memref<72x288xf32, #tpu.memory_space<vmem>>, vector<8x288xf32>
    tpu.vector_store %arg20[%c32_230, %c0_231], %192 {strides = array<i32>} : memref<72x288xf32, #tpu.memory_space<vmem>>, vector<8x288xf32>,
    %c0_232 = arith.constant 0 : index
    %c20_233 = arith.constant 20 : index
    %194 = vector.load %arg17[%c0_232, %c20_233] : memref<8x326xf32, #tpu.memory_space<vmem>>, vector<8x288xf32>
    %c40_234 = arith.constant 40 : index
    %c0_235 = arith.constant 0 : index
    %195 = vector.load %arg20[%c40_234, %c0_235] : memref<72x288xf32, #tpu.memory_space<vmem>>, vector<8x288xf32>
    tpu.vector_store %arg20[%c40_234, %c0_235], %194 {strides = array<i32>} : memref<72x288xf32, #tpu.memory_space<vmem>>, vector<8x288xf32>,
    %c0_236 = arith.constant 0 : index
    %c36_237 = arith.constant 36 : index
    %196 = vector.load %arg17[%c0_236, %c36_237] : memref<8x326xf32, #tpu.memory_space<vmem>>, vector<8x288xf32>
    %c48_238 = arith.constant 48 : index
    %c0_239 = arith.constant 0 : index
    %197 = vector.load %arg20[%c48_238, %c0_239] : memref<72x288xf32, #tpu.memory_space<vmem>>, vector<8x288xf32>
    tpu.vector_store %arg20[%c48_238, %c0_239], %196 {strides = array<i32>} : memref<72x288xf32, #tpu.memory_space<vmem>>, vector<8x288xf32>,
    %c0_240 = arith.constant 0 : index
    %c37_241 = arith.constant 37 : index
    %198 = vector.load %arg17[%c0_240, %c37_241] : memref<8x326xf32, #tpu.memory_space<vmem>>, vector<8x288xf32>
    %c56_242 = arith.constant 56 : index
    %c0_243 = arith.constant 0 : index
    %199 = vector.load %arg20[%c56_242, %c0_243] : memref<72x288xf32, #tpu.memory_space<vmem>>, vector<8x288xf32>
    tpu.vector_store %arg20[%c56_242, %c0_243], %198 {strides = array<i32>} : memref<72x288xf32, #tpu.memory_space<vmem>>, vector<8x288xf32>,
    %c0_244 = arith.constant 0 : index
    %c38_245 = arith.constant 38 : index
    %200 = vector.load %arg17[%c0_244, %c38_245] : memref<8x326xf32, #tpu.memory_space<vmem>>, vector<8x288xf32>
    %c64_246 = arith.constant 64 : index
    %c0_247 = arith.constant 0 : index
    %201 = vector.load %arg20[%c64_246, %c0_247] : memref<72x288xf32, #tpu.memory_space<vmem>>, vector<8x288xf32>
    tpu.vector_store %arg20[%c64_246, %c0_247], %200 {strides = array<i32>} : memref<72x288xf32, #tpu.memory_space<vmem>>, vector<8x288xf32>,
    %c0_248 = arith.constant 0 : index
    %c0_249 = arith.constant 0 : index
    %202 = vector.load %arg5[%c0_248, %c0_249] : memref<8x72xf32, #tpu.memory_space<vmem>>, vector<8x72xf32>
    %c0_250 = arith.constant 0 : index
    %c0_251 = arith.constant 0 : index
    %203 = vector.load %arg20[%c0_250, %c0_251] : memref<72x288xf32, #tpu.memory_space<vmem>>, vector<72x288xf32>
    %cst_252 = arith.constant dense<0.000000e+00> : vector<8x288xf32>
    %204 = tpu.matmul %202, %203, %cst_252 {dimension_numbers = #tpu.dot_dimension_numbers<[1], [0], [0], [1], [0, 0, 1, 1], [], []>} : vector<8x72xf32>, vector<72x288xf32>, vector<8x288xf32> -> vector<8x288xf32>
    %c0_253 = arith.constant 0 : index
    %c0_254 = arith.constant 0 : index
    %205 = vector.load %arg6[%c0_253, %c0_254] : memref<8x1xf32, #tpu.memory_space<vmem>>, vector<8x1xf32>
    %206 = vector.broadcast %205 : vector<8x1xf32> to vector<8x288xf32>
    %207 = arith.addf %204, %206 : vector<8x288xf32>
    %cst_255 = arith.constant 0.000000e+00 : f32
    %208 = vector.broadcast %cst_255 : f32 to vector<8x288xf32>
    %209 = arith.maximumf %207, %208 : vector<8x288xf32>
    %210 = vector.broadcast %1 : vector<1x288xf32> to vector<8x288xf32>
    %211 = arith.mulf %209, %210 : vector<8x288xf32>
    %c0_256 = arith.constant 0 : index
    %c19_257 = arith.constant 19 : index
    %212 = vector.load %arg19[%c0_256, %c19_257] : memref<8x326xf32, #tpu.memory_space<vmem>>, vector<8x288xf32>
    tpu.vector_store %arg19[%c0_256, %c19_257], %211 {strides = array<i32>} : memref<8x326xf32, #tpu.memory_space<vmem>>, vector<8x288xf32>,
    %213 = arith.mulf %182, %182 : vector<8x288xf32>
    %cst_258 = arith.constant dense<0.000000e+00> : vector<288xf32>
    %214 = vector.multi_reduction <add>, %213, %cst_258 [0] : vector<8x288xf32> to vector<288xf32>
    %215 = vector.shape_cast %214 : vector<288xf32> to vector<1x288xf32>
    %cst_259 = arith.constant 9.99999968E-21 : f32
    %216 = vector.broadcast %cst_259 : f32 to vector<1x288xf32>
    %217 = arith.addf %215, %216 : vector<1x288xf32>
    %218 = math.rsqrt %217 : vector<1x288xf32>
    %219 = vector.broadcast %218 : vector<1x288xf32> to vector<8x288xf32>
    %220 = arith.mulf %182, %219 : vector<8x288xf32>
    %221 = arith.mulf %211, %211 : vector<8x288xf32>
    %cst_260 = arith.constant dense<0.000000e+00> : vector<288xf32>
    %222 = vector.multi_reduction <add>, %221, %cst_260 [0] : vector<8x288xf32> to vector<288xf32>
    %223 = vector.shape_cast %222 : vector<288xf32> to vector<1x288xf32>
    %cst_261 = arith.constant 9.99999968E-21 : f32
    %224 = vector.broadcast %cst_261 : f32 to vector<1x288xf32>
    %225 = arith.addf %223, %224 : vector<1x288xf32>
    %226 = math.rsqrt %225 : vector<1x288xf32>
    %227 = vector.broadcast %226 : vector<1x288xf32> to vector<8x288xf32>
    %228 = arith.mulf %211, %227 : vector<8x288xf32>
    %229 = arith.subf %220, %228 : vector<8x288xf32>
    %230 = arith.mulf %229, %229 : vector<8x288xf32>
    %c0_262 = arith.constant 0 : index
    %c0_263 = arith.constant 0 : index
    %231 = vector.load %arg9[%c0_262, %c0_263] : memref<8x1xf32, #tpu.memory_space<vmem>>, vector<8x1xf32>
    %232 = vector.broadcast %231 : vector<8x1xf32> to vector<8x288xf32>
    %233 = arith.mulf %230, %232 : vector<8x288xf32>
    %cst_264 = arith.constant dense<0.000000e+00> : vector<288xf32>
    %234 = vector.multi_reduction <add>, %233, %cst_264 [0] : vector<8x288xf32> to vector<288xf32>
    %235 = vector.shape_cast %234 : vector<288xf32> to vector<1x288xf32>
    %cst_265 = arith.constant dense<0.000000e+00> : vector<1xf32>
    %236 = vector.multi_reduction <add>, %235, %cst_265 [1] : vector<1x288xf32> to vector<1xf32>
    %237 = vector.shape_cast %236 : vector<1xf32> to vector<1x1xf32>
    %cst_266 = arith.constant 3.906250e-03 : f32
    %238 = vector.broadcast %cst_266 : f32 to vector<1x1xf32>
    %239 = arith.mulf %237, %238 : vector<1x1xf32>
    %c0_267 = arith.constant 0 : index
    %c0_268 = arith.constant 0 : index
    %240 = vector.load %arg18[%c0_267, %c0_268] : memref<8x326xf32, #tpu.memory_space<vmem>>, vector<8x288xf32>
    %c0_269 = arith.constant 0 : index
    %c0_270 = arith.constant 0 : index
    %241 = vector.load %arg20[%c0_269, %c0_270] : memref<72x288xf32, #tpu.memory_space<vmem>>, vector<8x288xf32>
    tpu.vector_store %arg20[%c0_269, %c0_270], %240 {strides = array<i32>} : memref<72x288xf32, #tpu.memory_space<vmem>>, vector<8x288xf32>,
    %c0_271 = arith.constant 0 : index
    %c1_272 = arith.constant 1 : index
    %242 = vector.load %arg18[%c0_271, %c1_272] : memref<8x326xf32, #tpu.memory_space<vmem>>, vector<8x288xf32>
    %c8_273 = arith.constant 8 : index
    %c0_274 = arith.constant 0 : index
    %243 = vector.load %arg20[%c8_273, %c0_274] : memref<72x288xf32, #tpu.memory_space<vmem>>, vector<8x288xf32>
    tpu.vector_store %arg20[%c8_273, %c0_274], %242 {strides = array<i32>} : memref<72x288xf32, #tpu.memory_space<vmem>>, vector<8x288xf32>,
    %c0_275 = arith.constant 0 : index
    %c2_276 = arith.constant 2 : index
    %244 = vector.load %arg18[%c0_275, %c2_276] : memref<8x326xf32, #tpu.memory_space<vmem>>, vector<8x288xf32>
    %c16_277 = arith.constant 16 : index
    %c0_278 = arith.constant 0 : index
    %245 = vector.load %arg20[%c16_277, %c0_278] : memref<72x288xf32, #tpu.memory_space<vmem>>, vector<8x288xf32>
    tpu.vector_store %arg20[%c16_277, %c0_278], %244 {strides = array<i32>} : memref<72x288xf32, #tpu.memory_space<vmem>>, vector<8x288xf32>,
    %c0_279 = arith.constant 0 : index
    %c18_280 = arith.constant 18 : index
    %246 = vector.load %arg18[%c0_279, %c18_280] : memref<8x326xf32, #tpu.memory_space<vmem>>, vector<8x288xf32>
    %c24_281 = arith.constant 24 : index
    %c0_282 = arith.constant 0 : index
    %247 = vector.load %arg20[%c24_281, %c0_282] : memref<72x288xf32, #tpu.memory_space<vmem>>, vector<8x288xf32>
    tpu.vector_store %arg20[%c24_281, %c0_282], %246 {strides = array<i32>} : memref<72x288xf32, #tpu.memory_space<vmem>>, vector<8x288xf32>,
    %c0_283 = arith.constant 0 : index
    %c19_284 = arith.constant 19 : index
    %248 = vector.load %arg18[%c0_283, %c19_284] : memref<8x326xf32, #tpu.memory_space<vmem>>, vector<8x288xf32>
    %c32_285 = arith.constant 32 : index
    %c0_286 = arith.constant 0 : index
    %249 = vector.load %arg20[%c32_285, %c0_286] : memref<72x288xf32, #tpu.memory_space<vmem>>, vector<8x288xf32>
    tpu.vector_store %arg20[%c32_285, %c0_286], %248 {strides = array<i32>} : memref<72x288xf32, #tpu.memory_space<vmem>>, vector<8x288xf32>,
    %c0_287 = arith.constant 0 : index
    %c20_288 = arith.constant 20 : index
    %250 = vector.load %arg18[%c0_287, %c20_288] : memref<8x326xf32, #tpu.memory_space<vmem>>, vector<8x288xf32>
    %c40_289 = arith.constant 40 : index
    %c0_290 = arith.constant 0 : index
    %251 = vector.load %arg20[%c40_289, %c0_290] : memref<72x288xf32, #tpu.memory_space<vmem>>, vector<8x288xf32>
    tpu.vector_store %arg20[%c40_289, %c0_290], %250 {strides = array<i32>} : memref<72x288xf32, #tpu.memory_space<vmem>>, vector<8x288xf32>,
    %c0_291 = arith.constant 0 : index
    %c36_292 = arith.constant 36 : index
    %252 = vector.load %arg18[%c0_291, %c36_292] : memref<8x326xf32, #tpu.memory_space<vmem>>, vector<8x288xf32>
    %c48_293 = arith.constant 48 : index
    %c0_294 = arith.constant 0 : index
    %253 = vector.load %arg20[%c48_293, %c0_294] : memref<72x288xf32, #tpu.memory_space<vmem>>, vector<8x288xf32>
    tpu.vector_store %arg20[%c48_293, %c0_294], %252 {strides = array<i32>} : memref<72x288xf32, #tpu.memory_space<vmem>>, vector<8x288xf32>,
    %c0_295 = arith.constant 0 : index
    %c37_296 = arith.constant 37 : index
    %254 = vector.load %arg18[%c0_295, %c37_296] : memref<8x326xf32, #tpu.memory_space<vmem>>, vector<8x288xf32>
    %c56_297 = arith.constant 56 : index
    %c0_298 = arith.constant 0 : index
    %255 = vector.load %arg20[%c56_297, %c0_298] : memref<72x288xf32, #tpu.memory_space<vmem>>, vector<8x288xf32>
    tpu.vector_store %arg20[%c56_297, %c0_298], %254 {strides = array<i32>} : memref<72x288xf32, #tpu.memory_space<vmem>>, vector<8x288xf32>,
    %c0_299 = arith.constant 0 : index
    %c38_300 = arith.constant 38 : index
    %256 = vector.load %arg18[%c0_299, %c38_300] : memref<8x326xf32, #tpu.memory_space<vmem>>, vector<8x288xf32>
    %c64_301 = arith.constant 64 : index
    %c0_302 = arith.constant 0 : index
    %257 = vector.load %arg20[%c64_301, %c0_302] : memref<72x288xf32, #tpu.memory_space<vmem>>, vector<8x288xf32>
    tpu.vector_store %arg20[%c64_301, %c0_302], %256 {strides = array<i32>} : memref<72x288xf32, #tpu.memory_space<vmem>>, vector<8x288xf32>,
    %c0_303 = arith.constant 0 : index
    %c0_304 = arith.constant 0 : index
    %258 = vector.load %arg7[%c0_303, %c0_304] : memref<16x72xf32, #tpu.memory_space<vmem>>, vector<16x72xf32>
    %c0_305 = arith.constant 0 : index
    %c0_306 = arith.constant 0 : index
    %259 = vector.load %arg20[%c0_305, %c0_306] : memref<72x288xf32, #tpu.memory_space<vmem>>, vector<72x288xf32>
    %cst_307 = arith.constant dense<0.000000e+00> : vector<16x288xf32>
    %260 = tpu.matmul %258, %259, %cst_307 {dimension_numbers = #tpu.dot_dimension_numbers<[1], [0], [0], [1], [0, 0, 1, 1], [], []>} : vector<16x72xf32>, vector<72x288xf32>, vector<16x288xf32> -> vector<16x288xf32>
    %c0_308 = arith.constant 0 : index
    %c0_309 = arith.constant 0 : index
    %261 = vector.load %arg8[%c0_308, %c0_309] : memref<16x1xf32, #tpu.memory_space<vmem>>, vector<16x1xf32>
    %262 = vector.broadcast %261 : vector<16x1xf32> to vector<16x288xf32>
    %263 = arith.addf %260, %262 : vector<16x288xf32>
    %cst_310 = arith.constant 0.000000e+00 : f32
    %264 = vector.broadcast %cst_310 : f32 to vector<16x288xf32>
    %265 = arith.maximumf %263, %264 : vector<16x288xf32>
    %c0_311 = arith.constant 0 : index
    %c0_312 = arith.constant 0 : index
    %266 = vector.load %arg19[%c0_311, %c0_312] : memref<8x326xf32, #tpu.memory_space<vmem>>, vector<8x288xf32>
    %c0_313 = arith.constant 0 : index
    %c0_314 = arith.constant 0 : index
    %267 = vector.load %arg20[%c0_313, %c0_314] : memref<72x288xf32, #tpu.memory_space<vmem>>, vector<8x288xf32>
    tpu.vector_store %arg20[%c0_313, %c0_314], %266 {strides = array<i32>} : memref<72x288xf32, #tpu.memory_space<vmem>>, vector<8x288xf32>,
    %c0_315 = arith.constant 0 : index
    %c1_316 = arith.constant 1 : index
    %268 = vector.load %arg19[%c0_315, %c1_316] : memref<8x326xf32, #tpu.memory_space<vmem>>, vector<8x288xf32>
    %c8_317 = arith.constant 8 : index
    %c0_318 = arith.constant 0 : index
    %269 = vector.load %arg20[%c8_317, %c0_318] : memref<72x288xf32, #tpu.memory_space<vmem>>, vector<8x288xf32>
    tpu.vector_store %arg20[%c8_317, %c0_318], %268 {strides = array<i32>} : memref<72x288xf32, #tpu.memory_space<vmem>>, vector<8x288xf32>,
    %c0_319 = arith.constant 0 : index
    %c2_320 = arith.constant 2 : index
    %270 = vector.load %arg19[%c0_319, %c2_320] : memref<8x326xf32, #tpu.memory_space<vmem>>, vector<8x288xf32>
    %c16_321 = arith.constant 16 : index
    %c0_322 = arith.constant 0 : index
    %271 = vector.load %arg20[%c16_321, %c0_322] : memref<72x288xf32, #tpu.memory_space<vmem>>, vector<8x288xf32>
    tpu.vector_store %arg20[%c16_321, %c0_322], %270 {strides = array<i32>} : memref<72x288xf32, #tpu.memory_space<vmem>>, vector<8x288xf32>,
    %c0_323 = arith.constant 0 : index
    %c18_324 = arith.constant 18 : index
    %272 = vector.load %arg19[%c0_323, %c18_324] : memref<8x326xf32, #tpu.memory_space<vmem>>, vector<8x288xf32>
    %c24_325 = arith.constant 24 : index
    %c0_326 = arith.constant 0 : index
    %273 = vector.load %arg20[%c24_325, %c0_326] : memref<72x288xf32, #tpu.memory_space<vmem>>, vector<8x288xf32>
    tpu.vector_store %arg20[%c24_325, %c0_326], %272 {strides = array<i32>} : memref<72x288xf32, #tpu.memory_space<vmem>>, vector<8x288xf32>,
    %c0_327 = arith.constant 0 : index
    %c19_328 = arith.constant 19 : index
    %274 = vector.load %arg19[%c0_327, %c19_328] : memref<8x326xf32, #tpu.memory_space<vmem>>, vector<8x288xf32>
    %c32_329 = arith.constant 32 : index
    %c0_330 = arith.constant 0 : index
    %275 = vector.load %arg20[%c32_329, %c0_330] : memref<72x288xf32, #tpu.memory_space<vmem>>, vector<8x288xf32>
    tpu.vector_store %arg20[%c32_329, %c0_330], %274 {strides = array<i32>} : memref<72x288xf32, #tpu.memory_space<vmem>>, vector<8x288xf32>,
    %c0_331 = arith.constant 0 : index
    %c20_332 = arith.constant 20 : index
    %276 = vector.load %arg19[%c0_331, %c20_332] : memref<8x326xf32, #tpu.memory_space<vmem>>, vector<8x288xf32>
    %c40_333 = arith.constant 40 : index
    %c0_334 = arith.constant 0 : index
    %277 = vector.load %arg20[%c40_333, %c0_334] : memref<72x288xf32, #tpu.memory_space<vmem>>, vector<8x288xf32>
    tpu.vector_store %arg20[%c40_333, %c0_334], %276 {strides = array<i32>} : memref<72x288xf32, #tpu.memory_space<vmem>>, vector<8x288xf32>,
    %c0_335 = arith.constant 0 : index
    %c36_336 = arith.constant 36 : index
    %278 = vector.load %arg19[%c0_335, %c36_336] : memref<8x326xf32, #tpu.memory_space<vmem>>, vector<8x288xf32>
    %c48_337 = arith.constant 48 : index
    %c0_338 = arith.constant 0 : index
    %279 = vector.load %arg20[%c48_337, %c0_338] : memref<72x288xf32, #tpu.memory_space<vmem>>, vector<8x288xf32>
    tpu.vector_store %arg20[%c48_337, %c0_338], %278 {strides = array<i32>} : memref<72x288xf32, #tpu.memory_space<vmem>>, vector<8x288xf32>,
    %c0_339 = arith.constant 0 : index
    %c37_340 = arith.constant 37 : index
    %280 = vector.load %arg19[%c0_339, %c37_340] : memref<8x326xf32, #tpu.memory_space<vmem>>, vector<8x288xf32>
    %c56_341 = arith.constant 56 : index
    %c0_342 = arith.constant 0 : index
    %281 = vector.load %arg20[%c56_341, %c0_342] : memref<72x288xf32, #tpu.memory_space<vmem>>, vector<8x288xf32>
    tpu.vector_store %arg20[%c56_341, %c0_342], %280 {strides = array<i32>} : memref<72x288xf32, #tpu.memory_space<vmem>>, vector<8x288xf32>,
    %c0_343 = arith.constant 0 : index
    %c38_344 = arith.constant 38 : index
    %282 = vector.load %arg19[%c0_343, %c38_344] : memref<8x326xf32, #tpu.memory_space<vmem>>, vector<8x288xf32>
    %c64_345 = arith.constant 64 : index
    %c0_346 = arith.constant 0 : index
    %283 = vector.load %arg20[%c64_345, %c0_346] : memref<72x288xf32, #tpu.memory_space<vmem>>, vector<8x288xf32>
    tpu.vector_store %arg20[%c64_345, %c0_346], %282 {strides = array<i32>} : memref<72x288xf32, #tpu.memory_space<vmem>>, vector<8x288xf32>,
    %c0_347 = arith.constant 0 : index
    %c0_348 = arith.constant 0 : index
    %284 = vector.load %arg7[%c0_347, %c0_348] : memref<16x72xf32, #tpu.memory_space<vmem>>, vector<16x72xf32>
    %c0_349 = arith.constant 0 : index
    %c0_350 = arith.constant 0 : index
    %285 = vector.load %arg20[%c0_349, %c0_350] : memref<72x288xf32, #tpu.memory_space<vmem>>, vector<72x288xf32>
    %cst_351 = arith.constant dense<0.000000e+00> : vector<16x288xf32>
    %286 = tpu.matmul %284, %285, %cst_351 {dimension_numbers = #tpu.dot_dimension_numbers<[1], [0], [0], [1], [0, 0, 1, 1], [], []>} : vector<16x72xf32>, vector<72x288xf32>, vector<16x288xf32> -> vector<16x288xf32>
    %c0_352 = arith.constant 0 : index
    %c0_353 = arith.constant 0 : index
    %287 = vector.load %arg8[%c0_352, %c0_353] : memref<16x1xf32, #tpu.memory_space<vmem>>, vector<16x1xf32>
    %288 = vector.broadcast %287 : vector<16x1xf32> to vector<16x288xf32>
    %289 = arith.addf %286, %288 : vector<16x288xf32>
    %cst_354 = arith.constant 0.000000e+00 : f32
    %290 = vector.broadcast %cst_354 : f32 to vector<16x288xf32>
    %291 = arith.maximumf %289, %290 : vector<16x288xf32>
    %292 = arith.mulf %265, %265 : vector<16x288xf32>
    %cst_355 = arith.constant dense<0.000000e+00> : vector<288xf32>
    %293 = vector.multi_reduction <add>, %292, %cst_355 [0] : vector<16x288xf32> to vector<288xf32>
    %294 = vector.shape_cast %293 : vector<288xf32> to vector<1x288xf32>
    %cst_356 = arith.constant 9.99999968E-21 : f32
    %295 = vector.broadcast %cst_356 : f32 to vector<1x288xf32>
    %296 = arith.addf %294, %295 : vector<1x288xf32>
    %297 = math.rsqrt %296 : vector<1x288xf32>
    %298 = vector.broadcast %297 : vector<1x288xf32> to vector<16x288xf32>
    %299 = arith.mulf %265, %298 : vector<16x288xf32>
    %300 = arith.mulf %291, %291 : vector<16x288xf32>
    %cst_357 = arith.constant dense<0.000000e+00> : vector<288xf32>
    %301 = vector.multi_reduction <add>, %300, %cst_357 [0] : vector<16x288xf32> to vector<288xf32>
    %302 = vector.shape_cast %301 : vector<288xf32> to vector<1x288xf32>
    %cst_358 = arith.constant 9.99999968E-21 : f32
    %303 = vector.broadcast %cst_358 : f32 to vector<1x288xf32>
    %304 = arith.addf %302, %303 : vector<1x288xf32>
    %305 = math.rsqrt %304 : vector<1x288xf32>
    %306 = vector.broadcast %305 : vector<1x288xf32> to vector<16x288xf32>
    %307 = arith.mulf %291, %306 : vector<16x288xf32>
    %308 = arith.subf %299, %307 : vector<16x288xf32>
    %309 = arith.mulf %308, %308 : vector<16x288xf32>
    %c0_359 = arith.constant 0 : index
    %c0_360 = arith.constant 0 : index
    %310 = vector.load %arg10[%c0_359, %c0_360] : memref<16x1xf32, #tpu.memory_space<vmem>>, vector<16x1xf32>
    %311 = vector.broadcast %310 : vector<16x1xf32> to vector<16x288xf32>
    %312 = arith.mulf %309, %311 : vector<16x288xf32>
    %cst_361 = arith.constant dense<0.000000e+00> : vector<288xf32>
    %313 = vector.multi_reduction <add>, %312, %cst_361 [0] : vector<16x288xf32> to vector<288xf32>
    %314 = vector.shape_cast %313 : vector<288xf32> to vector<1x288xf32>
    %315 = arith.mulf %314, %1 : vector<1x288xf32>
    %cst_362 = arith.constant dense<0.000000e+00> : vector<1xf32>
    %316 = vector.multi_reduction <add>, %315, %cst_362 [1] : vector<1x288xf32> to vector<1xf32>
    %317 = vector.shape_cast %316 : vector<1xf32> to vector<1x1xf32>
    %cst_363 = arith.constant 3.906250e-03 : f32
    %318 = vector.broadcast %cst_363 : f32 to vector<1x1xf32>
    %319 = arith.mulf %317, %318 : vector<1x1xf32>
    %320 = arith.addf %239, %319 : vector<1x1xf32>
    %321 = vector.broadcast %320 : vector<1x1xf32> to vector<1x128xf32>
    %322 = arith.mulf %321, %0 : vector<1x128xf32>
    %c0_364 = arith.constant 0 : index
    %c0_365 = arith.constant 0 : index
    %c0_366 = arith.constant 0 : index
    %323 = vector.load %arg12[%c0_364, %c0_365, %c0_366] : memref<1x1x128xf32, #tpu.memory_space<vmem>>, vector<1x1x128xf32>
    %324 = vector.shape_cast %323 : vector<1x1x128xf32> to vector<1x128xf32>
    %325 = vector.shape_cast %322 : vector<1x128xf32> to vector<1x1x128xf32>
    tpu.vector_store %arg12[%c0_364, %c0_365, %c0_366], %325 {strides = array<i32>} : memref<1x1x128xf32, #tpu.memory_space<vmem>>, vector<1x1x128xf32>,
    return
  }
  func.func @transform_0(%arg0: i32) -> (i32, i32, i32) {
    %c0_i32 = arith.constant 0 : i32
    %c0_i32_0 = arith.constant 0 : i32
    %c0_i32_1 = arith.constant 0 : i32
    return %arg0, %c0_i32, %c0_i32_0 : i32, i32, i32
  }
  func.func @transform_1(%arg0: i32) -> (i32, i32, i32) {
    %c0_i32 = arith.constant 0 : i32
    %c0_i32_0 = arith.constant 0 : i32
    %c0_i32_1 = arith.constant 0 : i32
    return %arg0, %c0_i32, %c0_i32_0 : i32, i32, i32
  }
  func.func @transform_2(%arg0: i32) -> (i32, i32) {
    %c0_i32 = arith.constant 0 : i32
    %c0_i32_0 = arith.constant 0 : i32
    %c0_i32_1 = arith.constant 0 : i32
    return %c0_i32, %c0_i32_0 : i32, i32
  }
  func.func @transform_3(%arg0: i32) -> (i32, i32) {
    %c0_i32 = arith.constant 0 : i32
    %c0_i32_0 = arith.constant 0 : i32
    %c0_i32_1 = arith.constant 0 : i32
    return %c0_i32, %c0_i32_0 : i32, i32
  }
  func.func @transform_4(%arg0: i32) -> (i32, i32) {
    %c0_i32 = arith.constant 0 : i32
    %c0_i32_0 = arith.constant 0 : i32
    %c0_i32_1 = arith.constant 0 : i32
    return %c0_i32, %c0_i32_0 : i32, i32
  }
  func.func @transform_5(%arg0: i32) -> (i32, i32) {
    %c0_i32 = arith.constant 0 : i32
    %c0_i32_0 = arith.constant 0 : i32
    %c0_i32_1 = arith.constant 0 : i32
    return %c0_i32, %c0_i32_0 : i32, i32
  }
  func.func @transform_6(%arg0: i32) -> (i32, i32) {
    %c0_i32 = arith.constant 0 : i32
    %c0_i32_0 = arith.constant 0 : i32
    %c0_i32_1 = arith.constant 0 : i32
    return %c0_i32, %c0_i32_0 : i32, i32
  }
  func.func @transform_7(%arg0: i32) -> (i32, i32) {
    %c0_i32 = arith.constant 0 : i32
    %c0_i32_0 = arith.constant 0 : i32
    %c0_i32_1 = arith.constant 0 : i32
    return %c0_i32, %c0_i32_0 : i32, i32
  }
  func.func @transform_8(%arg0: i32) -> (i32, i32) {
    %c0_i32 = arith.constant 0 : i32
    %c0_i32_0 = arith.constant 0 : i32
    %c0_i32_1 = arith.constant 0 : i32
    return %c0_i32, %c0_i32_0 : i32, i32
  }
  func.func @transform_9(%arg0: i32) -> (i32, i32) {
    %c0_i32 = arith.constant 0 : i32
    %c0_i32_0 = arith.constant 0 : i32
    %c0_i32_1 = arith.constant 0 : i32
    return %c0_i32, %c0_i32_0 : i32, i32
  }
  func.func @transform_10(%arg0: i32) -> (i32, i32) {
    %c0_i32 = arith.constant 0 : i32
    %c0_i32_0 = arith.constant 0 : i32
    %c0_i32_1 = arith.constant 0 : i32
    return %c0_i32, %c0_i32_0 : i32, i32
  }
  func.func @transform_11(%arg0: i32) -> (i32, i32, i32) {
    %c0_i32 = arith.constant 0 : i32
    %c0_i32_0 = arith.constant 0 : i32
    %c0_i32_1 = arith.constant 0 : i32
    return %arg0, %c0_i32, %c0_i32_0 : i32, i32, i32
  }
  func.func @transform_12(%arg0: i32) -> (i32, i32, i32) {
    %c0_i32 = arith.constant 0 : i32
    %c0_i32_0 = arith.constant 0 : i32
    %c0_i32_1 = arith.constant 0 : i32
    return %arg0, %c0_i32, %c0_i32_0 : i32, i32, i32
  }
}

</mosaic_0001>

<bundles_post_ra>
// kernel: tpu_custom_call.1
= control target key start
LH: loop header
LB: loop body
LE: loop exit
PB: predicated region body
PF: predicated region fallthrough
CT: control target
= control target key end

     0   :  { %s4732_s0 = inlined_call_operand.vmem [shape: f32[2,4,256], index: 0, kind: input, shape index: {}]   ;;  %s4733_s1 = inlined_call_operand.vmem [shape: f32[2,4,256], index: 1, kind: input, shape index: {}]   ;;  %s4734_s2 = inlined_call_operand.vmem [shape: f32[8,72], index: 2, kind: input, shape index: {}]   ;;  %s4735_s3 = inlined_call_operand.vmem [shape: f32[8,1], index: 3, kind: input, shape index: {}]   ;;  %s4736_s4 = inlined_call_operand.vmem [shape: f32[8,72], index: 4, kind: input, shape index: {}]   ;;  %s4737_s5 = inlined_call_operand.vmem [shape: f32[8,1], index: 5, kind: input, shape index: {}]   ;;  %s4738_s6 = inlined_call_operand.vmem [shape: f32[16,72], index: 6, kind: input, shape index: {}]   ;;  %s4739_s7 = inlined_call_operand.vmem [shape: f32[16,1], index: 7, kind: input, shape index: {}]   ;;  %s4740_s8 = inlined_call_operand.vmem [shape: f32[8,1], index: 8, kind: input, shape index: {}]   ;;  %s4741_s9 = inlined_call_operand.vmem [shape: f32[16,1], index: 9, kind: input, shape index: {}]   ;;  %s4742_s10 = inlined_call_operand.vmem [shape: f32[1,288], index: 10, kind: input, shape index: {}]   ;;  %s4743_s11 = inlined_call_operand.hbm [shape: f32[2,1,128], index: 11, kind: output, shape index: {0}]   ;;  %s4744_s12 = inlined_call_operand.hbm [shape: f32[2,1,128], index: 12, kind: output, shape index: {1}]  }
   0x1   :  { %4766 = sst [smem:[#allocation24_spill]] %s4732_s0 }
   0x2   :  { %4767 = sst [smem:[#allocation25_spill]] %s4743_s11 }
   0x3   :  { %4768 = sst [smem:[#allocation26_spill]] %s4744_s12 }
   0x4   :  { %18 = vsyncpa [#allocation10], 0 }
   0x5   :  { %20 = vsyncpa [#allocation10 + $0x1], 0 }
   0x6   :  { %21 = vsyncpa [#allocation12], 0 }
   0x7   :  { %23 = vsyncpa [#allocation12 + $0x1], 0  ;;  %s3747_s21 = smov 0   ;;  %s3749_s22 = smov 0  }
   0x8   :  { %s3751_s23 = smov 0   ;;  %s3753_s24 = smov 0  }
   0x9 LB: > { %4769 = sst [smem:[#allocation15_spill]] %s3638_s21  ;;  %s3768_s25 = sadd.s32 4294967295, %s3650_s24   ;;  %s3650_s24 = sphi %s3753_s24, %s4798_s24   ;;  %s3646_s23 = sphi %s3751_s23, %s4801_s23   ;;  %s3642_s22 = sphi %s3749_s22, %s4800_s22   ;;  %s3638_s21 = sphi %s3747_s21, %s4799_s21  }
   0xa   : > { %4770 = sst [smem:[#allocation16_spill]] %s3642_s22  ;;  %s3240_s26 = sadd.s32 4294967294, %s3650_s24  }
   0xb   : > { %4771 = sst [smem:[#allocation17_spill]] %s3646_s23  ;;  %s3772_s27 = sadd.s32 1, %s3650_s24  }
   0xc   : > { %4772 = sst [smem:[#allocation18_spill]] %s3650_s24  ;;  %s277_s28 = sadd.s32 1, %s3646_s23 }
   0xd   : > { %4773 = sst [smem:[#allocation19_spill]] %s3768_s25  ;;  %s274_s29 = ssub.s32 %s3650_s24, %s3772_s27 }
   0xe   : > { %4774 = sst [smem:[#allocation20_spill]] %s3772_s27  ;;  %p287_p0 = scmp.ne.s32.totalorder %s3646_s23, %s3642_s22 }
   0xf   : > { %p275_p1 = scmp.eq.s32.totalorder %s274_s29, 0  ;;  %p288_p2 = scmp.eq.s32.totalorder %s3768_s25, 1 }
  0x10   : > { %p293_p3 = scmp.ne.s32.totalorder %s3642_s22, %s3638_s21  ;;  %p294_p4 = scmp.eq.s32.totalorder %s3240_s26, 1 }
  0x11   : > { %s3783_s30 = scalar_select %p275_p1, %s3646_s23, %s277_s28  }
  0x12   : > { %p3785_p5 = por %p288_p2, %p287_p0  ;;  %p3789_p6 = por %p294_p4, %p293_p3 }
  0x13   : > { %4775 = sst [smem:[#allocation21_spill]] %s3783_s30  ;;  %p3243_p7 = scmp.ge.s32.totalorder %s3650_s24, 1 }
  0x14   : > { %s4776_s13 = scalar_select %p3785_p5, 1, 0 }
  0x15   : > { %s4778_s14 = scalar_select %p3789_p6, 1, 0 }
  0x16   : > { %4777 = sst [smem:[#allocation22_spill]] %s4776_s13  ;;  %p381_p8 = scmp.lt.s32.totalorder %s3650_s24, 3 }
  0x17   : > { %4779 = sst [smem:[#allocation23_spill]] %s4778_s14 }
  0x18   : > { %p382_p9 = pnand %p3243_p7, %p381_p8 }
  0x19   : > { %p431_p10 = scmp.lt.s32.totalorder (!%p382_p9), %s3768_s25, 1  ;;  %s4780_s0 = sld [smem:[#allocation24_spill]] (!%p382_p9) }
  0x1a   : > { %385 = sbr.rel (%p382_p9) target bundleno = 1837 (0x72d), region = 64  ;;  %s4745_s20 = smov (!%p382_p9), 20  }
  0x1b   : > { %s4746_s26 = smov (!%p382_p9), 32   ;;  %s4748_s28 = smov (!%p382_p9), 22  }
  0x1c   : > { %s4749_s29 = smov (!%p382_p9), 34   ;;  %s4751_s17 = smov (!%p382_p9), 38  }
  0x1d   : > { %s3658_s18 = smov (!%p382_p9), 36   ;;  %s3665_s30 = smov (!%p382_p9), 48  }
  0x1e   : > { %s3666_s23 = smov (!%p382_p9), 28   ;;  %s3667_s24 = smov (!%p382_p9), 50  }
  0x1f   : > { %v3652_v0 = vmov 0.0   ;;  %s3803_s15 = scalar_select %p431_p10, %s3768_s25, 1  ;;  %vm465_vm0 = vcmask 572416   ;;  %vm471_vm1 = vcmask 289952   ;;  %vm501_vm2 = vcmask 125952   ;;  %v834_v45 = vld [vmem:[%s4735_s3] sm:$0xff] }
  0x20   : > { %463 = vst [vmem:[#allocation2] sm:$0xff] %v3652_v0  ;;  %464 = vst [vmem:[#allocation2 + $0x8] sm:$0xff] %v3652_v0  ;;  %3332 = vmatprep.subr.mxu1 %v3652_v0  ;;  %908 = vmatprep.mubr.f32.mxu0 %v3652_v0  ;;  %s3668_s11 = smov 30   ;;  %s4782_s12 = smov 32   ;;  %vm476_vm3 = vcmask 437552   ;;  %vm506_vm4 = vcmask 273552  }
  0x21   : > { %551 = vst [vmem:[#allocation3] sm:$0xff] %v3652_v0  ;;  %552 = vst [vmem:[#allocation3 + $0x8] sm:$0xff] %v3652_v0  ;;  %s4747_s16 = sshll.u32 %s3803_s15, 3  ;;  %s4783_s13 = smov 34   ;;  %vm512_vm5 = vcmask 421152   ;;  %vm517_vm6 = vcmask 568752  }
  0x22   : > { %s3811_s19 = scalar_lea.vmem %s4780_s0, %s4747_s16  ;;  %466 = vst.msk [vmem:[#allocation2 + $0x10] sm:$0xff] %vm465_vm0, %v3652_v0  ;;  %553 = vst.msk [vmem:[#allocation3 + $0x10] sm:$0xff] %vm465_vm0, %v3652_v0  ;;  %s3661_s16 = smov 42   ;;  %vm522_vm7 = vcmask 716352   ;;  %vm481_vm8 = vcmask 585152   ;;  %vm527_vm9 = vcmask 863952  }
  0x23   : > { %v442_v1 = vld [vmem:[%s3811_s19] sm:$0xff]  ;;  %s3664_s0 = smov 44   ;;  %s4784_s25 = smov 20   ;;  %vm4764_vm10 = vcmask 109568   ;;  %vm486_vm11 = vcmask 732752   ;;  %vm532_vm12 = vcmask 1011552  }
  0x24   : > { %468 = vrot.lane.b32.xlu1 %v442_v1, %s4745_s20  ;;  %498 = vrot.lane.b32.xlu0 %v442_v1, %s4746_s26  ;;  %v508_v2 = vcombine.high %v442_v1, %v442_v1  ;;  %s3659_s20 = smov 40   ;;  %s3660_s26 = smov 24   ;;  %vm4765_vm13 = vcmask 1044464   ;;  %vm544_vm14 = vcmask 257152   ;;  %vm491_vm15 = vcmask 880352   ;;  %v4007_v62 = vld [vmem:[%s4734_s2] sm:$0xff] }
  0x25   : > { %s4786_s22 = smov 22   ;;  %vm549_vm0 = vcmask 404752   ;;  %s3676_s27 = smov 127   ;;  %v3678_v44 = vmov 0  }
  0x26   : > { %3530 = vset.pattern.permute.xlu0 %v3678_v44  ;;  %3531 = vset.pattern.permute.xlu1 %v3678_v44 }
  0x28   : > { %473 = vrot.lane.b32.xlu1 %v442_v1, %s4748_s28  ;;  %503 = vrot.lane.b32.xlu0 %v442_v1, %s4749_s29  ;;  %s3662_s28 = smov 46   ;;  %s3663_s29 = smov 26  }
  0x2c   : > { %514 = vrot.lane.b32.xlu0 %v508_v2, %s4751_s17  ;;  %509 = vrot.lane.b32.xlu1 %v508_v2, %s3658_s18  ;;  %s4781_s17 = sshll.u32 %s3803_s15, 3  ;;  %s4785_s15 = smov 38  }
  0x2d   : > { %s3826_s21 = scalar_lea.vmem %s4733_s1, %s4781_s17 }
  0x2e   : > { %v443_v3 = vld [vmem:[%s3826_s21] sm:$0xff] }
  0x2f   : > { %v587_v4 = vcombine.high %v443_v3, %v443_v3 }
  0x30   : > { %519 = vrot.lane.b32.xlu0 %v508_v2, %s3659_s20  ;;  %478 = vrot.lane.b32.xlu1 %v442_v1, %s3660_s26 }
  0x34   : > { %524 = vrot.lane.b32.xlu0 %v508_v2, %s3661_s16  ;;  %534 = vrot.lane.b32.xlu1 %v508_v2, %s3662_s28 }
  0x38   : > { %483 = vrot.lane.b32.xlu0 %v442_v1, %s3663_s29  ;;  %529 = vrot.lane.b32.xlu1 %v508_v2, %s3664_s0 }
  0x3c   : > { %541 = vrot.lane.b32.xlu0 %v508_v2, %s3665_s30  ;;  %488 = vrot.lane.b32.xlu1 %v442_v1, %s3666_s23 }
  0x40   : > { %546 = vrot.lane.b32.xlu0 %v508_v2, %s3667_s24  ;;  %493 = vrot.lane.b32.xlu1 %v442_v1, %s3668_s11 }
  0x44   : > { %579 = vrot.lane.b32.xlu0 %v443_v3, %s4782_s12  ;;  %583 = vrot.lane.b32.xlu1 %v443_v3, %s4783_s13  ;;  %s3671_s12 = smov 92   ;;  %s4792_s13 = sld [smem:[#allocation26_spill]] }
  0x48   : > { %588 = vrot.lane.b32.xlu0 %v587_v4, %s3658_s18  ;;  %555 = vrot.lane.b32.xlu1 %v443_v3, %s4784_s25  ;;  %s3675_s25 = smov 126  }
  0x4c   : > { %592 = vrot.lane.b32.xlu0 %v587_v4, %s4785_s15  ;;  %559 = vrot.lane.b32.xlu1 %v443_v3, %s4786_s22  ;;  %s3672_s22 = smov 108  }
  0x50   : > { %596 = vrot.lane.b32.xlu0 %v587_v4, %s3659_s20  ;;  %563 = vrot.lane.b32.xlu1 %v443_v3, %s3660_s26 }
  0x54   : > { %600 = vrot.lane.b32.xlu0 %v587_v4, %s3661_s16  ;;  %608 = vrot.lane.b32.xlu1 %v587_v4, %s3662_s28  ;;  %s3679_s28 = smov 19  }
  0x58   : > { %567 = vrot.lane.b32.xlu0 %v443_v3, %s3663_s29  ;;  %604 = vrot.lane.b32.xlu1 %v587_v4, %s3664_s0  ;;  %s3669_s0 = smov 90  }
  0x5c   : > { %613 = vrot.lane.b32.xlu0 %v587_v4, %s3665_s30  ;;  %571 = vrot.lane.b32.xlu1 %v443_v3, %s3666_s23  ;;  %s3673_s23 = smov 109  }
  0x60   : > { %617 = vrot.lane.b32.xlu0 %v587_v4, %s3667_s24  ;;  %575 = vrot.lane.b32.xlu1 %v443_v3, %s3668_s11  ;;  %s3670_s11 = smov 91   ;;  %s3674_s24 = smov 110  }
  0x96   : > { %v469_v5 = vpop.permute.xlu1 %468  ;;  %v499_v6 = vpop.permute.xlu0 %498 }
  0x97   : > { %472 = vst.msk [vmem:[#allocation2] sm:$0xf] %vm471_vm1, %v469_v5 }
  0x98   : > { %502 = vst.msk [vmem:[#allocation2 + $0x8] sm:$0xf] %vm501_vm2, %v499_v6 }
  0x9a   : > { %v474_v7 = vpop.permute.xlu1 %473  ;;  %v504_v8 = vpop.permute.xlu0 %503 }
  0x9b   : > { %477 = vst.msk [vmem:[#allocation2] sm:$0xf] %vm476_vm3, %v474_v7 }
  0x9c   : > { %507 = vst.msk [vmem:[#allocation2 + $0x8] sm:$0xf] %vm506_vm4, %v504_v8 }
  0x9e   : > { %v515_v9 = vpop.permute.xlu0 %514  ;;  %v510_v10 = vpop.permute.xlu1 %509 }
  0x9f   : > { %513 = vst.msk [vmem:[#allocation2 + $0x8] sm:$0xf] %vm512_vm5, %v510_v10 }
  0xa0   : > { %518 = vst.msk [vmem:[#allocation2 + $0x8] sm:$0xf] %vm517_vm6, %v515_v9 }
  0xa2   : > { %v520_v11 = vpop.permute.xlu0 %519  ;;  %v479_v12 = vpop.permute.xlu1 %478 }
  0xa3   : > { %523 = vst.msk [vmem:[#allocation2 + $0x8] sm:$0xf] %vm522_vm7, %v520_v11 }
  0xa4   : > { %482 = vst.msk [vmem:[#allocation2] sm:$0xf] %vm481_vm8, %v479_v12 }
  0xa6   : > { %v525_v13 = vpop.permute.xlu0 %524  ;;  %v535_v14 = vpop.permute.xlu1 %534 }
  0xa7   : > { %528 = vst.msk [vmem:[#allocation2 + $0x8] sm:$0xf] %vm527_vm9, %v525_v13 }
  0xa8   : > { %540 = vst.msk [vmem:[#allocation2 + $0x10] sm:$0xf] %vm4764_vm10, %v535_v14  ;;  %vm496_vm10 = vcmask 1027952  }
  0xaa   : > { %v484_v15 = vpop.permute.xlu0 %483  ;;  %v530_v16 = vpop.permute.xlu1 %529 }
  0xab   : > { %487 = vst.msk [vmem:[#allocation2] sm:$0xf] %vm486_vm11, %v484_v15 }
  0xac   : > { %533 = vst.msk [vmem:[#allocation2 + $0x8] sm:$0xf] %vm532_vm12, %v530_v16 }
  0xad   : > { %538 = vst.msk [vmem:[#allocation2 + $0x8] sm:$0xf] %vm4765_vm13, %v535_v14  ;;  %vm636_vm13 = vcmask 261120  }
  0xae   : > { %v542_v17 = vpop.permute.xlu0 %541  ;;  %v489_v18 = vpop.permute.xlu1 %488 }
  0xaf   : > { %545 = vst.msk [vmem:[#allocation2 + $0x10] sm:$0xf] %vm544_vm14, %v542_v17 }
  0xb0   : > { %492 = vst.msk [vmem:[#allocation2] sm:$0xf] %vm491_vm15, %v489_v18 }
  0xb2   : > { %v547_v19 = vpop.permute.xlu0 %546  ;;  %v494_v20 = vpop.permute.xlu1 %493 }
  0xb3   : > { %550 = vst.msk [vmem:[#allocation2 + $0x10] sm:$0xf] %vm549_vm0, %v547_v19 }
  0xb4   : > { %497 = vst.msk [vmem:[#allocation2] sm:$0xf] %vm496_vm10, %v494_v20  ;;  %v3913_v42 = vld [vmem:[#allocation2 + $0x8] sm:$0xff] }
  0xb6   : > { %v580_v21 = vpop.permute.xlu0 %579  ;;  %v584_v22 = vpop.permute.xlu1 %583 }
  0xb7   : > { %582 = vst.msk [vmem:[#allocation3 + $0x8] sm:$0xf] %vm501_vm2, %v580_v21  ;;  %vm4788_vm2 = vcmask 1044464  }
  0xb8   : > { %586 = vst.msk [vmem:[#allocation3 + $0x8] sm:$0xf] %vm506_vm4, %v584_v22  ;;  %vm840_vm4 = vcmask 588800  }
  0xba   : > { %v589_v23 = vpop.permute.xlu0 %588  ;;  %v787_v24 = vld [vmem:[#allocation2 + $0x10] sm:$0xff]  ;;  %v556_v25 = vpop.permute.xlu1 %555 }
  0xbb   : > { %591 = vst.msk [vmem:[#allocation3 + $0x8] sm:$0xf] %vm512_vm5, %v589_v23  ;;  %795 = vrot.lane.b32.xlu1 %v787_v24, %s3669_s0  ;;  %774 = vrot.lane.b32.xlu0 %v787_v24, %s3670_s11  ;;  %v3886_v40 = vld [vmem:[#allocation2] sm:$0xff]  ;;  %vm797_vm5 = vcmask 736256  }
  0xbc   : > { %558 = vst.msk [vmem:[#allocation3] sm:$0xf] %vm471_vm1, %v556_v25  ;;  %vm4787_vm1 = vcmask 109568  }
  0xbd   : > { %637 = vst.msk [vmem:[#allocation8 + $0x10] sm:$0xff] %vm636_vm13, %v787_v24 }
  0xbe   : > { %v593_v26 = vpop.permute.xlu0 %592  ;;  %v560_v27 = vpop.permute.xlu1 %559 }
  0xbf   : > { %595 = vst.msk [vmem:[#allocation3 + $0x8] sm:$0xf] %vm517_vm6, %v593_v26  ;;  %753 = vrot.lane.b32.xlu1 %v787_v24, %s3671_s12  ;;  %732 = vrot.lane.b32.xlu0 %v787_v24, %s3672_s22  ;;  %vm776_vm6 = vcmask 744448  }
  0xc0   : > { %562 = vst.msk [vmem:[#allocation3] sm:$0xf] %vm476_vm3, %v560_v27  ;;  %vm3677_vm3 = vmmov 0  }
  0xc1   : > { %3350 = vmatprep.mubr.msk.f32.mxu1 %vm3677_vm3, %v3652_v0 }
  0xc2   : > { %v597_v28 = vpop.permute.xlu0 %596  ;;  %v564_v29 = vpop.permute.xlu1 %563 }
  0xc3   : > { %599 = vst.msk [vmem:[#allocation3 + $0x8] sm:$0xf] %vm522_vm7, %v597_v28  ;;  %711 = vrot.lane.b32.xlu1 %v787_v24, %s3673_s23  ;;  %690 = vrot.lane.b32.xlu0 %v787_v24, %s3674_s24  ;;  %vm755_vm7 = vcmask 752640  }
  0xc4   : > { %566 = vst.msk [vmem:[#allocation3] sm:$0xf] %vm481_vm8, %v564_v29  ;;  %v3879_v39 = vld [vmem:[#allocation8 + $0x10] sm:$0xff]  ;;  %vm734_vm8 = vcmask 883712  }
  0xc6   : > { %v601_v30 = vpop.permute.xlu0 %600  ;;  %v609_v31 = vpop.permute.xlu1 %608 }
  0xc7   : > { %603 = vst.msk [vmem:[#allocation3 + $0x8] sm:$0xf] %vm527_vm9, %v601_v30  ;;  %669 = vrot.lane.b32.xlu1 %v787_v24, %s3675_s25  ;;  %648 = vrot.lane.b32.xlu0 %v787_v24, %s3676_s27  ;;  %vm713_vm9 = vcmask 891904  }
  0xc8   : > { %612 = vst.msk [vmem:[#allocation3 + $0x10] sm:$0xf] %vm4787_vm1, %v609_v31  ;;  %vm1021_vm1 = vcmask 416768  }
  0xca   : > { %v568_v32 = vpop.permute.xlu0 %567  ;;  %v605_v33 = vpop.permute.xlu1 %604 }
  0xcb   : > { %570 = vst.msk [vmem:[#allocation3] sm:$0xf] %vm486_vm11, %v568_v32  ;;  %vm671_vm11 = vcmask 1031168  }
  0xcc   : > { %607 = vst.msk [vmem:[#allocation3 + $0x8] sm:$0xf] %vm532_vm12, %v605_v33  ;;  %vm650_vm12 = vcmask 1039360  }
  0xcd   : > { %611 = vst.msk [vmem:[#allocation3 + $0x8] sm:$0xf] %vm4788_vm2, %v609_v31  ;;  %vm449_vm2 = vcmask 1043456  }
  0xce   : > { %v614_v34 = vpop.permute.xlu0 %613  ;;  %v572_v35 = vpop.permute.xlu1 %571 }
  0xcf   : > { %616 = vst.msk [vmem:[#allocation3 + $0x10] sm:$0xf] %vm544_vm14, %v614_v34  ;;  %vm621_vm14 = vcmask 154624  }
  0xd0   : > { %574 = vst.msk [vmem:[#allocation3] sm:$0xf] %vm491_vm15, %v572_v35  ;;  %vm623_vm15 = vcmask 572824  }
  0xd1   : > { %622 = vst.msk [vmem:[#allocation4] sm:$0xff] %vm621_vm14, %v3652_v0  ;;  %625 = vst.msk [vmem:[#allocation5] sm:$0xff] %vm621_vm14, %v3652_v0 }
  0xd2   : > { %v618_v36 = vpop.permute.xlu0 %617  ;;  %v576_v37 = vpop.permute.xlu1 %575  ;;  %627 = vst.msk [vmem:[#allocation6] sm:$0xff] %vm621_vm14, %v3652_v0  ;;  %629 = vst.msk [vmem:[#allocation7] sm:$0xff] %vm621_vm14, %v3652_v0 }
  0xd3   : > { %620 = vst.msk [vmem:[#allocation3 + $0x10] sm:$0xf] %vm549_vm0, %v618_v36  ;;  %vm1018_vm0 = vcmask 1047704  }
  0xd4   : > { %578 = vst.msk [vmem:[#allocation3] sm:$0xf] %vm496_vm10, %v576_v37  ;;  %v3931_v43 = vld [vmem:[#allocation3 + $0x8] sm:$0xff]  ;;  %vm692_vm10 = vcmask 900096  }
  0xd5   : > { %624 = vst.msk [vmem:[#allocation4 + $0x10] sm:$0xff] %vm623_vm15, %v3652_v0  ;;  %626 = vst.msk [vmem:[#allocation5 + $0x10] sm:$0xff] %vm623_vm15, %v3652_v0 }
  0xd6   : > { %628 = vst.msk [vmem:[#allocation6 + $0x10] sm:$0xff] %vm623_vm15, %v3652_v0  ;;  %630 = vst.msk [vmem:[#allocation7 + $0x10] sm:$0xff] %vm623_vm15, %v3652_v0 }
  0xda   : > { %v1171_v38 = vld [vmem:[#allocation3 + $0x10] sm:$0xff] }
  0xdb   : > { %1179 = vrot.lane.b32.xlu1 %v1171_v38, %s3669_s0  ;;  %1159 = vrot.lane.b32.xlu0 %v1171_v38, %s3670_s11  ;;  %1028 = vst.msk [vmem:[#allocation8 + $0x10] sm:$0xff] %vm636_vm13, %v1171_v38  ;;  %v3903_v41 = vld [vmem:[#allocation3] sm:$0xff] }
  0xdf   : > { %1139 = vrot.lane.b32.xlu1 %v1171_v38, %s3671_s12  ;;  %1119 = vrot.lane.b32.xlu0 %v1171_v38, %s3672_s22 }
  0xe3   : > { %791 = vrot.lane.b32.xlu0 %v3886_v40, %s3669_s0  ;;  %1099 = vrot.lane.b32.xlu1 %v1171_v38, %s3673_s23 }
  0xe7   : > { %749 = vrot.lane.b32.xlu0 %v3886_v40, %s3671_s12  ;;  %770 = vrot.lane.b32.xlu1 %v3886_v40, %s3670_s11 }
  0xeb   : > { %707 = vrot.lane.b32.xlu0 %v3886_v40, %s3673_s23  ;;  %728 = vrot.lane.b32.xlu1 %v3886_v40, %s3672_s22 }
  0xef   : > { %665 = vrot.lane.b32.xlu0 %v3886_v40, %s3675_s25  ;;  %686 = vrot.lane.b32.xlu1 %v3886_v40, %s3674_s24 }
  0xf3   : > { %644 = vrot.lane.b32.xlu1 %v3886_v40, %s3676_s27  ;;  %1175 = vrot.lane.b32.xlu0 %v3903_v41, %s3669_s0 }
  0xf7   : > { %1155 = vrot.lane.b32.xlu1 %v3903_v41, %s3670_s11  ;;  %1135 = vrot.lane.b32.xlu0 %v3903_v41, %s3671_s12 }
  0xfb   : > { %793 = vrot.lane.b32.xlu0 %v3913_v42, %s3669_s0  ;;  %1115 = vrot.lane.b32.xlu1 %v3903_v41, %s3672_s22 }
  0xff   : > { %751 = vrot.lane.b32.xlu0 %v3913_v42, %s3671_s12  ;;  %772 = vrot.lane.b32.xlu1 %v3913_v42, %s3670_s11 }
 0x103   : > { %709 = vrot.lane.b32.xlu0 %v3913_v42, %s3673_s23  ;;  %730 = vrot.lane.b32.xlu1 %v3913_v42, %s3672_s22 }
 0x107   : > { %667 = vrot.lane.b32.xlu0 %v3913_v42, %s3675_s25  ;;  %688 = vrot.lane.b32.xlu1 %v3913_v42, %s3674_s24 }
 0x10b   : > { %1177 = vrot.lane.b32.xlu0 %v3931_v43, %s3669_s0  ;;  %646 = vrot.lane.b32.xlu1 %v3913_v42, %s3676_s27 }
 0x10f   : > { %1137 = vrot.lane.b32.xlu0 %v3931_v43, %s3671_s12  ;;  %1157 = vrot.lane.b32.xlu1 %v3931_v43, %s3670_s11 }
 0x113   : > { %1097 = vrot.lane.b32.xlu0 %v3931_v43, %s3673_s23  ;;  %1117 = vrot.lane.b32.xlu1 %v3931_v43, %s3672_s22 }
 0x117   : > { %1077 = vrot.lane.b32.xlu1 %v3931_v43, %s3674_s24  ;;  %1095 = vrot.lane.b32.xlu0 %v3903_v41, %s3673_s23 }
 0x11b   : > { %1079 = vrot.lane.b32.xlu0 %v1171_v38, %s3674_s24  ;;  %1075 = vrot.lane.b32.xlu1 %v3903_v41, %s3674_s24 }
 0x11f   : > { %1057 = vrot.lane.b32.xlu0 %v3931_v43, %s3675_s25  ;;  %1059 = vrot.lane.b32.xlu1 %v1171_v38, %s3675_s25 }
 0x123   : > { %1037 = vrot.lane.b32.xlu1 %v3931_v43, %s3676_s27  ;;  %1055 = vrot.lane.b32.xlu0 %v3903_v41, %s3675_s25 }
 0x127   : > { %1039 = vrot.lane.b32.xlu0 %v1171_v38, %s3676_s27  ;;  %1035 = vrot.lane.b32.xlu1 %v3903_v41, %s3676_s27 }
 0x12b   : > { %837 = vperm.xlu0 %3530, %v834_v45   ;;  %1220 = vperm.xlu1 %3531, %v834_v45  }
 0x12d   : > { %v3965_v46 = vpop.permute.xlu0 %774  ;;  %v3967_v47 = vpop.permute.xlu1 %795 }
 0x12e   : > { %784 = vst.msk [vmem:[#allocation8 + $0xb8] sm:$0xff] %vm636_vm13, %v3965_v46  ;;  %805 = vst.msk [vmem:[#allocation8 + $0xd0] sm:$0xff] %vm636_vm13, %v3967_v47 }
 0x131   : > { %v3973_v48 = vpop.permute.xlu0 %732  ;;  %v3975_v49 = vpop.permute.xlu1 %753 }
 0x132   : > { %742 = vst.msk [vmem:[#allocation8 + $0x88] sm:$0xff] %vm636_vm13, %v3973_v48  ;;  %763 = vst.msk [vmem:[#allocation8 + $0xa0] sm:$0xff] %vm636_vm13, %v3975_v49 }
 0x135   : > { %v3981_v50 = vpop.permute.xlu0 %690  ;;  %v3983_v51 = vpop.permute.xlu1 %711  ;;  %v833_v52 = vld [vmem:[#allocation8 + $0xd0] sm:$0xff]  ;;  %v830_v53 = vld [vmem:[#allocation8 + $0xb8] sm:$0xff] }
 0x136   : > { %700 = vst.msk [vmem:[#allocation8 + $0x58] sm:$0xff] %vm636_vm13, %v3981_v50  ;;  %721 = vst.msk [vmem:[#allocation8 + $0x70] sm:$0xff] %vm636_vm13, %v3983_v51  ;;  %3333 = vmatpush3.msra.mxu1 %v833_v52 }
 0x137   : > { %3334 = vmatprep.subr.mxu1 %v3652_v0 }
 0x138   : > { %3335 = vmatpush3.msra.mxu1 %v830_v53 }
 0x139   : > { %v3990_v54 = vpop.permute.xlu0 %648  ;;  %3336 = vmatprep.subr.mxu1 %v3652_v0  ;;  %v3993_v55 = vpop.permute.xlu1 %669  ;;  %v827_v56 = vld [vmem:[#allocation8 + $0xa0] sm:$0xff]  ;;  %v824_v57 = vld [vmem:[#allocation8 + $0x88] sm:$0xff] }
 0x13a   : > { %658 = vst.msk [vmem:[#allocation8 + $0x28] sm:$0xff] %vm636_vm13, %v3990_v54  ;;  %679 = vst.msk [vmem:[#allocation8 + $0x40] sm:$0xff] %vm636_vm13, %v3993_v55  ;;  %3337 = vmatpush3.msra.mxu1 %v827_v56 }
 0x13b   : > { %3338 = vmatprep.subr.mxu1 %v3652_v0 }
 0x13c   : > { %3339 = vmatpush3.msra.mxu1 %v824_v57 }
 0x13d   : > { %3340 = vmatprep.subr.mxu1 %v3652_v0  ;;  %v821_v58 = vld [vmem:[#allocation8 + $0x70] sm:$0xff]  ;;  %v818_v59 = vld [vmem:[#allocation8 + $0x58] sm:$0xff] }
 0x13e   : > { %3341 = vmatpush3.msra.mxu1 %v821_v58 }
 0x13f   : > { %3342 = vmatprep.subr.mxu1 %v3652_v0 }
 0x140   : > { %3343 = vmatpush3.msra.mxu1 %v818_v59 }
 0x141   : > { %3344 = vmatprep.subr.mxu1 %v3652_v0  ;;  %v815_v60 = vld [vmem:[#allocation8 + $0x40] sm:$0xff]  ;;  %v812_v61 = vld [vmem:[#allocation8 + $0x28] sm:$0xff] }
 0x142   : > { %3345 = vmatpush3.msra.mxu1 %v815_v60 }
 0x143   : > { %3346 = vmatprep.subr.mxu1 %v3652_v0 }
 0x144   : > { %3347 = vmatpush3.msra.mxu1 %v812_v61 }
 0x145   : > { %3348 = vmatprep.subr.mxu1 %v3652_v0 }
 0x146   : > { %3349 = vmatpush3.msra.mxu1 %v3879_v39 }
 0x147   : > { %3353 = vmatprep.subr.mxu1 %v3652_v0  ;;  %3351 = vmatmul.mubr.msk.f32.vlgmr.msra.gmra.mxu1 %vm840_vm4, %v4007_v62 }
 0x148   : > { %3371 = vmatprep.mubr.msk.f32.mxu1 %vm3677_vm3, %v3652_v0 }
 0x14d   : > { %v4016_v63 = vpop.permute.xlu0 %1159  ;;  %v4018_v1 = vpop.permute.xlu1 %1179 }
 0x14e   : > { %1168 = vst.msk [vmem:[#allocation8 + $0xb8] sm:$0xff] %vm636_vm13, %v4016_v63  ;;  %1188 = vst.msk [vmem:[#allocation8 + $0xd0] sm:$0xff] %vm636_vm13, %v4018_v1 }
 0x151   : > { %v4024_v2 = vpop.permute.xlu0 %1119  ;;  %v4026_v3 = vpop.permute.xlu1 %1139 }
 0x152   : > { %1128 = vst.msk [vmem:[#allocation8 + $0x88] sm:$0xff] %vm636_vm13, %v4024_v2  ;;  %1148 = vst.msk [vmem:[#allocation8 + $0xa0] sm:$0xff] %vm636_vm13, %v4026_v3 }
 0x155   : > { %v792_v4 = vpop.permute.xlu0 %791  ;;  %v4032_v5 = vpop.permute.xlu1 %1099  ;;  %v1216_v6 = vld [vmem:[#allocation8 + $0xd0] sm:$0xff]  ;;  %v1213_v7 = vld [vmem:[#allocation8 + $0xb8] sm:$0xff] }
 0x156   : > { %1108 = vst.msk [vmem:[#allocation8 + $0x70] sm:$0xff] %vm636_vm13, %v4032_v5  ;;  %3354 = vmatpush3.msra.mxu1 %v1216_v6 }
 0x157   : > { %3355 = vmatprep.subr.mxu1 %v3652_v0 }
 0x158   : > { %3356 = vmatpush3.msra.mxu1 %v1213_v7 }
 0x159   : > { %v750_v8 = vpop.permute.xlu0 %749  ;;  %3357 = vmatprep.subr.mxu1 %v3652_v0  ;;  %v771_v9 = vpop.permute.xlu1 %770  ;;  %v1210_v10 = vld [vmem:[#allocation8 + $0xa0] sm:$0xff]  ;;  %v1207_v11 = vld [vmem:[#allocation8 + $0x88] sm:$0xff] }
 0x15a   : > { %3358 = vmatpush3.msra.mxu1 %v1210_v10 }
 0x15b   : > { %3359 = vmatprep.subr.mxu1 %v3652_v0 }
 0x15c   : > { %3360 = vmatpush3.msra.mxu1 %v1207_v11 }
 0x15d   : > { %v708_v12 = vpop.permute.xlu0 %707  ;;  %3361 = vmatprep.subr.mxu1 %v3652_v0  ;;  %v729_v13 = vpop.permute.xlu1 %728  ;;  %v1204_v14 = vld [vmem:[#allocation8 + $0x70] sm:$0xff] }
 0x15e   : > { %3362 = vmatpush3.msra.mxu1 %v1204_v14 }
 0x15f   : > { %3363 = vmatprep.subr.mxu1 %v3652_v0 }
 0x161   : > { %v666_v15 = vpop.permute.xlu0 %665  ;;  %v687_v16 = vpop.permute.xlu1 %686 }
 0x165   : > { %v1176_v17 = vpop.permute.xlu0 %1175  ;;  %v645_v18 = vpop.permute.xlu1 %644 }
 0x169   : > { %v4041_v19 = vpop.permute.xlu0 %1135  ;;  %v4043_v20 = vpop.permute.xlu1 %1155 }
 0x16d   : > { %v794_v21 = vpop.permute.xlu0 %793  ;;  %v4045_v22 = vpop.permute.xlu1 %1115 }
 0x16e   : > { %v798_v23 = vsel %vm797_vm5, %v792_v4, %v794_v21  ;;  %v799_v24 = vsel %vm797_vm5, %v794_v21, %v3967_v47  ;;  %v441_v21 = vld [vmem:[%s4742_s10] sm:$0x7] }
 0x16f   : > { %858 = vmatprep.subr.mxu0 %v799_v24 }
 0x170   : > { %859 = vmatpush1.msra.mxu0 %v798_v23 }
 0x171   : > { %v752_v25 = vpop.permute.xlu0 %751  ;;  %v773_v26 = vpop.permute.xlu1 %772 }
 0x172   : > { %v777_v27 = vsel %vm776_vm6, %v771_v9, %v773_v26  ;;  %v778_v28 = vsel %vm776_vm6, %v773_v26, %v3965_v46  ;;  %v757_v29 = vsel %vm755_vm7, %v752_v25, %v3975_v49  ;;  %v756_v30 = vsel %vm755_vm7, %v750_v8, %v752_v25 }
 0x173   : > { %860 = vmatprep.subr.mxu0 %v778_v28 }
 0x174   : > { %861 = vmatpush1.msra.mxu0 %v777_v27 }
 0x175   : > { %v710_v31 = vpop.permute.xlu0 %709  ;;  %v731_v32 = vpop.permute.xlu1 %730  ;;  %862 = vmatprep.subr.mxu0 %v757_v29 }
 0x176   : > { %v735_v33 = vsel %vm734_vm8, %v729_v13, %v731_v32  ;;  %v736_v34 = vsel %vm734_vm8, %v731_v32, %v3973_v48  ;;  %863 = vmatpush1.msra.mxu0 %v756_v30  ;;  %v715_v35 = vsel %vm713_vm9, %v710_v31, %v3983_v51  ;;  %v714_v36 = vsel %vm713_vm9, %v708_v12, %v710_v31 }
 0x177   : > { %864 = vmatprep.subr.mxu0 %v736_v34 }
 0x178   : > { %865 = vmatpush1.msra.mxu0 %v735_v33 }
 0x179   : > { %v668_v37 = vpop.permute.xlu0 %667  ;;  %v689_v38 = vpop.permute.xlu1 %688  ;;  %866 = vmatprep.subr.mxu0 %v715_v35 }
 0x17a   : > { %v693_v39 = vsel %vm692_vm10, %v687_v16, %v689_v38  ;;  %v694_v44 = vsel %vm692_vm10, %v689_v38, %v3981_v50  ;;  %867 = vmatpush1.msra.mxu0 %v714_v36  ;;  %v673_v45 = vsel %vm671_vm11, %v668_v37, %v3993_v55  ;;  %v672_v46 = vsel %vm671_vm11, %v666_v15, %v668_v37 }
 0x17b   : > { %868 = vmatprep.subr.mxu0 %v694_v44 }
 0x17c   : > { %869 = vmatpush1.msra.mxu0 %v693_v39 }
 0x17d   : > { %v1178_v47 = vpop.permute.xlu0 %1177  ;;  %v647_v48 = vpop.permute.xlu1 %646  ;;  %870 = vmatprep.subr.mxu0 %v673_v45 }
 0x17e   : > { %v651_v49 = vsel %vm650_vm12, %v645_v18, %v647_v48  ;;  %v652_v51 = vsel %vm650_vm12, %v647_v48, %v3990_v54  ;;  %871 = vmatpush1.msra.mxu0 %v672_v46  ;;  %v1182_v53 = vsel %vm797_vm5, %v1178_v47, %v4018_v1  ;;  %v1181_v55 = vsel %vm797_vm5, %v1176_v17, %v1178_v47 }
 0x17f   : > { %872 = vmatprep.subr.mxu0 %v652_v51 }
 0x180   : > { %873 = vmatpush1.msra.mxu0 %v651_v49 }
 0x181   : > { %v1138_v50 = vpop.permute.xlu0 %1137  ;;  %v1158_v52 = vpop.permute.xlu1 %1157  ;;  %874 = vmatprep.subr.mxu0 %v3913_v42 }
 0x182   : > { %875 = vmatpush1.msra.mxu0 %v3886_v40  ;;  %v1162_v54 = vsel %vm776_vm6, %v1158_v52, %v4016_v63  ;;  %v1161_v42 = vsel %vm776_vm6, %v4043_v20, %v1158_v52  ;;  %v1142_v40 = vsel %vm755_vm7, %v1138_v50, %v4026_v3  ;;  %v1141_v58 = vsel %vm755_vm7, %v4041_v19, %v1138_v50  ;;  %v1192_v20 = vld [vmem:[#allocation8 + $0x10] sm:$0xff] }
 0x183   : > { %3248 = vmatmul.mubr.msk.f32.vlgmr.msra.gmra.mxu0 %vm840_vm4, %v4007_v62  ;;  %1240 = vmatprep.subr.mxu0 %v1182_v53 }
 0x184   : > { %1241 = vmatpush1.msra.mxu0 %v1181_v55  ;;  %1290 = vmatprep.mubr.f32.mxu0 %v3652_v0 }
 0x185   : > { %v1098_v56 = vpop.permute.xlu0 %1097  ;;  %v1118_v57 = vpop.permute.xlu1 %1117  ;;  %1242 = vmatprep.subr.mxu0 %v1162_v54 }
 0x186   : > { %1243 = vmatpush1.msra.mxu0 %v1161_v42  ;;  %v1122_v59 = vsel %vm734_vm8, %v1118_v57, %v4024_v2  ;;  %v1121_v60 = vsel %vm734_vm8, %v4045_v22, %v1118_v57  ;;  %v1102_v1 = vsel %vm713_vm9, %v1098_v56, %v4032_v5 }
 0x187   : > { %1244 = vmatprep.subr.mxu0 %v1142_v40 }
 0x188   : > { %1245 = vmatpush1.msra.mxu0 %v1141_v58 }
 0x189   : > { %v1096_v61 = vpop.permute.xlu0 %1095  ;;  %v1078_v63 = vpop.permute.xlu1 %1077  ;;  %1246 = vmatprep.subr.mxu0 %v1122_v59 }
 0x18a   : > { %v1101_v3 = vsel %vm713_vm9, %v1096_v61, %v1098_v56  ;;  %1247 = vmatpush1.msra.mxu0 %v1121_v60 }
 0x18b   : > { %1248 = vmatprep.subr.mxu0 %v1102_v1 }
 0x18c   : > { %1249 = vmatpush1.msra.mxu0 %v1101_v3 }
 0x18d   : > { %v1080_v4 = vpop.permute.xlu0 %1079  ;;  %v1076_v6 = vpop.permute.xlu1 %1075 }
 0x18e   : > { %v1082_v7 = vsel %vm692_vm10, %v1078_v63, %v1080_v4  ;;  %1088 = vst.msk [vmem:[#allocation8 + $0x58] sm:$0xff] %vm636_vm13, %v1080_v4  ;;  %v1081_v2 = vsel %vm692_vm10, %v1076_v6, %v1078_v63  ;;  %v1581_v6 = vld [vmem:[%s4737_s5] sm:$0xff] }
 0x18f   : > { %1250 = vmatprep.subr.mxu0 %v1082_v7 }
 0x190   : > { %1251 = vmatpush1.msra.mxu0 %v1081_v2 }
 0x191   : > { %v1058_v8 = vpop.permute.xlu0 %1057  ;;  %v1060_v9 = vpop.permute.xlu1 %1059 }
 0x192   : > { %v1062_v10 = vsel %vm671_vm11, %v1058_v8, %v1060_v9  ;;  %1068 = vst.msk [vmem:[#allocation8 + $0x40] sm:$0xff] %vm636_vm13, %v1060_v9 }
 0x193   : > { %1252 = vmatprep.subr.mxu0 %v1062_v10 }
 0x195   : > { %v1056_v5 = vpop.permute.xlu0 %1055  ;;  %v1038_v11 = vpop.permute.xlu1 %1037  ;;  %v1201_v12 = vld [vmem:[#allocation8 + $0x58] sm:$0xff] }
 0x196   : > { %v1061_v13 = vsel %vm671_vm11, %v1056_v5, %v1058_v8  ;;  %3364 = vmatpush3.msra.mxu1 %v1201_v12 }
 0x197   : > { %3365 = vmatprep.subr.mxu1 %v3652_v0  ;;  %1253 = vmatpush1.msra.mxu0 %v1061_v13 }
 0x199   : > { %v1040_v14 = vpop.permute.xlu0 %1039  ;;  %v1036_v15 = vpop.permute.xlu1 %1035  ;;  %v1198_v16 = vld [vmem:[#allocation8 + $0x40] sm:$0xff] }
 0x19a   : > { %v1042_v17 = vsel %vm650_vm12, %v1038_v11, %v1040_v14  ;;  %1048 = vst.msk [vmem:[#allocation8 + $0x28] sm:$0xff] %vm636_vm13, %v1040_v14  ;;  %v1041_v18 = vsel %vm650_vm12, %v1036_v15, %v1038_v11  ;;  %3366 = vmatpush3.msra.mxu1 %v1198_v16 }
 0x19b   : > { %3367 = vmatprep.subr.mxu1 %v3652_v0  ;;  %1254 = vmatprep.subr.mxu0 %v1042_v17 }
 0x19c   : > { %1255 = vmatpush1.msra.mxu0 %v1041_v18 }
 0x19d   : > { %1256 = vmatprep.subr.mxu0 %v3931_v43 }
 0x19e   : > { %1257 = vmatpush1.msra.mxu0 %v3903_v41  ;;  %v986_v41 = vlaneseq }
 0x19f   : > { %3250 = vmatmul.mubr.msk.f32.vlgmr.msra.gmra.mxu0 %vm840_vm4, %v4007_v62 }
 0x1a0   : > { %1654 = vmatprep.mubr.f32.mxu0 %v3652_v0  ;;  %v987_v43 = vshrl.u32 %v986_v41, 7 }
 0x1a1   : > { %v1195_v19 = vld [vmem:[#allocation8 + $0x28] sm:$0xff] }
 0x1a2   : > { %3368 = vmatpush3.msra.mxu1 %v1195_v19  ;;  %v988_v28 = vsub.s32 0, %v987_v43  ;;  %v992_v29 = vsub.s32 1, %v987_v43 }
 0x1a3   : > { %3369 = vmatprep.subr.mxu1 %v3652_v0 }
 0x1a4   : > { %3370 = vmatpush3.msra.mxu1 %v1192_v20  ;;  %v4135_v30 = vrot.slane %v441_v21, %v988_v28  ;;  %v4137_v33 = vrot.slane %v441_v21, %v992_v29 }
 0x1a5   : > { %3372 = vmatmul.mubr.msk.f32.vlgmr.msra.gmra.mxu1 %vm840_vm4, %v4007_v62  ;;  %3374 = vmatprep.subr.mxu1 %v3652_v0  ;;  %v996_v62 = vsub.s32 2, %v987_v43 }
 0x1a6   : > { %3392 = vmatprep.mubr.msk.f32.mxu1 %vm3677_vm3, %v3652_v0  ;;  %v838_v22 = vpop.permute.xlu0 %837  ;;  %v1221_v39 = vpop.permute.xlu1 %1220 }
 0x1a7   : > { %v4127_v23 = vrot.slane %v441_v21, %v996_v62 }
 0x207   : > { %v981_v24 = vpop.f32.mrf.mxu1 }
 0x208   : > { %v982_v25 = vadd.f32 %v981_v24, %v838_v22 }
 0x209   : > { %v3352_v26 = vpop.f32.mrf.mxu1 }
 0x20a   : > { %v1003_v27 = vmul.f32 %v4127_v23, %v982_v25 }
 0x20c   : > { %1011 = vrot.lane.b32.xlu1 %v1003_v27, %s3679_s28 }
 0x243   : > { %v910_v31 = vpop.f32.mrf.mxu0 }
 0x244   : > { %v911_v32 = vadd.f32 %v910_v31, %v838_v22 }
 0x245   : > { %v912_v34 = vpop.f32.mrf.mxu0 }
 0x246   : > { %v1001_v35 = vmul.f32 %v4135_v30, %v911_v32  ;;  %v913_v36 = vadd.f32 %v912_v34, %v838_v22 }
 0x248   : > { %v1002_v37 = vmul.f32 %v4137_v33, %v913_v36  ;;  %1007 = vrot.lane.b32.xlu1 %v1001_v35, %s3679_s28 }
 0x24a   : > { %1009 = vrot.lane.b32.xlu0 %v1002_v37, %s3679_s28 }
 0x25f   : > { %v1292_v38 = vpop.f32.mrf.mxu0 }
 0x260   : > { %v1293_v49 = vadd.f32 %v1292_v38, %v1221_v39 }
 0x261   : > { %v1294_v44 = vpop.f32.mrf.mxu0 }
 0x262   : > { %v1295_v45 = vadd.f32 %v1294_v44, %v1221_v39  ;;  %v1367_v52 = vmul.f32 %v1293_v49, %v4135_v30 }
 0x264   : > { %v1368_v46 = vmul.f32 %v1295_v45, %v4137_v33 }
 0x265   : > { %v1363_v47 = vpop.f32.mrf.mxu1 }
 0x266   : > { %v1364_v48 = vadd.f32 %v1363_v47, %v1221_v39  ;;  %1375 = vrot.lane.b32.xlu1 %v1368_v46, %s3679_s28 }
 0x267   : > { %v3373_v51 = vpop.f32.mrf.mxu1 }
 0x268   : > { %v1369_v50 = vmul.f32 %v1364_v48, %v4127_v23 }
 0x26a   : > { %1377 = vrot.lane.b32.xlu0 %v1369_v50, %s3679_s28 }
 0x26e   : > { %1373 = vrot.lane.b32.xlu0 %v1367_v52, %s3679_s28 }
 0x27e   : > { %v1012_v53 = vpop.permute.xlu1 %1011 }
 0x2ba   : > { %v1008_v55 = vpop.permute.xlu1 %1007 }
 0x2bb   : > { %1019 = vst.msk [vmem:[#allocation4] sm:$0xff] %vm1018_vm0, %v1008_v55 }
 0x2bc   : > { %v1010_v54 = vpop.permute.xlu0 %1009 }
 0x2bd   : > { %v4151_v42 = vsel %vm621_vm14, %v1008_v55, %v1010_v54  ;;  %v1014_v56 = vsel %vm621_vm14, %v1010_v54, %v1012_v53  ;;  %v4288_v54 = vld [vmem:[%s4736_s4] sm:$0xff] }
 0x2be   : > { %1022 = vst.msk [vmem:[#allocation4 + $0x10] sm:$0xff] %vm1021_vm1, %v1014_v56 }
 0x2c2   : > { %v4155_v57 = vld [vmem:[#allocation4] sm:$0xff] }
 0x2c3   : > { %1539 = vrot.lane.b32.xlu1 %v4155_v57, %s3669_s0  ;;  %1519 = vrot.lane.b32.xlu0 %v4155_v57, %s3670_s11 }
 0x2c5   : > { %v1535_v40 = vld [vmem:[#allocation4 + $0x10] sm:$0xff] }
 0x2c6   : > { %1392 = vst.msk [vmem:[#allocation8 + $0x10] sm:$0xff] %vm636_vm13, %v1535_v40 }
 0x2c7   : > { %1499 = vrot.lane.b32.xlu1 %v4155_v57, %s3671_s12  ;;  %1479 = vrot.lane.b32.xlu0 %v4155_v57, %s3672_s22 }
 0x2cb   : > { %1459 = vrot.lane.b32.xlu1 %v4155_v57, %s3673_s23  ;;  %1439 = vrot.lane.b32.xlu0 %v4155_v57, %s3674_s24 }
 0x2cd   : > { %v4195_v3 = vld [vmem:[#allocation8 + $0x10] sm:$0xff] }
 0x2cf   : > { %1419 = vrot.lane.b32.xlu1 %v4155_v57, %s3675_s25  ;;  %1399 = vrot.lane.b32.xlu0 %v4155_v57, %s3676_s27 }
 0x2d3   : > { %1543 = vrot.lane.b32.xlu0 %v1535_v40, %s3669_s0  ;;  %1541 = vrot.lane.b32.xlu1 %v4151_v42, %s3669_s0 }
 0x2d7   : > { %1523 = vrot.lane.b32.xlu1 %v1535_v40, %s3670_s11  ;;  %1521 = vrot.lane.b32.xlu0 %v4151_v42, %s3670_s11 }
 0x2d8   : > { %v1376_v58 = vpop.permute.xlu1 %1375 }
 0x2db   : > { %1503 = vrot.lane.b32.xlu0 %v1535_v40, %s3671_s12  ;;  %1501 = vrot.lane.b32.xlu1 %v4151_v42, %s3671_s12 }
 0x2dc   : > { %v1378_v59 = vpop.permute.xlu0 %1377 }
 0x2dd   : > { %v1380_v60 = vsel %vm621_vm14, %v1376_v58, %v1378_v59 }
 0x2de   : > { %1386 = vst.msk [vmem:[#allocation5 + $0x10] sm:$0xff] %vm1021_vm1, %v1380_v60 }
 0x2df   : > { %1483 = vrot.lane.b32.xlu1 %v1535_v40, %s3672_s22  ;;  %1481 = vrot.lane.b32.xlu0 %v4151_v42, %s3672_s22 }
 0x2e0   : > { %v1374_v61 = vpop.permute.xlu0 %1373 }
 0x2e1   : > { %1384 = vst.msk [vmem:[#allocation5] sm:$0xff] %vm1018_vm0, %v1374_v61  ;;  %v4190_v63 = vsel %vm621_vm14, %v1374_v61, %v1376_v58 }
 0x2e3   : > { %1463 = vrot.lane.b32.xlu0 %v1535_v40, %s3673_s23  ;;  %1461 = vrot.lane.b32.xlu1 %v4151_v42, %s3673_s23 }
 0x2e5   : > { %v1902_v1 = vld [vmem:[#allocation5 + $0x10] sm:$0xff] }
 0x2e6   : > { %1759 = vst.msk [vmem:[#allocation8 + $0x10] sm:$0xff] %vm636_vm13, %v1902_v1 }
 0x2e7   : > { %1443 = vrot.lane.b32.xlu1 %v1535_v40, %s3674_s24  ;;  %1441 = vrot.lane.b32.xlu0 %v4151_v42, %s3674_s24 }
 0x2e8   : > { %v4207_v4 = vld [vmem:[#allocation5] sm:$0xff] }
 0x2eb   : > { %1423 = vrot.lane.b32.xlu0 %v1535_v40, %s3675_s25  ;;  %1421 = vrot.lane.b32.xlu1 %v4151_v42, %s3675_s25 }
 0x2ef   : > { %1403 = vrot.lane.b32.xlu1 %v1535_v40, %s3676_s27  ;;  %1401 = vrot.lane.b32.xlu0 %v4151_v42, %s3676_s27 }
 0x2f3   : > { %1906 = vrot.lane.b32.xlu1 %v4207_v4, %s3669_s0  ;;  %1886 = vrot.lane.b32.xlu0 %v4207_v4, %s3670_s11 }
 0x2f7   : > { %1866 = vrot.lane.b32.xlu1 %v4207_v4, %s3671_s12  ;;  %1846 = vrot.lane.b32.xlu0 %v4207_v4, %s3672_s22 }
 0x2fb   : > { %1826 = vrot.lane.b32.xlu1 %v4207_v4, %s3673_s23  ;;  %1806 = vrot.lane.b32.xlu0 %v4207_v4, %s3674_s24 }
 0x2ff   : > { %1786 = vrot.lane.b32.xlu1 %v4207_v4, %s3675_s25  ;;  %1910 = vrot.lane.b32.xlu0 %v1902_v1, %s3669_s0 }
 0x303   : > { %1908 = vrot.lane.b32.xlu1 %v4190_v63, %s3669_s0  ;;  %1888 = vrot.lane.b32.xlu0 %v4190_v63, %s3670_s11 }
 0x307   : > { %1890 = vrot.lane.b32.xlu1 %v1902_v1, %s3670_s11  ;;  %1870 = vrot.lane.b32.xlu0 %v1902_v1, %s3671_s12 }
 0x30b   : > { %1868 = vrot.lane.b32.xlu1 %v4190_v63, %s3671_s12  ;;  %1848 = vrot.lane.b32.xlu0 %v4190_v63, %s3672_s22 }
 0x30f   : > { %1850 = vrot.lane.b32.xlu1 %v1902_v1, %s3672_s22  ;;  %1830 = vrot.lane.b32.xlu0 %v1902_v1, %s3673_s23 }
 0x313   : > { %1828 = vrot.lane.b32.xlu1 %v4190_v63, %s3673_s23  ;;  %1808 = vrot.lane.b32.xlu0 %v4190_v63, %s3674_s24 }
 0x317   : > { %1810 = vrot.lane.b32.xlu1 %v1902_v1, %s3674_s24  ;;  %1790 = vrot.lane.b32.xlu0 %v1902_v1, %s3675_s25 }
 0x31b   : > { %1788 = vrot.lane.b32.xlu1 %v4190_v63, %s3675_s25  ;;  %1768 = vrot.lane.b32.xlu0 %v4190_v63, %s3676_s27 }
 0x31f   : > { %1770 = vrot.lane.b32.xlu1 %v1902_v1, %s3676_s27  ;;  %1766 = vrot.lane.b32.xlu0 %v4207_v4, %s3676_s27 }
 0x323   : > { %1584 = vperm.xlu1 %3531, %v1581_v6   ;;  %1951 = vperm.xlu0 %3530, %v1581_v6  }
 0x335   : > { %v1520_v7 = vpop.permute.xlu0 %1519  ;;  %v1540_v2 = vpop.permute.xlu1 %1539 }
 0x339   : > { %v1480_v8 = vpop.permute.xlu0 %1479  ;;  %v1500_v9 = vpop.permute.xlu1 %1499 }
 0x33d   : > { %v1440_v10 = vpop.permute.xlu0 %1439  ;;  %v1460_v5 = vpop.permute.xlu1 %1459 }
 0x341   : > { %v4252_v11 = vpop.permute.xlu0 %1399  ;;  %v1420_v12 = vpop.permute.xlu1 %1419 }
 0x345   : > { %v1544_v13 = vpop.permute.xlu0 %1543  ;;  %v1542_v14 = vpop.permute.xlu1 %1541 }
 0x346   : > { %1552 = vst.msk [vmem:[#allocation8 + $0xd0] sm:$0xff] %vm636_vm13, %v1544_v13  ;;  %v1545_v15 = vsel %vm797_vm5, %v1540_v2, %v1542_v14  ;;  %v1546_v16 = vsel %vm797_vm5, %v1542_v14, %v1544_v13 }
 0x347   : > { %1604 = vmatprep.subr.mxu0 %v1546_v16 }
 0x348   : > { %1605 = vmatpush1.msra.mxu0 %v1545_v15 }
 0x349   : > { %v1522_v17 = vpop.permute.xlu0 %1521  ;;  %v1524_v18 = vpop.permute.xlu1 %1523 }
 0x34a   : > { %v1525_v19 = vsel %vm776_vm6, %v1520_v7, %v1522_v17  ;;  %v1526_v20 = vsel %vm776_vm6, %v1522_v17, %v1524_v18  ;;  %1532 = vst.msk [vmem:[#allocation8 + $0xb8] sm:$0xff] %vm636_vm13, %v1524_v18 }
 0x34b   : > { %1606 = vmatprep.subr.mxu0 %v1526_v20 }
 0x34c   : > { %1607 = vmatpush1.msra.mxu0 %v1525_v19 }
 0x34d   : > { %v1504_v41 = vpop.permute.xlu0 %1503  ;;  %v1502_v43 = vpop.permute.xlu1 %1501  ;;  %v1580_v62 = vld [vmem:[#allocation8 + $0xd0] sm:$0xff] }
 0x34e   : > { %1512 = vst.msk [vmem:[#allocation8 + $0xa0] sm:$0xff] %vm636_vm13, %v1504_v41  ;;  %v1505_v21 = vsel %vm755_vm7, %v1500_v9, %v1502_v43  ;;  %v1506_v22 = vsel %vm755_vm7, %v1502_v43, %v1504_v41  ;;  %3375 = vmatpush3.msra.mxu1 %v1580_v62 }
 0x34f   : > { %3376 = vmatprep.subr.mxu1 %v3652_v0  ;;  %1608 = vmatprep.subr.mxu0 %v1506_v22 }
 0x350   : > { %1609 = vmatpush1.msra.mxu0 %v1505_v21 }
 0x351   : > { %v1482_v24 = vpop.permute.xlu0 %1481  ;;  %v1484_v25 = vpop.permute.xlu1 %1483  ;;  %v1577_v26 = vld [vmem:[#allocation8 + $0xb8] sm:$0xff] }
 0x352   : > { %v1485_v27 = vsel %vm734_vm8, %v1480_v8, %v1482_v24  ;;  %v1486_v28 = vsel %vm734_vm8, %v1482_v24, %v1484_v25  ;;  %1492 = vst.msk [vmem:[#allocation8 + $0x88] sm:$0xff] %vm636_vm13, %v1484_v25  ;;  %3377 = vmatpush3.msra.mxu1 %v1577_v26 }
 0x353   : > { %3378 = vmatprep.subr.mxu1 %v3652_v0  ;;  %1610 = vmatprep.subr.mxu0 %v1486_v28 }
 0x354   : > { %1611 = vmatpush1.msra.mxu0 %v1485_v27 }
 0x355   : > { %v1464_v29 = vpop.permute.xlu0 %1463  ;;  %v1462_v31 = vpop.permute.xlu1 %1461  ;;  %v1574_v32 = vld [vmem:[#allocation8 + $0xa0] sm:$0xff] }
 0x356   : > { %1472 = vst.msk [vmem:[#allocation8 + $0x70] sm:$0xff] %vm636_vm13, %v1464_v29  ;;  %v1465_v34 = vsel %vm713_vm9, %v1460_v5, %v1462_v31  ;;  %v1466_v35 = vsel %vm713_vm9, %v1462_v31, %v1464_v29  ;;  %3379 = vmatpush3.msra.mxu1 %v1574_v32 }
 0x357   : > { %3380 = vmatprep.subr.mxu1 %v3652_v0  ;;  %1612 = vmatprep.subr.mxu0 %v1466_v35 }
 0x358   : > { %1613 = vmatpush1.msra.mxu0 %v1465_v34 }
 0x359   : > { %v1442_v36 = vpop.permute.xlu0 %1441  ;;  %v1444_v37 = vpop.permute.xlu1 %1443  ;;  %v1571_v38 = vld [vmem:[#allocation8 + $0x88] sm:$0xff] }
 0x35a   : > { %v1445_v39 = vsel %vm692_vm10, %v1440_v10, %v1442_v36  ;;  %v1446_v44 = vsel %vm692_vm10, %v1442_v36, %v1444_v37  ;;  %1452 = vst.msk [vmem:[#allocation8 + $0x58] sm:$0xff] %vm636_vm13, %v1444_v37  ;;  %3381 = vmatpush3.msra.mxu1 %v1571_v38 }
 0x35b   : > { %3382 = vmatprep.subr.mxu1 %v3652_v0  ;;  %1614 = vmatprep.subr.mxu0 %v1446_v44 }
 0x35c   : > { %1615 = vmatpush1.msra.mxu0 %v1445_v39 }
 0x35d   : > { %v1424_v45 = vpop.permute.xlu0 %1423  ;;  %v1422_v46 = vpop.permute.xlu1 %1421  ;;  %v1568_v47 = vld [vmem:[#allocation8 + $0x70] sm:$0xff] }
 0x35e   : > { %1432 = vst.msk [vmem:[#allocation8 + $0x40] sm:$0xff] %vm636_vm13, %v1424_v45  ;;  %v1425_v48 = vsel %vm671_vm11, %v1420_v12, %v1422_v46  ;;  %v1426_v49 = vsel %vm671_vm11, %v1422_v46, %v1424_v45  ;;  %3383 = vmatpush3.msra.mxu1 %v1568_v47 }
 0x35f   : > { %3384 = vmatprep.subr.mxu1 %v3652_v0  ;;  %1616 = vmatprep.subr.mxu0 %v1426_v49 }
 0x360   : > { %1617 = vmatpush1.msra.mxu0 %v1425_v48  ;;  %v1923_v48 = vld [vmem:[#allocation8 + $0x10] sm:$0xff] }
 0x361   : > { %v1402_v51 = vpop.permute.xlu0 %1401  ;;  %v1404_v50 = vpop.permute.xlu1 %1403  ;;  %v1565_v52 = vld [vmem:[#allocation8 + $0x58] sm:$0xff] }
 0x362   : > { %v1405_v53 = vsel %vm650_vm12, %v4252_v11, %v1402_v51  ;;  %v1406_v55 = vsel %vm650_vm12, %v1402_v51, %v1404_v50  ;;  %1412 = vst.msk [vmem:[#allocation8 + $0x28] sm:$0xff] %vm636_vm13, %v1404_v50  ;;  %3385 = vmatpush3.msra.mxu1 %v1565_v52 }
 0x363   : > { %3386 = vmatprep.subr.mxu1 %v3652_v0  ;;  %1618 = vmatprep.subr.mxu0 %v1406_v55 }
 0x364   : > { %1619 = vmatpush1.msra.mxu0 %v1405_v53 }
 0x365   : > { %v1887_v56 = vpop.permute.xlu0 %1886  ;;  %v1907_v40 = vpop.permute.xlu1 %1906  ;;  %v1562_v58 = vld [vmem:[#allocation8 + $0x40] sm:$0xff]  ;;  %1620 = vmatprep.subr.mxu0 %v4151_v42 }
 0x366   : > { %3387 = vmatpush3.msra.mxu1 %v1562_v58  ;;  %1621 = vmatpush1.msra.mxu0 %v4155_v57 }
 0x367   : > { %3388 = vmatprep.subr.mxu1 %v3652_v0  ;;  %3252 = vmatmul.mubr.msk.f32.vlgmr.msra.gmra.mxu0 %vm840_vm4, %v4288_v54 }
 0x368   : > { %2021 = vmatprep.mubr.f32.mxu0 %v3652_v0 }
 0x369   : > { %v1847_v59 = vpop.permute.xlu0 %1846  ;;  %v1867_v60 = vpop.permute.xlu1 %1866  ;;  %v1559_v61 = vld [vmem:[#allocation8 + $0x28] sm:$0xff] }
 0x36a   : > { %3389 = vmatpush3.msra.mxu1 %v1559_v61 }
 0x36b   : > { %3390 = vmatprep.subr.mxu1 %v3652_v0 }
 0x36c   : > { %3391 = vmatpush3.msra.mxu1 %v4195_v3 }
 0x36d   : > { %v1807_v1 = vpop.permute.xlu0 %1806  ;;  %3393 = vmatmul.mubr.msk.f32.vlgmr.msra.gmra.mxu1 %vm840_vm4, %v4288_v54  ;;  %v1827_v42 = vpop.permute.xlu1 %1826  ;;  %3395 = vmatprep.subr.mxu1 %v3652_v0 }
 0x36e   : > { %3413 = vmatprep.mubr.msk.f32.mxu1 %vm3677_vm3, %v3652_v0  ;;  %vm3107_vm3 = vcmask 253952  }
 0x371   : > { %v1911_v57 = vpop.permute.xlu0 %1910  ;;  %v1787_v6 = vpop.permute.xlu1 %1786 }
 0x372   : > { %1919 = vst.msk [vmem:[#allocation8 + $0xd0] sm:$0xff] %vm636_vm13, %v1911_v57 }
 0x375   : > { %v1889_v7 = vpop.permute.xlu0 %1888  ;;  %v1909_v2 = vpop.permute.xlu1 %1908 }
 0x376   : > { %v1912_v8 = vsel %vm797_vm5, %v1907_v40, %v1909_v2  ;;  %v1913_v3 = vsel %vm797_vm5, %v1909_v2, %v1911_v57  ;;  %v1892_v12 = vsel %vm776_vm6, %v1887_v56, %v1889_v7 }
 0x377   : > { %1971 = vmatprep.subr.mxu0 %v1913_v3 }
 0x378   : > { %1972 = vmatpush1.msra.mxu0 %v1912_v8 }
 0x379   : > { %v1871_v9 = vpop.permute.xlu0 %1870  ;;  %v1891_v10 = vpop.permute.xlu1 %1890  ;;  %v1947_v5 = vld [vmem:[#allocation8 + $0xd0] sm:$0xff] }
 0x37a   : > { %1879 = vst.msk [vmem:[#allocation8 + $0xa0] sm:$0xff] %vm636_vm13, %v1871_v9  ;;  %v1893_v11 = vsel %vm776_vm6, %v1889_v7, %v1891_v10  ;;  %1899 = vst.msk [vmem:[#allocation8 + $0xb8] sm:$0xff] %vm636_vm13, %v1891_v10  ;;  %3396 = vmatpush3.msra.mxu1 %v1947_v5 }
 0x37b   : > { %3397 = vmatprep.subr.mxu1 %v3652_v0  ;;  %1973 = vmatprep.subr.mxu0 %v1893_v11 }
 0x37c   : > { %1974 = vmatpush1.msra.mxu0 %v1892_v12 }
 0x37d   : > { %v1849_v13 = vpop.permute.xlu0 %1848  ;;  %v1869_v14 = vpop.permute.xlu1 %1868 }
 0x37e   : > { %v1872_v15 = vsel %vm755_vm7, %v1867_v60, %v1869_v14  ;;  %v1873_v16 = vsel %vm755_vm7, %v1869_v14, %v1871_v9  ;;  %v1852_v41 = vsel %vm734_vm8, %v1847_v59, %v1849_v13 }
 0x37f   : > { %1975 = vmatprep.subr.mxu0 %v1873_v16 }
 0x380   : > { %1976 = vmatpush1.msra.mxu0 %v1872_v15 }
 0x381   : > { %v1831_v17 = vpop.permute.xlu0 %1830  ;;  %v1851_v18 = vpop.permute.xlu1 %1850  ;;  %v1944_v19 = vld [vmem:[#allocation8 + $0xb8] sm:$0xff]  ;;  %v1941_v43 = vld [vmem:[#allocation8 + $0xa0] sm:$0xff] }
 0x382   : > { %1839 = vst.msk [vmem:[#allocation8 + $0x70] sm:$0xff] %vm636_vm13, %v1831_v17  ;;  %v1853_v20 = vsel %vm734_vm8, %v1849_v13, %v1851_v18  ;;  %1859 = vst.msk [vmem:[#allocation8 + $0x88] sm:$0xff] %vm636_vm13, %v1851_v18  ;;  %3398 = vmatpush3.msra.mxu1 %v1944_v19 }
 0x383   : > { %3399 = vmatprep.subr.mxu1 %v3652_v0  ;;  %1977 = vmatprep.subr.mxu0 %v1853_v20 }
 0x384   : > { %3400 = vmatpush3.msra.mxu1 %v1941_v43  ;;  %1978 = vmatpush1.msra.mxu0 %v1852_v41 }
 0x385   : > { %v1809_v62 = vpop.permute.xlu0 %1808  ;;  %v1829_v21 = vpop.permute.xlu1 %1828  ;;  %3401 = vmatprep.subr.mxu1 %v3652_v0 }
 0x386   : > { %v1832_v22 = vsel %vm713_vm9, %v1827_v42, %v1829_v21  ;;  %v1833_v24 = vsel %vm713_vm9, %v1829_v21, %v1831_v17  ;;  %v1812_v29 = vsel %vm692_vm10, %v1807_v1, %v1809_v62 }
 0x387   : > { %1979 = vmatprep.subr.mxu0 %v1833_v24 }
 0x388   : > { %1980 = vmatpush1.msra.mxu0 %v1832_v22 }
 0x389   : > { %v1791_v25 = vpop.permute.xlu0 %1790  ;;  %v1811_v26 = vpop.permute.xlu1 %1810  ;;  %v1938_v27 = vld [vmem:[#allocation8 + $0x88] sm:$0xff]  ;;  %v1935_v31 = vld [vmem:[#allocation8 + $0x70] sm:$0xff] }
 0x38a   : > { %1799 = vst.msk [vmem:[#allocation8 + $0x40] sm:$0xff] %vm636_vm13, %v1791_v25  ;;  %v1813_v28 = vsel %vm692_vm10, %v1809_v62, %v1811_v26  ;;  %1819 = vst.msk [vmem:[#allocation8 + $0x58] sm:$0xff] %vm636_vm13, %v1811_v26  ;;  %3402 = vmatpush3.msra.mxu1 %v1938_v27 }
 0x38b   : > { %3403 = vmatprep.subr.mxu1 %v3652_v0  ;;  %1981 = vmatprep.subr.mxu0 %v1813_v28 }
 0x38c   : > { %3404 = vmatpush3.msra.mxu1 %v1935_v31  ;;  %1982 = vmatpush1.msra.mxu0 %v1812_v29 }
 0x38d   : > { %v1769_v32 = vpop.permute.xlu0 %1768  ;;  %v1789_v34 = vpop.permute.xlu1 %1788  ;;  %3405 = vmatprep.subr.mxu1 %v3652_v0 }
 0x38e   : > { %v1792_v35 = vsel %vm671_vm11, %v1787_v6, %v1789_v34  ;;  %v1793_v36 = vsel %vm671_vm11, %v1789_v34, %v1791_v25 }
 0x38f   : > { %1983 = vmatprep.subr.mxu0 %v1793_v36 }
 0x390   : > { %1984 = vmatpush1.msra.mxu0 %v1792_v35 }
 0x391   : > { %v1767_v37 = vpop.permute.xlu0 %1766  ;;  %v1771_v38 = vpop.permute.xlu1 %1770  ;;  %v1932_v39 = vld [vmem:[#allocation8 + $0x58] sm:$0xff]  ;;  %v1929_v46 = vld [vmem:[#allocation8 + $0x40] sm:$0xff] }
 0x392   : > { %v1772_v44 = vsel %vm650_vm12, %v1767_v37, %v1769_v32  ;;  %v1773_v45 = vsel %vm650_vm12, %v1769_v32, %v1771_v38  ;;  %1779 = vst.msk [vmem:[#allocation8 + $0x28] sm:$0xff] %vm636_vm13, %v1771_v38  ;;  %3406 = vmatpush3.msra.mxu1 %v1932_v39 }
 0x393   : > { %3407 = vmatprep.subr.mxu1 %v3652_v0  ;;  %1985 = vmatprep.subr.mxu0 %v1773_v45 }
 0x394   : > { %3408 = vmatpush3.msra.mxu1 %v1929_v46  ;;  %1986 = vmatpush1.msra.mxu0 %v1772_v44 }
 0x395   : > { %3409 = vmatprep.subr.mxu1 %v3652_v0  ;;  %1987 = vmatprep.subr.mxu0 %v4190_v63 }
 0x396   : > { %1988 = vmatpush1.msra.mxu0 %v4207_v4 }
 0x397   : > { %3254 = vmatmul.mubr.msk.f32.vlgmr.msra.gmra.mxu0 %vm840_vm4, %v4288_v54 }
 0x398   : > { %2500 = vmatprep.mubr.f32.mxu0 %v3652_v0 }
 0x399   : > { %v1926_v47 = vld [vmem:[#allocation8 + $0x28] sm:$0xff] }
 0x39a   : > { %3410 = vmatpush3.msra.mxu1 %v1926_v47 }
 0x39b   : > { %3411 = vmatprep.subr.mxu1 %v3652_v0 }
 0x39c   : > { %3412 = vmatpush3.msra.mxu1 %v1923_v48 }
 0x39d   : > { %3414 = vmatmul.mubr.msk.f32.vlgmr.msra.gmra.mxu1 %vm840_vm4, %v4288_v54 }
 0x39e   : > { %v1585_v51 = vpop.permute.xlu1 %1584  ;;  %v1952_v3 = vpop.permute.xlu0 %1951 }
 0x427   : > { %v1656_v49 = vpop.f32.mrf.mxu0 }
 0x428   : > { %v1657_v55 = vadd.f32 %v1656_v49, %v1585_v51 }
 0x429   : > { %v1658_v50 = vpop.f32.mrf.mxu0 }
 0x42a   : > { %v1659_v63 = vadd.f32 %v1658_v50, %v1585_v51  ;;  %v1731_v54 = vmax.f32 %v1657_v55, 0.0 }
 0x42c   : > { %v1732_v52 = vmax.f32 %v1659_v63, 0.0  ;;  %v4353_v60 = vmul.f32 %v1731_v54, %v4135_v30 }
 0x42d   : > { %v1727_v4 = vpop.f32.mrf.mxu1 }
 0x42e   : > { %v1728_v53 = vadd.f32 %v1727_v4, %v1585_v51  ;;  %v4343_v56 = vmul.f32 %v1732_v52, %v4137_v33  ;;  %v2121_v61 = vmul.f32 %v4353_v60, %v4353_v60 }
 0x42f   : > { %v3394_v40 = vpop.f32.mrf.mxu1 }
 0x430   : > { %v1733_v58 = vmax.f32 %v1728_v53, 0.0  ;;  %1742 = vrot.lane.b32.xlu0 %v4343_v56, %s3679_s28  ;;  %v2122_v1 = vmul.f32 %v4343_v56, %v4343_v56  ;;  %v2124_v57 = vrot.slane %v2121_v61, 4 }
 0x432   : > { %v4348_v59 = vmul.f32 %v1733_v58, %v4127_v23  ;;  %v2130_v6 = vrot.slane %v2122_v1, 4  ;;  %v2125_v2 = vadd.f32 %v2124_v57, %v2121_v61 }
 0x434   : > { %1744 = vrot.lane.b32.xlu1 %v4348_v59, %s3679_s28  ;;  %v2123_v42 = vmul.f32 %v4348_v59, %v4348_v59  ;;  %v2131_v8 = vadd.f32 %v2130_v6, %v2122_v1  ;;  %v2126_v5 = vrot.slane %v2125_v2, 2 }
 0x436   : > { %v2136_v7 = vsel %vm636_vm13, %v2123_v42, 0.0  ;;  %v2132_v12 = vrot.slane %v2131_v8, 2  ;;  %v2127_v17 = vadd.f32 %v2126_v5, %v2125_v2 }
 0x437   : > { %v2137_v9 = vrot.slane %v2136_v7, 4 }
 0x438   : > { %1740 = vrot.lane.b32.xlu1 %v4353_v60, %s3679_s28  ;;  %v2133_v20 = vadd.f32 %v2132_v12, %v2131_v8  ;;  %v2128_v25 = vrot.slane %v2127_v17, 1 }
 0x439   : > { %v2138_v16 = vadd.f32 %v2137_v9, %v2136_v7 }
 0x43a   : > { %v2134_v29 = vrot.slane %v2133_v20, 1  ;;  %v2129_v36 = vadd.f32 %v2128_v25, %v2127_v17 }
 0x43b   : > { %v2139_v22 = vrot.slane %v2138_v16, 2 }
 0x43c   : > { %v2135_v44 = vadd.f32 %v2134_v29, %v2133_v20  ;;  %v2143_v51 = vadd.f32 1e-20, %v2129_v36  ;;  %v3059_v36 = vld [vmem:[%s4741_s9] sm:$0xff] }
 0x43d   : > { %v2140_v35 = vadd.f32 %v2139_v22, %v2138_v16 }
 0x43e   : > { %v2144_v52 = vadd.f32 1e-20, %v2135_v44  ;;  %3534 = vrsqrt.f32 %v2143_v51 }
 0x43f   : > { %v2141_v48 = vrot.slane %v2140_v35, 1 }
 0x440   : > { %3536 = vrsqrt.f32 %v2144_v52 }
 0x441   : > { %v2142_v40 = vadd.f32 %v2141_v48, %v2140_v35  ;;  %v2419_v35 = vld [vmem:[%s4739_s7 + $0x8] sm:$0xff] }
 0x443   : > { %v2145_v57 = vadd.f32 1e-20, %v2142_v40 }
 0x44b   : > { %v3535_v8 = vpop.eup %3534 }
 0x457   : > { %v2023_v10 = vpop.f32.mrf.mxu0 }
 0x458   : > { %v2024_v11 = vadd.f32 %v2023_v10, %v1952_v3  ;;  %v2149_v10 = vmul.f32 %v3535_v8, %v4353_v60 }
 0x459   : > { %v2025_v13 = vpop.f32.mrf.mxu0 }
 0x45a   : > { %v2098_v14 = vmax.f32 %v2024_v11, 0.0  ;;  %v2026_v15 = vadd.f32 %v2025_v13, %v1952_v3 }
 0x45c   : > { %v2101_v18 = vmul.f32 %v2098_v14, %v4135_v30  ;;  %v2099_v19 = vmax.f32 %v2026_v15, 0.0 }
 0x45d   : > { %v2094_v41 = vpop.f32.mrf.mxu1 }
 0x45e   : > { %v2095_v43 = vadd.f32 %v2094_v41, %v1952_v3  ;;  %v2152_v62 = vmul.f32 %v2101_v18, %v2101_v18  ;;  %v2102_v21 = vmul.f32 %v2099_v19, %v4137_v33  ;;  %v3537_v3 = vpop.eup %3536 }
 0x45f   : > { %v3415_v24 = vpop.f32.mrf.mxu1  ;;  %v2150_v12 = vmul.f32 %v3537_v3, %v4343_v56 }
 0x460   : > { %v2100_v26 = vmax.f32 %v2095_v43, 0.0  ;;  %v2155_v27 = vrot.slane %v2152_v62, 4  ;;  %v2153_v28 = vmul.f32 %v2102_v21, %v2102_v21  ;;  %2109 = vrot.lane.b32.xlu1 %v2102_v21, %s3679_s28 }
 0x462   : > { %v2103_v31 = vmul.f32 %v2100_v26, %v4127_v23  ;;  %v2156_v32 = vadd.f32 %v2155_v27, %v2152_v62  ;;  %v2161_v34 = vrot.slane %v2153_v28, 4  ;;  %v4427_v26 = vld [vmem:[%s4738_s6] sm:$0xff] }
 0x463   : > { %3434 = vmatprep.mubr.msk.f32.mxu1 %vm840_vm4, %v4427_v26 }
 0x464   : > { %v2154_v37 = vmul.f32 %v2103_v31, %v2103_v31  ;;  %v2157_v38 = vrot.slane %v2156_v32, 2  ;;  %v2162_v39 = vadd.f32 %v2161_v34, %v2153_v28  ;;  %2111 = vrot.lane.b32.xlu0 %v2103_v31, %s3679_s28  ;;  %v2418_v34 = vld [vmem:[%s4739_s7] sm:$0xff] }
 0x466   : > { %v2167_v45 = vsel %vm636_vm13, %v2154_v37, 0.0  ;;  %v2158_v46 = vadd.f32 %v2157_v38, %v2156_v32  ;;  %v2163_v47 = vrot.slane %v2162_v39, 2  ;;  %v3060_v37 = vld [vmem:[%s4741_s9 + $0x8] sm:$0xff]  ;;  %v2189_v38 = vld [vmem:[%s4740_s8] sm:$0xff] }
 0x467   : > { %v2168_v49 = vrot.slane %v2167_v45, 4 }
 0x468   : > { %v2159_v50 = vrot.slane %v2158_v46, 1  ;;  %v2164_v63 = vadd.f32 %v2163_v47, %v2162_v39  ;;  %2107 = vrot.lane.b32.xlu0 %v2101_v18, %s3679_s28 }
 0x469   : > { %v2169_v4 = vadd.f32 %v2168_v49, %v2167_v45 }
 0x46a   : > { %v2160_v53 = vadd.f32 %v2159_v50, %v2158_v46  ;;  %v2165_v55 = vrot.slane %v2164_v63, 1 }
 0x46b   : > { %v2170_v58 = vrot.slane %v2169_v4, 2 }
 0x46c   : > { %v2174_v54 = vadd.f32 1e-20, %v2160_v53  ;;  %v2166_v61 = vadd.f32 %v2165_v55, %v2164_v63 }
 0x46d   : > { %v2171_v1 = vadd.f32 %v2170_v58, %v2169_v4 }
 0x46e   : > { %3538 = vrsqrt.f32 %v2174_v54  ;;  %v2175_v42 = vadd.f32 1e-20, %v2166_v61 }
 0x46f   : > { %v2172_v6 = vrot.slane %v2171_v1, 1 }
 0x470   : > { %3540 = vrsqrt.f32 %v2175_v42 }
 0x471   : > { %v2173_v7 = vadd.f32 %v2172_v6, %v2171_v1  ;;  %3542 = vrsqrt.f32 %v2145_v57 }
 0x473   : > { %v2176_v2 = vadd.f32 1e-20, %v2173_v7 }
 0x475   : > { %3544 = vrsqrt.f32 %v2176_v2 }
 0x47b   : > { %v3539_v9 = vpop.eup %3538 }
 0x47c   : > { %v2180_v5 = vmul.f32 %v3539_v9, %v2101_v18 }
 0x47d   : > { %v3541_v11 = vpop.eup %3540 }
 0x47e   : > { %v2181_v13 = vmul.f32 %v3541_v11, %v2102_v21  ;;  %v4373_v14 = vsub.f32 %v2149_v10, %v2180_v5  ;;  %v3543_v15 = vpop.eup %3542 }
 0x47f   : > { %v2151_v19 = vmul.f32 %v3543_v15, %v4348_v59 }
 0x480   : > { %v4375_v16 = vsub.f32 %v2150_v12, %v2181_v13 }
 0x482   : > { %v3545_v17 = vpop.eup %3544 }
 0x483   : > { %v2182_v20 = vmul.f32 %v3545_v17, %v2103_v31 }
 0x485   : > { %v4378_v41 = vsub.f32 %v2151_v19, %v2182_v20 }
 0x4a2   : > { %v1743_v62 = vpop.permute.xlu0 %1742 }
 0x4a6   : > { %v1745_v43 = vpop.permute.xlu1 %1744 }
 0x4a7   : > { %v1747_v60 = vsel %vm621_vm14, %v1743_v62, %v1745_v43 }
 0x4a8   : > { %1753 = vst.msk [vmem:[#allocation6 + $0x10] sm:$0xff] %vm1021_vm1, %v1747_v60 }
 0x4aa   : > { %v1741_v18 = vpop.permute.xlu1 %1740 }
 0x4ab   : > { %v4383_v56 = vsel %vm621_vm14, %v1741_v18, %v1743_v62  ;;  %1751 = vst.msk [vmem:[#allocation6] sm:$0xff] %vm1018_vm0, %v1741_v18 }
 0x4af   : > { %v2371_v21 = vld [vmem:[#allocation6 + $0x10] sm:$0xff] }
 0x4b0   : > { %2228 = vst.msk [vmem:[#allocation8 + $0x10] sm:$0xff] %vm636_vm13, %v2371_v21 }
 0x4b2   : > { %v4387_v22 = vld [vmem:[#allocation6] sm:$0xff] }
 0x4b3   : > { %2375 = vrot.lane.b32.xlu1 %v4387_v22, %s3669_s0  ;;  %2355 = vrot.lane.b32.xlu0 %v4387_v22, %s3670_s11 }
 0x4b7   : > { %2335 = vrot.lane.b32.xlu1 %v4387_v22, %s3671_s12  ;;  %2315 = vrot.lane.b32.xlu0 %v4387_v22, %s3672_s22  ;;  %v4442_v31 = vld [vmem:[#allocation8 + $0x10] sm:$0xff] }
 0x4bb   : > { %2295 = vrot.lane.b32.xlu1 %v4387_v22, %s3673_s23  ;;  %2275 = vrot.lane.b32.xlu0 %v4387_v22, %s3674_s24 }
 0x4bf   : > { %2255 = vrot.lane.b32.xlu1 %v4387_v22, %s3675_s25  ;;  %2235 = vrot.lane.b32.xlu0 %v4387_v22, %s3676_s27 }
 0x4c3   : > { %2379 = vrot.lane.b32.xlu0 %v2371_v21, %s3669_s0  ;;  %2377 = vrot.lane.b32.xlu1 %v4383_v56, %s3669_s0 }
 0x4c7   : > { %2359 = vrot.lane.b32.xlu1 %v2371_v21, %s3670_s11  ;;  %2357 = vrot.lane.b32.xlu0 %v4383_v56, %s3670_s11 }
 0x4cb   : > { %2339 = vrot.lane.b32.xlu0 %v2371_v21, %s3671_s12  ;;  %2337 = vrot.lane.b32.xlu1 %v4383_v56, %s3671_s12 }
 0x4cf   : > { %2319 = vrot.lane.b32.xlu1 %v2371_v21, %s3672_s22  ;;  %2317 = vrot.lane.b32.xlu0 %v4383_v56, %s3672_s22 }
 0x4d2   : > { %v2110_v24 = vpop.permute.xlu1 %2109 }
 0x4d3   : > { %2299 = vrot.lane.b32.xlu0 %v2371_v21, %s3673_s23  ;;  %2297 = vrot.lane.b32.xlu1 %v4383_v56, %s3673_s23 }
 0x4d6   : > { %v2112_v59 = vpop.permute.xlu0 %2111 }
 0x4d7   : > { %2279 = vrot.lane.b32.xlu1 %v2371_v21, %s3674_s24  ;;  %2277 = vrot.lane.b32.xlu0 %v4383_v56, %s3674_s24  ;;  %v2114_v25 = vsel %vm621_vm14, %v2110_v24, %v2112_v59 }
 0x4d8   : > { %2120 = vst.msk [vmem:[#allocation7 + $0x10] sm:$0xff] %vm1021_vm1, %v2114_v25 }
 0x4da   : > { %v2108_v27 = vpop.permute.xlu0 %2107 }
 0x4db   : > { %2118 = vst.msk [vmem:[#allocation7] sm:$0xff] %vm1018_vm0, %v2108_v27  ;;  %v4434_v28 = vsel %vm621_vm14, %v2108_v27, %v2110_v24  ;;  %2259 = vrot.lane.b32.xlu0 %v2371_v21, %s3675_s25  ;;  %2257 = vrot.lane.b32.xlu1 %v4383_v56, %s3675_s25 }
 0x4df   : > { %2239 = vrot.lane.b32.xlu1 %v2371_v21, %s3676_s27  ;;  %2237 = vrot.lane.b32.xlu0 %v4383_v56, %s3676_s27  ;;  %v2742_v29 = vld [vmem:[#allocation7 + $0x10] sm:$0xff] }
 0x4e0   : > { %2599 = vst.msk [vmem:[#allocation8 + $0x10] sm:$0xff] %vm636_vm13, %v2742_v29 }
 0x4e2   : > { %v4445_v32 = vld [vmem:[#allocation7] sm:$0xff] }
 0x4e3   : > { %2746 = vrot.lane.b32.xlu1 %v4445_v32, %s3669_s0  ;;  %2726 = vrot.lane.b32.xlu0 %v4445_v32, %s3670_s11 }
 0x4e7   : > { %2706 = vrot.lane.b32.xlu1 %v4445_v32, %s3671_s12  ;;  %2686 = vrot.lane.b32.xlu0 %v4445_v32, %s3672_s22 }
 0x4eb   : > { %2666 = vrot.lane.b32.xlu1 %v4445_v32, %s3673_s23  ;;  %2646 = vrot.lane.b32.xlu0 %v4445_v32, %s3674_s24 }
 0x4ef   : > { %2626 = vrot.lane.b32.xlu1 %v4445_v32, %s3675_s25  ;;  %2750 = vrot.lane.b32.xlu0 %v2742_v29, %s3669_s0 }
 0x4f3   : > { %2748 = vrot.lane.b32.xlu1 %v4434_v28, %s3669_s0  ;;  %2728 = vrot.lane.b32.xlu0 %v4434_v28, %s3670_s11 }
 0x4f7   : > { %2730 = vrot.lane.b32.xlu1 %v2742_v29, %s3670_s11  ;;  %2710 = vrot.lane.b32.xlu0 %v2742_v29, %s3671_s12 }
 0x4fb   : > { %2708 = vrot.lane.b32.xlu1 %v4434_v28, %s3671_s12  ;;  %2688 = vrot.lane.b32.xlu0 %v4434_v28, %s3672_s22 }
 0x4ff   : > { %2690 = vrot.lane.b32.xlu1 %v2742_v29, %s3672_s22  ;;  %2670 = vrot.lane.b32.xlu0 %v2742_v29, %s3673_s23 }
 0x503   : > { %2668 = vrot.lane.b32.xlu1 %v4434_v28, %s3673_s23  ;;  %2648 = vrot.lane.b32.xlu0 %v4434_v28, %s3674_s24  ;;  %s3680_s23 = smov [#allocation11]  }
 0x507   : > { %2650 = vrot.lane.b32.xlu1 %v2742_v29, %s3674_s24  ;;  %2630 = vrot.lane.b32.xlu0 %v2742_v29, %s3675_s25  ;;  %s3564_s24 = sshll.u32 %s3680_s23, 4  ;;  %s3565_s24 = int_to_ptr.vmem [resolvable:$false] %s3564_s24 }
 0x50b   : > { %2628 = vrot.lane.b32.xlu1 %v4434_v28, %s3675_s25  ;;  %2608 = vrot.lane.b32.xlu0 %v4434_v28, %s3676_s27  ;;  %s3566_s25 = scalar_lea.vmem %s3565_s24, 32 }
 0x50f   : > { %2610 = vrot.lane.b32.xlu1 %v2742_v29, %s3676_s27  ;;  %2606 = vrot.lane.b32.xlu0 %v4445_v32, %s3676_s27 }
 0x513   : > { %2422 = vperm.xlu1 %3531, %v2418_v34   ;;  %2427 = vperm.xlu0 %3530, %v2419_v35  }
 0x517   : > { %2793 = vperm.xlu1 %3531, %v2418_v34   ;;  %2798 = vperm.xlu0 %3530, %v2419_v35  }
 0x51b   : > { %3063 = vperm.xlu1 %3531, %v3059_v36   ;;  %3068 = vperm.xlu0 %3530, %v3060_v37   ;;  %v4536_v37 = vld [vmem:[%s4738_s6 + $0x8] sm:$0xff] }
 0x51f   : > { %2192 = vperm.xlu1 %3531, %v2189_v38  }
 0x525   : > { %v2356_v39 = vpop.permute.xlu0 %2355  ;;  %v2376_v44 = vpop.permute.xlu1 %2375 }
 0x529   : > { %v2316_v45 = vpop.permute.xlu0 %2315  ;;  %v2336_v46 = vpop.permute.xlu1 %2335 }
 0x52d   : > { %v2276_v47 = vpop.permute.xlu0 %2275  ;;  %v2296_v48 = vpop.permute.xlu1 %2295 }
 0x531   : > { %v4502_v49 = vpop.permute.xlu0 %2235  ;;  %v2256_v51 = vpop.permute.xlu1 %2255 }
 0x535   : > { %v2380_v50 = vpop.permute.xlu0 %2379  ;;  %v2378_v63 = vpop.permute.xlu1 %2377 }
 0x536   : > { %2388 = vst.msk [vmem:[#allocation8 + $0xd0] sm:$0xff] %vm636_vm13, %v2380_v50  ;;  %v2381_v52 = vsel %vm797_vm5, %v2376_v44, %v2378_v63  ;;  %v2382_v4 = vsel %vm797_vm5, %v2378_v63, %v2380_v50 }
 0x537   : > { %2450 = vmatprep.subr.mxu0 %v2382_v4 }
 0x538   : > { %2451 = vmatpush1.msra.mxu0 %v2381_v52 }
 0x539   : > { %v2358_v53 = vpop.permute.xlu0 %2357  ;;  %v2360_v55 = vpop.permute.xlu1 %2359 }
 0x53a   : > { %v2361_v40 = vsel %vm776_vm6, %v2356_v39, %v2358_v53  ;;  %v2362_v58 = vsel %vm776_vm6, %v2358_v53, %v2360_v55  ;;  %2368 = vst.msk [vmem:[#allocation8 + $0xb8] sm:$0xff] %vm636_vm13, %v2360_v55 }
 0x53b   : > { %2452 = vmatprep.subr.mxu0 %v2362_v58 }
 0x53c   : > { %2453 = vmatpush1.msra.mxu0 %v2361_v40 }
 0x53d   : > { %v2340_v54 = vpop.permute.xlu0 %2339  ;;  %v2338_v61 = vpop.permute.xlu1 %2337  ;;  %v2417_v1 = vld [vmem:[#allocation8 + $0xd0] sm:$0xff] }
 0x53e   : > { %2348 = vst.msk [vmem:[#allocation8 + $0xa0] sm:$0xff] %vm636_vm13, %v2340_v54  ;;  %v2341_v42 = vsel %vm755_vm7, %v2336_v46, %v2338_v61  ;;  %v2342_v57 = vsel %vm755_vm7, %v2338_v61, %v2340_v54  ;;  %3416 = vmatprep.subr.mxu1 %v2417_v1 }
 0x53f   : > { %3417 = vmatpush3.msra.mxu1 %v2417_v1  ;;  %2454 = vmatprep.subr.mxu0 %v2342_v57 }
 0x540   : > { %2455 = vmatpush1.msra.mxu0 %v2341_v42 }
 0x541   : > { %v2318_v6 = vpop.permute.xlu0 %2317  ;;  %v2320_v7 = vpop.permute.xlu1 %2319  ;;  %v2414_v2 = vld [vmem:[#allocation8 + $0xb8] sm:$0xff] }
 0x542   : > { %v2321_v8 = vsel %vm734_vm8, %v2316_v45, %v2318_v6  ;;  %v2322_v3 = vsel %vm734_vm8, %v2318_v6, %v2320_v7  ;;  %2328 = vst.msk [vmem:[#allocation8 + $0x88] sm:$0xff] %vm636_vm13, %v2320_v7  ;;  %3418 = vmatprep.subr.mxu1 %v2414_v2 }
 0x543   : > { %3419 = vmatpush3.msra.mxu1 %v2414_v2  ;;  %2456 = vmatprep.subr.mxu0 %v2322_v3 }
 0x544   : > { %2457 = vmatpush1.msra.mxu0 %v2321_v8 }
 0x545   : > { %v2300_v9 = vpop.permute.xlu0 %2299  ;;  %v2298_v10 = vpop.permute.xlu1 %2297  ;;  %v2411_v5 = vld [vmem:[#allocation8 + $0xa0] sm:$0xff] }
 0x546   : > { %2308 = vst.msk [vmem:[#allocation8 + $0x70] sm:$0xff] %vm636_vm13, %v2300_v9  ;;  %v2301_v11 = vsel %vm713_vm9, %v2296_v48, %v2298_v10  ;;  %v2302_v12 = vsel %vm713_vm9, %v2298_v10, %v2300_v9  ;;  %3420 = vmatprep.subr.mxu1 %v2411_v5 }
 0x547   : > { %3421 = vmatpush3.msra.mxu1 %v2411_v5  ;;  %2458 = vmatprep.subr.mxu0 %v2302_v12 }
 0x548   : > { %2459 = vmatpush1.msra.mxu0 %v2301_v11 }
 0x549   : > { %v2278_v13 = vpop.permute.xlu0 %2277  ;;  %v2280_v15 = vpop.permute.xlu1 %2279  ;;  %v2408_v17 = vld [vmem:[#allocation8 + $0x88] sm:$0xff] }
 0x54a   : > { %v2281_v19 = vsel %vm692_vm10, %v2276_v47, %v2278_v13  ;;  %v2282_v20 = vsel %vm692_vm10, %v2278_v13, %v2280_v15  ;;  %2288 = vst.msk [vmem:[#allocation8 + $0x58] sm:$0xff] %vm636_vm13, %v2280_v15  ;;  %3422 = vmatprep.subr.mxu1 %v2408_v17 }
 0x54b   : > { %3423 = vmatpush3.msra.mxu1 %v2408_v17  ;;  %2460 = vmatprep.subr.mxu0 %v2282_v20 }
 0x54c   : > { %2461 = vmatpush1.msra.mxu0 %v2281_v19 }
 0x54d   : > { %v2260_v43 = vpop.permute.xlu0 %2259  ;;  %v2258_v62 = vpop.permute.xlu1 %2257  ;;  %v2405_v60 = vld [vmem:[#allocation8 + $0x70] sm:$0xff] }
 0x54e   : > { %2268 = vst.msk [vmem:[#allocation8 + $0x40] sm:$0xff] %vm636_vm13, %v2260_v43  ;;  %v2261_v18 = vsel %vm671_vm11, %v2256_v51, %v2258_v62  ;;  %v2262_v21 = vsel %vm671_vm11, %v2258_v62, %v2260_v43  ;;  %3424 = vmatprep.subr.mxu1 %v2405_v60 }
 0x54f   : > { %3425 = vmatpush3.msra.mxu1 %v2405_v60  ;;  %2462 = vmatprep.subr.mxu0 %v2262_v21 }
 0x550   : > { %2463 = vmatpush1.msra.mxu0 %v2261_v18 }
 0x551   : > { %v2238_v59 = vpop.permute.xlu0 %2237  ;;  %v2240_v24 = vpop.permute.xlu1 %2239  ;;  %v2402_v25 = vld [vmem:[#allocation8 + $0x58] sm:$0xff] }
 0x552   : > { %v2241_v27 = vsel %vm650_vm12, %v4502_v49, %v2238_v59  ;;  %v2242_v29 = vsel %vm650_vm12, %v2238_v59, %v2240_v24  ;;  %2248 = vst.msk [vmem:[#allocation8 + $0x28] sm:$0xff] %vm636_vm13, %v2240_v24  ;;  %3426 = vmatprep.subr.mxu1 %v2402_v25 }
 0x553   : > { %3427 = vmatpush3.msra.mxu1 %v2402_v25  ;;  %2464 = vmatprep.subr.mxu0 %v2242_v29  ;;  %v2764_v25 = vld [vmem:[#allocation8 + $0x10] sm:$0xff]  ;;  %v2186_v29 = vmul.f32 %v4373_v14, %v4373_v14 }
 0x554   : > { %2465 = vmatpush1.msra.mxu0 %v2241_v27 }
 0x555   : > { %v2727_v34 = vpop.permute.xlu0 %2726  ;;  %v2747_v35 = vpop.permute.xlu1 %2746  ;;  %v2399_v36 = vld [vmem:[#allocation8 + $0x40] sm:$0xff]  ;;  %2466 = vmatprep.subr.mxu0 %v4383_v56 }
 0x556   : > { %3428 = vmatprep.subr.mxu1 %v2399_v36  ;;  %2467 = vmatpush1.msra.mxu0 %v4387_v22 }
 0x557   : > { %3429 = vmatpush3.msra.mxu1 %v2399_v36  ;;  %3256 = vmatmul.mubr.msk.f32.vlgmr.msra.gmra.mxu0 %vm840_vm4, %v4427_v26 }
 0x558   : > { %2506 = vmatprep.mubr.f32.mxu0 %v3652_v0 }
 0x559   : > { %v2687_v38 = vpop.permute.xlu0 %2686  ;;  %v2707_v39 = vpop.permute.xlu1 %2706  ;;  %v2396_v44 = vld [vmem:[#allocation8 + $0x28] sm:$0xff] }
 0x55a   : > { %3430 = vmatprep.subr.mxu1 %v2396_v44 }
 0x55b   : > { %3431 = vmatpush3.msra.mxu1 %v2396_v44  ;;  %3257 = vmatmul.mubr.msk.f32.gmra.mxu0 %vm840_vm4, %v4536_v37 }
 0x55c   : > { %3432 = vmatprep.subr.mxu1 %v4442_v31  ;;  %2871 = vmatprep.mubr.f32.mxu0 %v3652_v0 }
 0x55d   : > { %v2647_v56 = vpop.permute.xlu0 %2646  ;;  %3433 = vmatpush3.msra.mxu1 %v4442_v31  ;;  %v2667_v22 = vpop.permute.xlu1 %2666 }
 0x55e   : > { %3435 = vmatmul.mubr.msk.f32.vlgmr.msra.gmra.mxu1 %vm840_vm4, %v4536_v37 }
 0x55f   : > { %3455 = vmatprep.mubr.msk.f32.mxu1 %vm840_vm4, %v4427_v26 }
 0x561   : > { %v2751_v45 = vpop.permute.xlu0 %2750  ;;  %v2627_v46 = vpop.permute.xlu1 %2626 }
 0x562   : > { %2759 = vst.msk [vmem:[#allocation8 + $0xd0] sm:$0xff] %vm636_vm13, %v2751_v45 }
 0x565   : > { %v2729_v47 = vpop.permute.xlu0 %2728  ;;  %v2749_v48 = vpop.permute.xlu1 %2748 }
 0x566   : > { %v2732_v49 = vsel %vm776_vm6, %v2727_v34, %v2729_v47  ;;  %v2752_v51 = vsel %vm797_vm5, %v2747_v35, %v2749_v48  ;;  %v2753_v50 = vsel %vm797_vm5, %v2749_v48, %v2751_v45 }
 0x567   : > { %2821 = vmatprep.subr.mxu0 %v2753_v50 }
 0x568   : > { %2822 = vmatpush1.msra.mxu0 %v2752_v51 }
 0x569   : > { %v2711_v31 = vpop.permute.xlu0 %2710  ;;  %v2731_v63 = vpop.permute.xlu1 %2730  ;;  %v2788_v52 = vld [vmem:[#allocation8 + $0xd0] sm:$0xff] }
 0x56a   : > { %2719 = vst.msk [vmem:[#allocation8 + $0xa0] sm:$0xff] %vm636_vm13, %v2711_v31  ;;  %v2733_v4 = vsel %vm776_vm6, %v2729_v47, %v2731_v63  ;;  %2739 = vst.msk [vmem:[#allocation8 + $0xb8] sm:$0xff] %vm636_vm13, %v2731_v63  ;;  %3437 = vmatprep.subr.mxu1 %v2788_v52 }
 0x56b   : > { %3438 = vmatpush3.msra.mxu1 %v2788_v52  ;;  %2823 = vmatprep.subr.mxu0 %v2733_v4 }
 0x56c   : > { %2824 = vmatpush1.msra.mxu0 %v2732_v49 }
 0x56d   : > { %v2689_v53 = vpop.permute.xlu0 %2688  ;;  %v2709_v55 = vpop.permute.xlu1 %2708 }
 0x56e   : > { %v2692_v40 = vsel %vm734_vm8, %v2687_v38, %v2689_v53  ;;  %v2712_v58 = vsel %vm755_vm7, %v2707_v39, %v2709_v55  ;;  %v2713_v54 = vsel %vm755_vm7, %v2709_v55, %v2711_v31 }
 0x56f   : > { %2825 = vmatprep.subr.mxu0 %v2713_v54  ;;  %v3559_v54 = vld [vmem:[%s3826_s21] sm:$0xff]  ;;  %s4789_s21 = sld [smem:[#allocation16_spill]] }
 0x570   : > { %2826 = vmatpush1.msra.mxu0 %v2712_v58  ;;  %v3558_v58 = vld [vmem:[%s3811_s19] sm:$0xff]  ;;  %s4790_s19 = sld [smem:[#allocation19_spill]] }
 0x571   : > { %v2671_v61 = vpop.permute.xlu0 %2670  ;;  %v2691_v1 = vpop.permute.xlu1 %2690  ;;  %v2785_v42 = vld [vmem:[#allocation8 + $0xb8] sm:$0xff]  ;;  %v2782_v6 = vld [vmem:[#allocation8 + $0xa0] sm:$0xff] }
 0x572   : > { %2679 = vst.msk [vmem:[#allocation8 + $0x70] sm:$0xff] %vm636_vm13, %v2671_v61  ;;  %v2693_v57 = vsel %vm734_vm8, %v2689_v53, %v2691_v1  ;;  %2699 = vst.msk [vmem:[#allocation8 + $0x88] sm:$0xff] %vm636_vm13, %v2691_v1  ;;  %3439 = vmatprep.subr.mxu1 %v2785_v42 }
 0x573   : > { %3440 = vmatpush3.msra.mxu1 %v2785_v42  ;;  %2827 = vmatprep.subr.mxu0 %v2693_v57 }
 0x574   : > { %3441 = vmatprep.subr.mxu1 %v2782_v6  ;;  %2828 = vmatpush1.msra.mxu0 %v2692_v40 }
 0x575   : > { %v2649_v7 = vpop.permute.xlu0 %2648  ;;  %3442 = vmatpush3.msra.mxu1 %v2782_v6  ;;  %v2669_v2 = vpop.permute.xlu1 %2668  ;;  %s4674_s29 = sand.u32 1, %s4789_s21  }
 0x576   : > { %v2652_v8 = vsel %vm692_vm10, %v2647_v56, %v2649_v7  ;;  %v2672_v3 = vsel %vm713_vm9, %v2667_v22, %v2669_v2  ;;  %v2673_v9 = vsel %vm713_vm9, %v2669_v2, %v2671_v61  ;;  %v444_v61 = vsub.f32 %v3558_v58, %v3559_v54  ;;  %s430_s17 = scalar_lea.vmem [#allocation11], %s4674_s29  ;;  %s3264_s18 = sshll.u32 %s4790_s19, 4 }
 0x577   : > { %2829 = vmatprep.subr.mxu0 %v2673_v9  ;;  %s3143_s0 = scalar_lea.hbm %s4792_s13, %s3264_s18  ;;  %s3145_s11 = sshll.u32 %s430_s17, 4  ;;  %s3146_s11 = int_to_ptr.vmem [resolvable:$true] %s3145_s11 }
 0x578   : > { %2830 = vmatpush1.msra.mxu0 %v2672_v3  ;;  %v445_v1 = vmul.f32 %v444_v61, %v444_v61  ;;  %s3120_s12 = scalar_lea.sflag [#allocation12], %s4674_s29  ;;  %s3560_s22 = scalar_lea.vmem %s3146_s11, 16 }
 0x579   : > { %v2631_v10 = vpop.permute.xlu0 %2630  ;;  %v2651_v5 = vpop.permute.xlu1 %2650  ;;  %v2779_v11 = vld [vmem:[#allocation8 + $0x88] sm:$0xff]  ;;  %v2776_v13 = vld [vmem:[#allocation8 + $0x70] sm:$0xff]  ;;  %p3561_p11 = scmp.ne.s32.totalorder %s3146_s11, %s3560_s22  ;;  %p3567_p0 = scmp.lt.s32.totalorder %s3146_s11, %s3565_s24 }
 0x57a   : > { %2639 = vst.msk [vmem:[#allocation8 + $0x40] sm:$0xff] %vm636_vm13, %v2631_v10  ;;  %v2653_v12 = vsel %vm692_vm10, %v2649_v7, %v2651_v5  ;;  %2659 = vst.msk [vmem:[#allocation8 + $0x58] sm:$0xff] %vm636_vm13, %v2651_v5  ;;  %3443 = vmatprep.subr.mxu1 %v2779_v11  ;;  %v447_v42 = vcombine.high %v445_v1, %v445_v1  ;;  %v450_v57 = vsel %vm449_vm2, %v445_v1, 0.0  ;;  %p3568_p1 = scmp.lt.s32.totalorder %s3566_s25, %s3560_s22 }
 0x57b   : > { %3444 = vmatpush3.msra.mxu1 %v2779_v11  ;;  %2831 = vmatprep.subr.mxu0 %v2653_v12  ;;  %p3562_p12 = pnand %p3561_p11, %p3785_p5 }
 0x57c   : > { %3445 = vmatprep.subr.mxu1 %v2776_v13  ;;  %2832 = vmatpush1.msra.mxu0 %v2652_v8  ;;  %v451_v6 = vsel %vm449_vm2, %v447_v42, 0.0  ;;  %p3569_p2 = por %p3568_p1, %p3567_p0 }
 0x57d   : > { %v2609_v15 = vpop.permute.xlu0 %2608  ;;  %3446 = vmatpush3.msra.mxu1 %v2776_v13  ;;  %v2629_v17 = vpop.permute.xlu1 %2628  ;;  %v452_v7 = vadd.f32 %v451_v6, %v450_v57  ;;  %p3563_p13 = pneg %p3562_p12 }
 0x57e   : > { %v2632_v19 = vsel %vm671_vm11, %v2627_v46, %v2629_v17  ;;  %v2633_v20 = vsel %vm671_vm11, %v2629_v17, %v2631_v10 }
 0x57f   : > { %2833 = vmatprep.subr.mxu0 %v2633_v20  ;;  %453 = vadd.xlane.f32.xlu0 %v452_v7  ;;  %p3570_p3 = pnand %p3569_p2, %p3563_p13 }
 0x580   : > { %2834 = vmatpush1.msra.mxu0 %v2632_v19 }
 0x581   : > { %v2607_v43 = vpop.permute.xlu0 %2606  ;;  %v2611_v62 = vpop.permute.xlu1 %2610  ;;  %v2773_v60 = vld [vmem:[#allocation8 + $0x58] sm:$0xff]  ;;  %v2770_v59 = vld [vmem:[#allocation8 + $0x40] sm:$0xff] }
 0x582   : > { %v2612_v18 = vsel %vm650_vm12, %v2607_v43, %v2609_v15  ;;  %v2613_v21 = vsel %vm650_vm12, %v2609_v15, %v2611_v62  ;;  %2619 = vst.msk [vmem:[#allocation8 + $0x28] sm:$0xff] %vm636_vm13, %v2611_v62  ;;  %3447 = vmatprep.subr.mxu1 %v2773_v60 }
 0x583   : > { %3448 = vmatpush3.msra.mxu1 %v2773_v60  ;;  %2835 = vmatprep.subr.mxu0 %v2613_v21 }
 0x584   : > { %3449 = vmatprep.subr.mxu1 %v2770_v59  ;;  %2836 = vmatpush1.msra.mxu0 %v2612_v18 }
 0x585   : > { %3450 = vmatpush3.msra.mxu1 %v2770_v59  ;;  %2837 = vmatprep.subr.mxu0 %v4434_v28 }
 0x586   : > { %2838 = vmatpush1.msra.mxu0 %v4445_v32 }
 0x587   : > { %3260 = vmatmul.mubr.msk.f32.vlgmr.msra.gmra.mxu0 %vm840_vm4, %v4427_v26  ;;  %v2188_v26 = vmul.f32 %v4378_v41, %v4378_v41 }
 0x588   : > { %2877 = vmatprep.mubr.f32.mxu0 %v3652_v0  ;;  %v2187_v0 = vmul.f32 %v4375_v16, %v4375_v16 }
 0x589   : > { %v2767_v24 = vld [vmem:[#allocation8 + $0x28] sm:$0xff] }
 0x58a   : > { %3451 = vmatprep.subr.mxu1 %v2767_v24 }
 0x58b   : > { %3452 = vmatpush3.msra.mxu1 %v2767_v24  ;;  %3261 = vmatmul.mubr.msk.f32.gmra.mxu0 %vm840_vm4, %v4536_v37 }
 0x58c   : > { %3453 = vmatprep.subr.mxu1 %v2764_v25 }
 0x58d   : > { %3454 = vmatpush3.msra.mxu1 %v2764_v25 }
 0x58e   : > { %3456 = vmatmul.mubr.msk.f32.vlgmr.msra.gmra.mxu1 %vm840_vm4, %v4536_v37  ;;  %v2423_v28 = vpop.permute.xlu1 %2422  ;;  %v2428_v5 = vpop.permute.xlu0 %2427 }
 0x592   : > { %v4581_v27 = vpop.permute.xlu1 %2793 }
 0x596   : > { %v4583_v32 = vpop.permute.xlu1 %3063 }
 0x59a   : > { %v2193_v34 = vpop.permute.xlu1 %2192 }
 0x59b   : > { %v2195_v35 = vmul.f32 %v2193_v34, %v2186_v29  ;;  %v2196_v36 = vmul.f32 %v2193_v34, %v2187_v0  ;;  %v2197_v38 = vmul.f32 %v2193_v34, %v2188_v26 }
 0x59d   : > { %v2198_v39 = vrot.slane %v2195_v35, 4  ;;  %v2204_v37 = vrot.slane %v2196_v36, 4  ;;  %v2210_v44 = vsel %vm636_vm13, %v2197_v38, 0.0 }
 0x59e   : > { %v2211_v56 = vrot.slane %v2210_v44, 4 }
 0x59f   : > { %v2199_v22 = vadd.f32 %v2198_v39, %v2195_v35  ;;  %v2205_v45 = vadd.f32 %v2204_v37, %v2196_v36 }
 0x5a0   : > { %v2212_v46 = vadd.f32 %v2211_v56, %v2210_v44 }
 0x5a1   : > { %v2200_v47 = vrot.slane %v2199_v22, 2  ;;  %v2206_v16 = vrot.slane %v2205_v45, 2 }
 0x5a2   : > { %v2213_v41 = vrot.slane %v2212_v46, 2 }
 0x5a3   : > { %v2201_v48 = vadd.f32 %v2200_v47, %v2199_v22  ;;  %v2207_v49 = vadd.f32 %v2206_v16, %v2205_v45 }
 0x5a4   : > { %v2214_v14 = vadd.f32 %v2213_v41, %v2212_v46 }
 0x5a5   : > { %v2202_v51 = vrot.slane %v2201_v48, 1  ;;  %v2208_v50 = vrot.slane %v2207_v49, 1 }
 0x5a6   : > { %v2215_v31 = vrot.slane %v2214_v14, 1 }
 0x5a7   : > { %v2203_v63 = vadd.f32 %v2202_v51, %v2201_v48  ;;  %v2209_v52 = vadd.f32 %v2208_v50, %v2207_v49  ;;  %v2799_v48 = vpop.permute.xlu0 %2798 }
 0x5a8   : > { %v2216_v4 = vadd.f32 %v2215_v31, %v2214_v14 }
 0x5a9   : > { %v2217_v53 = vadd.f32 %v2209_v52, %v2203_v63 }
 0x5aa   : > { %v2218_v55 = vsel %vm636_vm13, %v2216_v4, 0.0 }
 0x5ab   : > { %v2219_v40 = vadd.f32 %v2218_v55, %v2217_v53 }
 0x5ad   : > { %2220 = vadd.xlane.f32.xlu1 %v2219_v40 }
 0x617   : > { %v2502_v2 = vpop.f32.mrf.mxu0 }
 0x618   : > { %v2503_v15 = vadd.f32 %v2502_v2, %v2423_v28 }
 0x619   : > { %v2504_v8 = vpop.f32.mrf.mxu0 }
 0x61a   : > { %v2505_v19 = vadd.f32 %v2504_v8, %v2423_v28  ;;  %v4601_v60 = vmax.f32 %v2503_v15, 0.0 }
 0x61b   : > { %v2508_v3 = vpop.f32.mrf.mxu0 }
 0x61c   : > { %v2509_v12 = vadd.f32 %v2508_v3, %v2428_v5  ;;  %v4605_v21 = vmax.f32 %v2505_v19, 0.0 }
 0x61d   : > { %v2510_v10 = vpop.f32.mrf.mxu0 }
 0x61e   : > { %v3436_v9 = vpop.f32.mrf.mxu1  ;;  %v2511_v13 = vadd.f32 %v2510_v10, %v2428_v5  ;;  %v4597_v43 = vmax.f32 %v2509_v12, 0.0  ;;  %v2966_v26 = vmul.f32 %v4605_v21, %v4605_v21 }
 0x61f   : > { %v2585_v20 = vadd.f32 %v3436_v9, %v2428_v5 }
 0x620   : > { %v2579_v11 = vpop.f32.mrf.mxu1  ;;  %v4599_v62 = vmax.f32 %v2511_v13, 0.0  ;;  %v2968_v24 = vmul.f32 %v4597_v43, %v4597_v43 }
 0x621   : > { %v2580_v17 = vadd.f32 %v2579_v11, %v2423_v28  ;;  %v4607_v59 = vmax.f32 %v2585_v20, 0.0  ;;  %v2965_v28 = vmul.f32 %v4601_v60, %v4601_v60 }
 0x622   : > { %v2969_v25 = vmul.f32 %v4599_v62, %v4599_v62 }
 0x623   : > { %v4603_v18 = vmax.f32 %v2580_v17, 0.0  ;;  %v2970_v29 = vmul.f32 %v4607_v59, %v4607_v59  ;;  %v2971_v34 = vadd.f32 %v2968_v24, %v2965_v28 }
 0x624   : > { %v2978_v35 = vadd.f32 %v2969_v25, %v2966_v26 }
 0x625   : > { %v2967_v0 = vmul.f32 %v4603_v18, %v4603_v18  ;;  %v2986_v38 = vsel %vm636_vm13, %v2970_v29, 0.0  ;;  %v2972_v39 = vrot.slane %v2971_v34, 4 }
 0x626   : > { %v2979_v44 = vrot.slane %v2978_v35, 4 }
 0x627   : > { %v2985_v36 = vsel %vm636_vm13, %v2967_v0, 0.0  ;;  %v2973_v22 = vadd.f32 %v2972_v39, %v2971_v34 }
 0x628   : > { %v2987_v37 = vadd.f32 %v2986_v38, %v2985_v36  ;;  %v2980_v47 = vadd.f32 %v2979_v44, %v2978_v35 }
 0x629   : > { %v2974_v14 = vrot.slane %v2973_v22, 2 }
 0x62a   : > { %v2988_v46 = vrot.slane %v2987_v37, 4  ;;  %v2981_v63 = vrot.slane %v2980_v47, 2 }
 0x62b   : > { %v2975_v54 = vadd.f32 %v2974_v14, %v2973_v22 }
 0x62c   : > { %v2989_v31 = vadd.f32 %v2988_v46, %v2987_v37  ;;  %v2982_v7 = vadd.f32 %v2981_v63, %v2980_v47 }
 0x62d   : > { %v2976_v12 = vrot.slane %v2975_v54, 1 }
 0x62e   : > { %v2990_v6 = vrot.slane %v2989_v31, 2  ;;  %v2983_v19 = vrot.slane %v2982_v7, 1 }
 0x62f   : > { %v2977_v0 = vadd.f32 %v2976_v12, %v2975_v54 }
 0x630   : > { %v2991_v17 = vadd.f32 %v2990_v6, %v2989_v31  ;;  %v2984_v36 = vadd.f32 %v2983_v19, %v2982_v7 }
 0x631   : > { %v2994_v44 = vadd.f32 1e-20, %v2977_v0 }
 0x632   : > { %v2992_v35 = vrot.slane %v2991_v17, 1  ;;  %v2995_v47 = vadd.f32 1e-20, %v2984_v36 }
 0x633   : > { %3546 = vrsqrt.f32 %v2994_v44 }
 0x634   : > { %v2993_v46 = vadd.f32 %v2992_v35, %v2991_v17  ;;  %3548 = vrsqrt.f32 %v2995_v47 }
 0x636   : > { %v2996_v31 = vadd.f32 1e-20, %v2993_v46 }
 0x647   : > { %v2873_v56 = vpop.f32.mrf.mxu0 }
 0x648   : > { %v2874_v45 = vadd.f32 %v2873_v56, %v4581_v27 }
 0x649   : > { %v2875_v16 = vpop.f32.mrf.mxu0 }
 0x64a   : > { %v2876_v41 = vadd.f32 %v2875_v16, %v4581_v27  ;;  %v4625_v51 = vmax.f32 %v2874_v45, 0.0 }
 0x64b   : > { %v2879_v49 = vpop.f32.mrf.mxu0 }
 0x64c   : > { %v2880_v50 = vadd.f32 %v2879_v49, %v2799_v48  ;;  %v4627_v53 = vmax.f32 %v2876_v41, 0.0  ;;  %v3006_v61 = vmul.f32 %v4625_v51, %v4625_v51 }
 0x64d   : > { %v2881_v52 = vpop.f32.mrf.mxu0 }
 0x64e   : > { %v3457_v4 = vpop.f32.mrf.mxu1  ;;  %v4629_v55 = vmax.f32 %v2880_v50, 0.0  ;;  %v2882_v40 = vadd.f32 %v2881_v52, %v2799_v48  ;;  %v3007_v3 = vmul.f32 %v4627_v53, %v4627_v53 }
 0x64f   : > { %v2956_v58 = vadd.f32 %v3457_v4, %v2799_v48 }
 0x650   : > { %v2950_v1 = vpop.f32.mrf.mxu1  ;;  %v3009_v42 = vmul.f32 %v4629_v55, %v4629_v55  ;;  %v4635_v57 = vmax.f32 %v2882_v40, 0.0 }
 0x651   : > { %v4637_v2 = vmax.f32 %v2956_v58, 0.0  ;;  %v2951_v8 = vadd.f32 %v2950_v1, %v4581_v27  ;;  %v3547_v58 = vpop.eup %3546 }
 0x652   : > { %v3012_v9 = vadd.f32 %v3009_v42, %v3006_v61  ;;  %v3010_v10 = vmul.f32 %v4635_v57, %v4635_v57  ;;  %v3549_v54 = vpop.eup %3548  ;;  %v3003_v1 = vmul.f32 %v3547_v58, %v4597_v43  ;;  %v3000_v42 = vmul.f32 %v3547_v58, %v4601_v60 }
 0x653   : > { %v3011_v5 = vmul.f32 %v4637_v2, %v4637_v2  ;;  %v4646_v11 = vmax.f32 %v2951_v8, 0.0 }
 0x654   : > { %v3013_v13 = vrot.slane %v3012_v9, 4  ;;  %v3019_v15 = vadd.f32 %v3010_v10, %v3007_v3  ;;  %v3004_v3 = vmul.f32 %v3549_v54, %v4599_v62 }
 0x655   : > { %v3008_v27 = vmul.f32 %v4646_v11, %v4646_v11  ;;  %v3027_v25 = vsel %vm636_vm13, %v3011_v5, 0.0 }
 0x656   : > { %v3014_v20 = vadd.f32 %v3013_v13, %v3012_v9  ;;  %v3020_v24 = vrot.slane %v3019_v15, 4  ;;  %v3001_v9 = vmul.f32 %v3549_v54, %v4605_v21 }
 0x657   : > { %v3026_v28 = vsel %vm636_vm13, %v3008_v27, 0.0 }
 0x658   : > { %v3028_v26 = vadd.f32 %v3027_v25, %v3026_v28  ;;  %v3015_v29 = vrot.slane %v3014_v20, 2  ;;  %v3021_v34 = vadd.f32 %v3020_v24, %v3019_v15 }
 0x65a   : > { %v3029_v38 = vrot.slane %v3028_v26, 4  ;;  %v3016_v39 = vadd.f32 %v3015_v29, %v3014_v20  ;;  %v3022_v37 = vrot.slane %v3021_v34, 2 }
 0x65c   : > { %v3030_v56 = vadd.f32 %v3029_v38, %v3028_v26  ;;  %v3017_v22 = vrot.slane %v3016_v39, 1  ;;  %v3023_v45 = vadd.f32 %v3022_v37, %v3021_v34 }
 0x65e   : > { %v3031_v16 = vrot.slane %v3030_v56, 2  ;;  %v3018_v41 = vadd.f32 %v3017_v22, %v3016_v39  ;;  %v3024_v48 = vrot.slane %v3023_v45, 1 }
 0x660   : > { %v3032_v49 = vadd.f32 %v3031_v16, %v3030_v56  ;;  %v3035_v14 = vadd.f32 1e-20, %v3018_v41  ;;  %v3025_v50 = vadd.f32 %v3024_v48, %v3023_v45 }
 0x662   : > { %v3033_v63 = vrot.slane %v3032_v49, 1  ;;  %3550 = vrsqrt.f32 %v3035_v14  ;;  %v3036_v52 = vadd.f32 1e-20, %v3025_v50 }
 0x664   : > { %v3034_v4 = vadd.f32 %v3033_v63, %v3032_v49  ;;  %3552 = vrsqrt.f32 %v3036_v52 }
 0x665   : > { %3554 = vrsqrt.f32 %v2996_v31 }
 0x666   : > { %v3037_v40 = vadd.f32 1e-20, %v3034_v4 }
 0x668   : > { %3556 = vrsqrt.f32 %v3037_v40 }
 0x66f   : > { %v3551_v61 = vpop.eup %3550 }
 0x670   : > { %v3041_v6 = vmul.f32 %v3551_v61, %v4625_v51  ;;  %v3044_v7 = vmul.f32 %v3551_v61, %v4629_v55  ;;  %v3069_v51 = vpop.permute.xlu0 %3068 }
 0x671   : > { %v3553_v8 = vpop.eup %3552 }
 0x672   : > { %v3555_v10 = vpop.eup %3554  ;;  %v3047_v5 = vsub.f32 %v3000_v42, %v3041_v6  ;;  %v3050_v12 = vsub.f32 %v3003_v1, %v3044_v7  ;;  %v3042_v13 = vmul.f32 %v3553_v8, %v4627_v53  ;;  %v3045_v15 = vmul.f32 %v3553_v8, %v4635_v57 }
 0x673   : > { %v3002_v55 = vmul.f32 %v3555_v10, %v4603_v18  ;;  %v3005_v20 = vmul.f32 %v3555_v10, %v4607_v59 }
 0x674   : > { %v3053_v17 = vmul.f32 %v3047_v5, %v3047_v5  ;;  %v3056_v43 = vmul.f32 %v3050_v12, %v3050_v12  ;;  %v3048_v19 = vsub.f32 %v3001_v9, %v3042_v13  ;;  %v3051_v60 = vsub.f32 %v3004_v3, %v3045_v15  ;;  %v454_v42 = vpop.xlane.xlu0 %453 }
 0x675   : > { %v3557_v27 = vpop.eup %3556  ;;  %v455_v7 = vsel %vm449_vm2, %v454_v42, 0.0 }
 0x676   : > { %v3043_v62 = vmul.f32 %v3557_v27, %v4646_v11  ;;  %v3046_v21 = vmul.f32 %v3557_v27, %v4637_v2  ;;  %v3071_v24 = vmul.f32 %v4583_v32, %v3053_v17  ;;  %v3074_v25 = vmul.f32 %v3069_v51, %v3056_v43 }
 0x677   : > { %v3054_v53 = vmul.f32 %v3048_v19, %v3048_v19  ;;  %v3057_v28 = vmul.f32 %v3051_v60, %v3051_v60  ;;  %v456_v3 = vrot.slane %v455_v7, 4 }
 0x678   : > { %v3049_v57 = vsub.f32 %v3002_v55, %v3043_v62  ;;  %v3052_v0 = vsub.f32 %v3005_v20, %v3046_v21  ;;  %v3077_v26 = vadd.f32 %v3074_v25, %v3071_v24 }
 0x679   : > { %v3072_v29 = vmul.f32 %v4583_v32, %v3054_v53  ;;  %v3075_v34 = vmul.f32 %v3069_v51, %v3057_v28 }
 0x67a   : > { %v3055_v35 = vmul.f32 %v3049_v57, %v3049_v57  ;;  %v3058_v36 = vmul.f32 %v3052_v0, %v3052_v0  ;;  %v3078_v18 = vrot.slane %v3077_v26, 4 }
 0x67b   : > { %v3084_v38 = vadd.f32 %v3075_v34, %v3072_v29 }
 0x67c   : > { %v3073_v59 = vmul.f32 %v4583_v32, %v3055_v35  ;;  %v3076_v11 = vmul.f32 %v3069_v51, %v3058_v36  ;;  %v3079_v39 = vadd.f32 %v3078_v18, %v3077_v26 }
 0x67d   : > { %v3085_v2 = vrot.slane %v3084_v38, 4 }
 0x67e   : > { %v3091_v37 = vsel %vm636_vm13, %v3073_v59, 0.0  ;;  %v3092_v44 = vsel %vm636_vm13, %v3076_v11, 0.0  ;;  %v3080_v56 = vrot.slane %v3079_v39, 2  ;;  %vm3103_vm13 = vcmask 1040384  }
 0x67f   : > { %v3093_v22 = vadd.f32 %v3092_v44, %v3091_v37  ;;  %v3086_v45 = vadd.f32 %v3085_v2, %v3084_v38 }
 0x680   : > { %v3081_v46 = vadd.f32 %v3080_v56, %v3079_v39 }
 0x681   : > { %v3094_v47 = vrot.slane %v3093_v22, 4  ;;  %v3087_v16 = vrot.slane %v3086_v45, 2 }
 0x682   : > { %v3082_v41 = vrot.slane %v3081_v46, 1 }
 0x683   : > { %v3095_v48 = vadd.f32 %v3094_v47, %v3093_v22  ;;  %v3088_v49 = vadd.f32 %v3087_v16, %v3086_v45 }
 0x684   : > { %v3083_v14 = vadd.f32 %v3082_v41, %v3081_v46 }
 0x685   : > { %v3089_v50 = vrot.slane %v3088_v49, 1  ;;  %v3096_v31 = vrot.slane %v3095_v48, 2 }
 0x686   : > { %v3100_v4 = vmul.f32 %v3083_v14, %v4135_v30  ;;  %v457_v30 = vadd.f32 %v456_v3, %v455_v7 }
 0x687   : > { %v3090_v32 = vadd.f32 %v3089_v50, %v3088_v49  ;;  %v3097_v63 = vadd.f32 %v3096_v31, %v3095_v48 }
 0x688   : > { %v3104_v1 = vsel %vm3103_vm13, %v3100_v4, 0.0 }
 0x689   : > { %v3098_v52 = vrot.slane %v3097_v63, 1  ;;  %v3101_v40 = vmul.f32 %v3090_v32, %v4137_v33  ;;  %v458_v33 = vrot.slane %v457_v30, 2 }
 0x68b   : > { %v3099_v58 = vadd.f32 %v3098_v52, %v3097_v63  ;;  %v3105_v54 = vsel %vm3103_vm13, %v3101_v40, 0.0  ;;  %v459_v10 = vadd.f32 %v458_v33, %v457_v30 }
 0x68c   : > { %v3106_v6 = vadd.f32 %v3105_v54, %v3104_v1 }
 0x68d   : > { %v3102_v61 = vmul.f32 %v3099_v58, %v4127_v23  ;;  %v460_v5 = vrot.slane %v459_v10, 1 }
 0x68f   : > { %v3108_v8 = vsel %vm3107_vm3, %v3102_v61, 0.0  ;;  %v461_v23 = vadd.f32 %v460_v5, %v459_v10 }
 0x690   : > { %v3109_v9 = vadd.f32 %v3108_v8, %v3106_v6 }
 0x691   : > { %462 = vst [vmem:[%s430_s17] sm:$0x1] %v461_v23 }
 0x692   : > { %3110 = vadd.xlane.f32.xlu0 %v3109_v9 }
 0x693   : > { %3573 = shalt.err (!%p3570_p3)
}
 0x694   : > { %s3574_s14 = scalar_lea.hbm %s3143_s0, 16  ;;  %s3578_s20 = scalar_lea.hbm %s4792_s13, 32 }
 0x695   : > { %p3575_p4 = scmp.ne.s32.totalorder %s3143_s0, %s3574_s14  ;;  %p3579_p9 = scmp.lt.s32.totalorder %s3143_s0, %s4792_s13 }
 0x696   : > { %p3580_p10 = scmp.lt.s32.totalorder %s3578_s20, %s3574_s14 }
 0x697   : > { %p3576_p7 = pnand %p3575_p4, %p3785_p5 }
 0x698   : > { %p3581_p11 = por %p3580_p10, %p3579_p9 }
 0x699   : > { %p3577_p8 = pneg %p3576_p7 }
 0x69b   : > { %p3582_p12 = pnand %p3581_p11, %p3577_p8 }
 0x69d   : > { %3585 = shalt.err (!%p3582_p12)
}
 0x69e   : > { %3459 = dma.vmem_to_hbm [thread:$0]  (%p3785_p5), %s3146_s11, 16, %s3143_s0, %s3120_s12   ;;  %v2221_v12 = vpop.xlane.xlu1 %2220 }
 0x69f   : > { %s424_s17 = scalar_lea.vmem [#allocation9], %s4674_s29  ;;  %v2222_v15 = vmul.f32 0.00390625, %v2221_v12  ;;  %s4793_s23 = sld [smem:[#allocation25_spill]] }
 0x6a0   : > { %s3132_s15 = sshll.u32 %s424_s17, 4  ;;  %s3116_s14 = scalar_lea.sflag [#allocation10], %s4674_s29  ;;  %s3133_s15 = int_to_ptr.vmem [resolvable:$true] %s3132_s15 }
 0x6a1   : > { %s3586_s27 = scalar_lea.vmem %s3133_s15, 16  ;;  %s3681_s0 = smov [#allocation9]  }
 0x6a2   : > { %p3587_p13 = scmp.ne.s32.totalorder %s3133_s15, %s3586_s27  ;;  %s3590_s11 = sshll.u32 %s3681_s0, 4  ;;  %s3591_s11 = int_to_ptr.vmem [resolvable:$false] %s3590_s11 }
 0x6a3   : > { %s3592_s12 = scalar_lea.vmem %s3591_s11, 32  ;;  %p3593_p2 = scmp.lt.s32.totalorder %s3133_s15, %s3591_s11 }
 0x6a4   : > { %p3588_p0 = pnand %p3587_p13, %p3785_p5  ;;  %p3594_p3 = scmp.lt.s32.totalorder %s3592_s12, %s3586_s27 }
 0x6a5   : > { %s4794_s25 = smov %s4793_s23  ;;  %s3130_s24 = scalar_lea.hbm %s4793_s23, %s3264_s18 }
 0x6a6   : > { %p3589_p1 = pneg %p3588_p0  ;;  %p3595_p4 = por %p3594_p3, %p3593_p2 }
 0x6a8   : > { %p3596_p7 = pnand %p3595_p4, %p3589_p1 }
 0x71b   : > { %v3111_v13 = vpop.xlane.xlu0 %3110 }
 0x71c   : > { %v3112_v17 = vmul.f32 0.00390625, %v3111_v13 }
 0x71e   : > { %v3113_v43 = vadd.f32 %v3112_v17, %v2222_v15 }
 0x720   : > { %3114 = vst [vmem:[%s424_s17] sm:$0x1] %v3113_v43 }
 0x721   : > { %3599 = shalt.err (!%p3596_p7)
}
 0x722   : > { %s3600_s19 = scalar_lea.hbm %s3130_s24, 16  ;;  %s3604_s16 = scalar_lea.hbm %s4794_s25, 32 }
 0x723   : > { %p3601_p8 = scmp.ne.s32.totalorder %s3130_s24, %s3600_s19  ;;  %p3605_p11 = scmp.lt.s32.totalorder %s3130_s24, %s4794_s25 }
 0x724   : > { %p3606_p12 = scmp.lt.s32.totalorder %s3604_s16, %s3600_s19 }
 0x725   : > { %p3602_p9 = pnand %p3601_p8, %p3785_p5 }
 0x726   : > { %p3607_p13 = por %p3606_p12, %p3605_p11 }
 0x727   : > { %p3603_p10 = pneg %p3602_p9 }
 0x729   : > { %p3608_p0 = pnand %p3607_p13, %p3603_p10 }
 0x72b   : > { %3611 = shalt.err (!%p3608_p0)
}
 0x72c   : > { %3458 = dma.vmem_to_hbm [thread:$0]  (%p3785_p5), %s3133_s15, 16, %s3130_s24, %s3116_s14  }
 0x72d PF: > { %s4795_s21 = sld [smem:[#allocation18_spill]] }
 0x72e   : > { %s4796_s17 = sld [smem:[#allocation15_spill]] }
 0x733   : > { %p3469_p1 = scmp.ge.s32.totalorder %s4795_s21, 2 }
 0x734   : > { %s3157_s22 = sand.u32 1, %s4796_s17  }
 0x735   : > { %p3463_p2 = pnand %p3469_p1, %p3789_p6  ;;  %s3158_s23 = scalar_lea.sflag [#allocation10], %s3157_s22 }
 0x737   : > { %p3464_p3 = pneg %p3463_p2 }
 0x739   : > { %3629 = dma.done.wait (%p3464_p3), %s3158_s23, 16  }
 0x73a   : > { %3631 = vsyncadd (%p3464_p3), %s3158_s23, 4294967280  ;;  %s3166_s27 = scalar_lea.sflag [#allocation12], %s3157_s22 }
 0x73b   : > { %3633 = dma.done.wait (%p3464_p3), %s3166_s27, 16  }
 0x73c   : > { %3635 = vsyncadd (%p3464_p3), %s3166_s27, 4294967280  ;;  %s4798_s24 = sld [smem:[#allocation20_spill]] }
 0x73d   : > { %s4799_s21 = sld [smem:[#allocation16_spill]] }
 0x73e   : > { %s4800_s22 = sld [smem:[#allocation17_spill]] }
 0x73f   : > { %s4801_s23 = sld [smem:[#allocation21_spill]] }
 0x742   : > { %p26_p5 = scmp.ge.s32.totalorder %s4798_s24, 4  }
 0x744   :  { %28 = sbr.rel (!%p26_p5) target bundleno = 9 (0x9), region = 119 }
 0x749   :  { %3170 = vsyncpa [#allocation10], 1 }
 0x74a   :  { %3172 = vsyncpa [#allocation10 + $0x1], 1 }
 0x74b   :  { %3173 = vsyncpa [#allocation12], 1 }
 0x74c   :  { %3175 = vsyncpa [#allocation12 + $0x1], 1 }

</bundles_post_ra>
